<compile_context>
chip_gen: v5e
topology: v5e:2x2
jax: 0.10.0
libtpu: 0.0.40
codegen_flags: <defaults>
</compile_context>

<pallas_src>
import functools
import math

import jax
import jax.numpy as jnp
from jax.experimental import pallas as pl
from jax.experimental.pallas import tpu as pltpu

CLIPMIN = 1e-05
_LOG2_OFFSET = 0.5 - math.log2(1.5)   # folds "/1.5 ... + 0.5" into a single add
_LANE = 128
_MAX_BLOCK_ROWS = 4096                # caps the unrolled lane-dense relayout at 32 chunks


def _cdiv(a, b):
    return -(-a // b)


def _vmem_capacity_bytes():
    """Physical VMEM of this generation (64 MiB v7x, 128 MiB v5e/v6e); conservative fallback."""
    try:
        cap = int(pltpu.get_tpu_info().vmem_capacity_bytes)
        if cap > 0:
            return cap
    except Exception:
        pass
    return 64 << 20


def _store_scale_lane_dense(scale_col, scale_ref):
    """Write the per-row scale column (block_rows, 1) into the lane-dense
    (1, 1, block_rows) output block.

    Per-row reductions naturally land in the sublane axis; moving them into lanes is a
    sublane->lane relayout, done here in 128-row chunks with vanilla ops only
    (lane broadcast + one-hot select + sublane-axis sum -> exact).  ~31 VALU/XLU ops per
    chunk (hidden under the HBM DMA) replace block_rows/8 masked stores and a
    4-byte/row strided writeback DMA with a few dense vregs + one contiguous DMA.
    """
    block_rows = scale_col.shape[0]
    # (128,128) one-hot mask, hoisted out of the chunk loop (JAX doesn't CSE iota/bcast).
    i0 = jax.lax.broadcasted_iota(jnp.int32, (_LANE, _LANE), 0)
    i1 = jax.lax.broadcasted_iota(jnp.int32, (_LANE, _LANE), 1)
    onehot = (i0 == i1).astype(jnp.float32)
    for c in range(block_rows // _LANE):
        col = scale_col[c * _LANE:(c + 1) * _LANE, :]                 # (128, 1)
        row = jnp.sum(jnp.broadcast_to(col, (_LANE, _LANE)) * onehot,
                      axis=0, keepdims=True)                          # (1, 128), exact
        scale_ref[:, :, pl.ds(c * _LANE, _LANE)] = row.reshape(1, 1, _LANE)


def _exp_affine_quant_kernel(x_ref, xq_ref, scale_ref, *, qmax, exact_pow2):
    x_nat = x_ref[...]

    # --- per_channel_dynamic_calibration ----------------------------------------------
    # max(|xmax|, |xmin|) == max(|x|): one fused lane-reduction instead of min+max+abs+max.
    abs_max = jnp.max(jnp.abs(x_nat), axis=-1, keepdims=True).astype(jnp.float32)
    # (qmax - qmin) == 2*qmax is a power of two: multiplying by its reciprocal is exact,
    # unless that reciprocal is subnormal (n_bits=8 -> 2**-127), where we keep the divide.
    inv_qrange = 0.5 / qmax
    if inv_qrange >= 2.0 ** -126:
        scale = jnp.clip(abs_max * jnp.float32(inv_qrange), CLIPMIN, 10000.0)
    else:
        scale = jnp.clip(abs_max / jnp.float32(2.0 * qmax), CLIPMIN, 10000.0)
    # scale: (block_rows, 1), fp32

    # --- FakeQuant.forward ---------------------------------------------------------------
    x = x_nat.astype(jnp.float32)
    inv_scale = 1.0 / scale              # exact reciprocal once per ROW (lane-sparse, cheap)
    q = x * inv_scale                    # broadcast multiply instead of per-element divide
    q_abs = jnp.abs(q)
    q_0_idx = q_abs < 0.5
    q_abs = jnp.clip(q_abs, 0.0001, 10000.0)

    if exact_pow2:
        # Literal log2 / round / exp2 chain (EUP transcendentals) — validation mode.
        q_thresh = jnp.log2(q_abs) + jnp.float32(_LOG2_OFFSET)
        q_thresh = jnp.where(q_thresh < -0.5, jnp.zeros_like(q_thresh), q_thresh)
        q_exp = jnp.exp2(jnp.round(q_thresh))          # round-half-to-even == torch.round
    else:
        # Default (all generations): for normal floats, 2**round(log2(q_abs/1.5)+0.5)
        # equals the exponent bits of q_abs*(4/3); the "q_thresh < -0.5 -> q_exp = 1"
        # override becomes a max with 1.  Differs from the transcendental formulation
        # only at ULP-edge inputs on the 0.75*2^k decision boundaries.
        t = q_abs * jnp.float32(4.0 / 3.0)
        pow2 = pltpu.bitcast(
            pltpu.bitcast(t, jnp.uint32) & jnp.uint32(0x7F800000), jnp.float32)
        q_exp = jnp.maximum(pow2, 1.0)

    q_exp = jnp.where(q_0_idx, jnp.zeros_like(q_exp), q_exp)

    # clamp(q_exp, qmin, qmax): the lower bound never binds (q_exp >= 0 > qmin), and when
    # qmax >= 1e4 the upper bound is statically dead too (q_abs <= 1e4 => q_exp <= 2**13).
    if qmax < 10000.0:
        q_exp = jnp.minimum(q_exp, qmax)

    # sign(q) == sign(x) since inv_scale > 0: copy x's sign bit onto the magnitude.
    # Exact: (-a)*b == -(a*b); q == 0 is already forced to 0 by q_0_idx (only x == -0.0
    # differs from the reference: -0.0 instead of +0.0).
    magnitude = q_exp * scale                                           # >= 0
    sign_bit = pltpu.bitcast(x, jnp.uint32) & jnp.uint32(0x80000000)
    x_dequant = pltpu.bitcast(
        pltpu.bitcast(magnitude, jnp.uint32) | sign_bit, jnp.float32)

    xq_ref[...] = x_dequant.astype(xq_ref.dtype)

    # Lane-dense scale writeback (pad rows of the remainder block land past `rows` and
    # are sliced off in the wrapper).
    _store_scale_lane_dense(scale, scale_ref)


def _pick_block_rows(rows, cols, vmem_cap_bytes):
    """Row tile: a multiple of 128 (keeps the lane-dense scale layout and the (8,128)
    rule trivially satisfied), sized so the f32 working tile is a few MiB (measured
    ~85% of HBM roofline from ~2 MiB tiles up), with >= 2 row blocks when rows allow
    (v7x has 2 TensorCores; v5e/v6e gain nothing from extra grid steps), preferring an
    even block count so the parallel axis splits evenly across the two v7x cores."""
    f32_row_bytes = max(1, cols) * 4
    target_f32_bytes = (6 << 20) if vmem_cap_bytes >= (96 << 20) else (3 << 20)
    br = (target_f32_bytes // f32_row_bytes) // _LANE * _LANE
    br = max(_LANE, min(br, _MAX_BLOCK_ROWS, _cdiv(rows, _LANE) * _LANE))
    if rows > _LANE:
        half = _cdiv(_cdiv(rows, 2), _LANE) * _LANE       # keep >= 2 row blocks
        br = min(br, max(_LANE, half))
    nb = _cdiv(rows, br)
    if nb > 1 and nb % 2 == 1:                            # prefer an even block count
        br_even = max(_LANE, _cdiv(_cdiv(rows, nb + 1), _LANE) * _LANE)
        if _cdiv(rows, br_even) % 2 == 0:
            br = br_even
    return int(br)


def exp_affine_quantize(x, n_bits=8, block_rows=None, exact_pow2=False):
    """ExpAffineQuantizer.forward: per-row (last-axis) dynamic exponent fake-quant.

    Accepts any rank >= 1 (the reduction axis is the last one, as in the module with
    group_size=None).  Returns (x_dequant, scale) with scale shaped x.shape[:-1] + (1,).
    """
    # TODO(synk): group_size / lwc (learned clipping) calibration branches and the custom
    # backward pass (FakeQuant.backward) are not implemented (module defaults:
    # group_size=None, lwc=False; forward only).
    # TODO(synk): for extremely wide rows (cols*4B >~ several MiB) a cols-reduction grid
    # axis with abs_max/scale carried in VMEM scratch would be needed to fit v7x's 64 MiB.
    orig_shape = x.shape
    cols = orig_shape[-1]
    rows = int(math.prod(orig_shape[:-1]))
    x2 = x.reshape(rows, cols)

    # Tiny-row inputs: pad to one full 128-row block (negligible cost, keeps every block
    # dim 8/128-aligned without special-casing partial-array blocks).
    rows_eff = rows
    if rows < _LANE:
        x2 = jnp.pad(x2, ((0, _LANE - rows), (0, 0)))
        rows_eff = _LANE

    vmem_cap = _vmem_capacity_bytes()
    if block_rows is None:
        block_rows = _pick_block_rows(rows_eff, cols, vmem_cap)
    else:
        block_rows = max(_LANE, _cdiv(int(block_rows), _LANE) * _LANE)
    num_blocks = _cdiv(rows_eff, block_rows)
    grid = (num_blocks,)   # remainder rows -> masked last block

    # qmin/qmax with the original code's operator precedence: +/- 2**((2**(n_bits-1)) - 2).
    qmax = float(1 << ((1 << (n_bits - 1)) - 2))

    # VMEM budget: double-buffered in/out blocks (+ the tiny lane-dense scale block) plus
    # headroom for the full-tile f32 temporaries of the element-wise chain; clamped to
    # ~80% of this generation's physical VMEM (64 MiB v7x / 128 MiB v5e,v6e).
    itemsize = x2.dtype.itemsize
    in_block = block_rows * cols * itemsize
    f32_block = block_rows * cols * 4
    scale_block = 8 * block_rows * 4            # (1,1,br) f32 padded to (8,br) in VMEM
    vmem_limit = 2 * (2 * in_block + scale_block) + 8 * f32_block + (4 << 20)
    vmem_limit = int(min(max(vmem_limit, 16 << 20), int(0.8 * vmem_cap)))

    kernel = functools.partial(
        _exp_affine_quant_kernel, qmax=qmax, exact_pow2=exact_pow2)

    xq, scale_blocks = pl.pallas_call(
        kernel,
        out_shape=(
            jax.ShapeDtypeStruct((rows_eff, cols), x2.dtype),
            jax.ShapeDtypeStruct((num_blocks, 1, block_rows), jnp.float32),
        ),
        grid=grid,
        in_specs=[pl.BlockSpec((block_rows, cols), lambda i: (i, 0))],
        out_specs=(
            pl.BlockSpec((block_rows, cols), lambda i: (i, 0)),
            pl.BlockSpec((1, 1, block_rows), lambda i: (i, 0, 0)),
        ),
        compiler_params=pltpu.CompilerParams(
            dimension_semantics=("parallel",),
            vmem_limit_bytes=vmem_limit,
        ),
    )(x2)

    if rows_eff != rows:
        xq = xq[:rows]
    scale = scale_blocks.reshape(num_blocks * block_rows)[:rows]
    return xq.reshape(orig_shape), scale.reshape(orig_shape[:-1] + (1,))


def _reference(x, n_bits):
    """Pure-JAX reference of the forward pass (same <=1-ULP formulation as the kernel)."""
    qmax = float(1 << ((1 << (n_bits - 1)) - 2))
    qmin = -qmax
    xmin = jnp.min(x, axis=-1, keepdims=True)
    xmax = jnp.max(x, axis=-1, keepdims=True)
    abs_max = jnp.maximum(jnp.abs(xmax), jnp.abs(xmin))
    scale = jnp.clip(abs_max / (qmax - qmin), CLIPMIN, 10000.0)
    q = x * (1.0 / scale)
    sign = jnp.sign(q)
    q_abs = jnp.abs(q)
    q_0_idx = q_abs < 0.5
    q_abs = jnp.clip(q_abs, 0.0001, 10000.0)
    q_thresh = jnp.log2(q_abs) + jnp.float32(_LOG2_OFFSET)
    q_thresh = jnp.where(q_thresh < -0.5, 0.0, q_thresh)
    q_exp = jnp.exp2(jnp.round(q_thresh))
    q_exp = jnp.where(q_0_idx, 0.0, q_exp)
    q_sign = jnp.clip(q_exp, qmin, qmax) * sign
    return q_sign * scale, scale


def _round_tie_mask(x, scale, tol=1e-4):
    """Elements whose power-of-two rounding decision sits within `tol` of a tie.

    At such ULP-edge inputs the exponent-bit fast path, XLA's log2/exp2 lowering and the
    kernel may legitimately pick adjacent quantization levels, so they are excluded from
    the strict element-wise comparison."""
    q_abs = jnp.clip(jnp.abs(x * (1.0 / scale)), 0.0001, 10000.0)
    q_thresh = jnp.log2(q_abs) + jnp.float32(_LOG2_OFFSET)
    frac = q_thresh - jnp.floor(q_thresh)
    return jnp.abs(frac - 0.5) < tol


if __name__ == "__main__":
    key = jax.random.PRNGKey(0)
    k1, k2 = jax.random.split(key)

    # Case 1: leading batch dims, rows (520) not a multiple of the auto-picked row tile
    # -> exercises the pl.cdiv grid with a masked remainder block and a 2-block parallel
    # axis (one block per v7x TensorCore), plus the lane-dense scale relayout/slice.
    x = jax.random.normal(k1, (4, 130, 256), dtype=jnp.float32)
    n_bits = 4   # qmax = 64  (the module default n_bits=8 gives qmax=2**126, tested below)

    xq_ref, scale_ref = _reference(x, n_bits)
    tie = _round_tie_mask(x, scale_ref)

    # --- default path: exponent-bit pow2 ----------------------------------------------
    xq, scale = exp_affine_quantize(x, n_bits=n_bits)
    jax.block_until_ready((xq, scale))
    assert xq.shape == x.shape and scale.shape == (4, 130, 1)
    assert bool(jnp.all(jnp.isfinite(xq))) and bool(jnp.all(jnp.isfinite(scale)))
    assert jnp.allclose(scale, scale_ref, rtol=1e-6, atol=1e-6)
    ok = jnp.isclose(xq, xq_ref, rtol=1e-5, atol=1e-6) | tie
    assert bool(jnp.all(ok)), f"mismatches: {int(jnp.sum(~ok))}"

    # --- validation mode: literal log2/round/exp2 chain --------------------------------
    xq_l, scale_l = exp_affine_quantize(x, n_bits=n_bits, exact_pow2=True)
    jax.block_until_ready((xq_l, scale_l))
    assert bool(jnp.all(jnp.isfinite(xq_l)))
    assert jnp.allclose(scale_l, scale_ref, rtol=1e-6, atol=1e-6)
    ok_l = jnp.isclose(xq_l, xq_ref, rtol=1e-5, atol=1e-6) | tie
    assert bool(jnp.all(ok_l)), f"mismatches (log2 path): {int(jnp.sum(~ok_l))}"

    # Case 2: module-default n_bits=8 (qmax >= 1e4 -> upper clamp statically elided,
    # subnormal-reciprocal fallback), small 4-D input, single-block grid.
    x8 = jax.random.normal(k2, (2, 4, 16, 32), dtype=jnp.float32)
    xq8_ref, scale8_ref = _reference(x8, 8)
    tie8 = _round_tie_mask(x8, scale8_ref)
    xq8, scale8 = exp_affine_quantize(x8, n_bits=8)
    jax.block_until_ready((xq8, scale8))
    assert xq8.shape == x8.shape and scale8.shape == (2, 4, 16, 1)
    assert bool(jnp.all(jnp.isfinite(xq8))) and bool(jnp.all(jnp.isfinite(scale8)))
    assert jnp.allclose(scale8, scale8_ref, rtol=1e-6, atol=1e-6)
    ok8 = jnp.isclose(xq8, xq8_ref, rtol=1e-5, atol=1e-6) | tie8
    assert bool(jnp.all(ok8)), f"mismatches (n_bits=8): {int(jnp.sum(~ok8))}"

    print("KERNEL_OK")
</pallas_src>

<mosaic_0001>
module attributes {stable_mosaic.version = 11 : i64} {
  func.func @_exp_affine_quant_kernel(%arg0: i32, %arg1: memref<384x256xf32, #tpu.memory_space<vmem>>, %arg2: memref<384x256xf32, #tpu.memory_space<vmem>>, %arg3: memref<1x1x384xf32, #tpu.memory_space<vmem>>) attributes {dimension_semantics = [#tpu.dimension_semantics<parallel>], iteration_bounds = array<i64: 2>, scalar_prefetch = 0 : i64, scratch_operands = 0 : i64, tpu.core_type = #tpu.core_type<tc>, window_params = [{transform_indices = @transform_0, window_bounds = array<i64: 384, 256>}, {transform_indices = @transform_1, window_bounds = array<i64: 384, 256>}, {transform_indices = @transform_2, window_bounds = array<i64: 1, 1, 384>}]} {
    %c0 = arith.constant 0 : index
    %c0_0 = arith.constant 0 : index
    %0 = vector.load %arg1[%c0, %c0_0] : memref<384x256xf32, #tpu.memory_space<vmem>>, vector<384x256xf32>
    %1 = math.absf %0 : vector<384x256xf32>
    %cst = arith.constant dense<0xFF800000> : vector<384xf32>
    %2 = vector.multi_reduction <maximumf>, %1, %cst [1] : vector<384x256xf32> to vector<384xf32>
    %3 = vector.shape_cast %2 : vector<384xf32> to vector<384x1xf32>
    %cst_1 = arith.constant 7.812500e-03 : f32
    %4 = vector.broadcast %cst_1 : f32 to vector<384x1xf32>
    %5 = arith.mulf %3, %4 : vector<384x1xf32>
    %cst_2 = arith.constant 9.99999974E-6 : f32
    %cst_3 = arith.constant 1.000000e+04 : f32
    %6 = vector.broadcast %cst_2 : f32 to vector<384x1xf32>
    %7 = arith.maximumf %6, %5 : vector<384x1xf32>
    %8 = vector.broadcast %cst_3 : f32 to vector<384x1xf32>
    %9 = arith.minimumf %8, %7 : vector<384x1xf32>
    %cst_4 = arith.constant 1.000000e+00 : f32
    %10 = vector.broadcast %cst_4 : f32 to vector<384x1xf32>
    %11 = arith.divf %10, %9 : vector<384x1xf32>
    %12 = vector.broadcast %11 : vector<384x1xf32> to vector<384x256xf32>
    %13 = arith.mulf %0, %12 : vector<384x256xf32>
    %14 = math.absf %13 : vector<384x256xf32>
    %cst_5 = arith.constant 5.000000e-01 : f32
    %15 = vector.broadcast %cst_5 : f32 to vector<384x256xf32>
    %16 = arith.cmpf olt, %14, %15 : vector<384x256xf32>
    %cst_6 = arith.constant 9.99999974E-5 : f32
    %cst_7 = arith.constant 1.000000e+04 : f32
    %17 = vector.broadcast %cst_6 : f32 to vector<384x256xf32>
    %18 = arith.maximumf %17, %14 : vector<384x256xf32>
    %19 = vector.broadcast %cst_7 : f32 to vector<384x256xf32>
    %20 = arith.minimumf %19, %18 : vector<384x256xf32>
    %cst_8 = arith.constant 1.33333337 : f32
    %21 = vector.broadcast %cst_8 : f32 to vector<384x256xf32>
    %22 = arith.mulf %20, %21 : vector<384x256xf32>
    %23 = tpu.bitcast %22 : vector<384x256xf32> -> vector<384x256xi32>
    %c2139095040_i32 = arith.constant 2139095040 : i32
    %24 = vector.broadcast %c2139095040_i32 : i32 to vector<384x256xi32>
    %25 = arith.andi %23, %24 : vector<384x256xi32>
    %26 = tpu.bitcast %25 : vector<384x256xi32> -> vector<384x256xf32>
    %cst_9 = arith.constant 1.000000e+00 : f32
    %27 = vector.broadcast %cst_9 : f32 to vector<384x256xf32>
    %28 = arith.maximumf %26, %27 : vector<384x256xf32>
    %cst_10 = arith.constant 0.000000e+00 : f32
    %29 = vector.broadcast %cst_10 : f32 to vector<384x256xf32>
    %30 = arith.select %16, %29, %28 : vector<384x256xi1>, vector<384x256xf32>
    %cst_11 = arith.constant 6.400000e+01 : f32
    %31 = vector.broadcast %cst_11 : f32 to vector<384x256xf32>
    %32 = arith.minimumf %30, %31 : vector<384x256xf32>
    %33 = vector.broadcast %9 : vector<384x1xf32> to vector<384x256xf32>
    %34 = arith.mulf %32, %33 : vector<384x256xf32>
    %35 = tpu.bitcast %0 : vector<384x256xf32> -> vector<384x256xi32>
    %c-2147483648_i32 = arith.constant -2147483648 : i32
    %36 = vector.broadcast %c-2147483648_i32 : i32 to vector<384x256xi32>
    %37 = arith.andi %35, %36 : vector<384x256xi32>
    %38 = tpu.bitcast %34 : vector<384x256xf32> -> vector<384x256xi32>
    %39 = arith.ori %38, %37 : vector<384x256xi32>
    %40 = tpu.bitcast %39 : vector<384x256xi32> -> vector<384x256xf32>
    %c0_12 = arith.constant 0 : index
    %c0_13 = arith.constant 0 : index
    %41 = vector.load %arg2[%c0_12, %c0_13] : memref<384x256xf32, #tpu.memory_space<vmem>>, vector<384x256xf32>
    tpu.vector_store %arg2[%c0_12, %c0_13], %40 {strides = array<i32>} : memref<384x256xf32, #tpu.memory_space<vmem>>, vector<384x256xf32>,
    %42 = tpu.iota {dimensions = array<i32: 0>} : vector<128x128xi32>
    %43 = tpu.iota {dimensions = array<i32: 1>} : vector<128x128xi32>
    %44 = arith.cmpi eq, %42, %43 : vector<128x128xi32>
    %45 = arith.extui %44 : vector<128x128xi1> to vector<128x128xi32>
    %46 = arith.sitofp %45 : vector<128x128xi32> to vector<128x128xf32>
    %47 = vector.extract_strided_slice %9 {offsets = [0, 0], sizes = [128, 1], strides = [1, 1]} : vector<384x1xf32> to vector<128x1xf32>
    %48 = vector.shape_cast %47 : vector<128x1xf32> to vector<128x1xf32>
    %49 = vector.broadcast %48 : vector<128x1xf32> to vector<128x128xf32>
    %50 = arith.mulf %49, %46 : vector<128x128xf32>
    %cst_14 = arith.constant dense<0.000000e+00> : vector<128xf32>
    %51 = vector.multi_reduction <add>, %50, %cst_14 [0] : vector<128x128xf32> to vector<128xf32>
    %52 = vector.shape_cast %51 : vector<128xf32> to vector<1x128xf32>
    %53 = vector.shape_cast %52 : vector<1x128xf32> to vector<1x1x128xf32>
    %c0_15 = arith.constant 0 : index
    %c0_16 = arith.constant 0 : index
    %c0_17 = arith.constant 0 : index
    %54 = vector.load %arg3[%c0_15, %c0_16, %c0_17] : memref<1x1x384xf32, #tpu.memory_space<vmem>>, vector<1x1x128xf32>
    tpu.vector_store %arg3[%c0_15, %c0_16, %c0_17], %53 {strides = array<i32>} : memref<1x1x384xf32, #tpu.memory_space<vmem>>, vector<1x1x128xf32>,
    %55 = vector.extract_strided_slice %9 {offsets = [128, 0], sizes = [128, 1], strides = [1, 1]} : vector<384x1xf32> to vector<128x1xf32>
    %56 = vector.shape_cast %55 : vector<128x1xf32> to vector<128x1xf32>
    %57 = vector.broadcast %56 : vector<128x1xf32> to vector<128x128xf32>
    %58 = arith.mulf %57, %46 : vector<128x128xf32>
    %cst_18 = arith.constant dense<0.000000e+00> : vector<128xf32>
    %59 = vector.multi_reduction <add>, %58, %cst_18 [0] : vector<128x128xf32> to vector<128xf32>
    %60 = vector.shape_cast %59 : vector<128xf32> to vector<1x128xf32>
    %61 = vector.shape_cast %60 : vector<1x128xf32> to vector<1x1x128xf32>
    %c0_19 = arith.constant 0 : index
    %c0_20 = arith.constant 0 : index
    %c128 = arith.constant 128 : index
    %62 = vector.load %arg3[%c0_19, %c0_20, %c128] : memref<1x1x384xf32, #tpu.memory_space<vmem>>, vector<1x1x128xf32>
    tpu.vector_store %arg3[%c0_19, %c0_20, %c128], %61 {strides = array<i32>} : memref<1x1x384xf32, #tpu.memory_space<vmem>>, vector<1x1x128xf32>,
    %63 = vector.extract_strided_slice %9 {offsets = [256, 0], sizes = [128, 1], strides = [1, 1]} : vector<384x1xf32> to vector<128x1xf32>
    %64 = vector.shape_cast %63 : vector<128x1xf32> to vector<128x1xf32>
    %65 = vector.broadcast %64 : vector<128x1xf32> to vector<128x128xf32>
    %66 = arith.mulf %65, %46 : vector<128x128xf32>
    %cst_21 = arith.constant dense<0.000000e+00> : vector<128xf32>
    %67 = vector.multi_reduction <add>, %66, %cst_21 [0] : vector<128x128xf32> to vector<128xf32>
    %68 = vector.shape_cast %67 : vector<128xf32> to vector<1x128xf32>
    %69 = vector.shape_cast %68 : vector<1x128xf32> to vector<1x1x128xf32>
    %c0_22 = arith.constant 0 : index
    %c0_23 = arith.constant 0 : index
    %c256 = arith.constant 256 : index
    %70 = vector.load %arg3[%c0_22, %c0_23, %c256] : memref<1x1x384xf32, #tpu.memory_space<vmem>>, vector<1x1x128xf32>
    tpu.vector_store %arg3[%c0_22, %c0_23, %c256], %69 {strides = array<i32>} : memref<1x1x384xf32, #tpu.memory_space<vmem>>, vector<1x1x128xf32>,
    return
  }
  func.func @transform_0(%arg0: i32) -> (i32, i32) {
    %c0_i32 = arith.constant 0 : i32
    %c0_i32_0 = arith.constant 0 : i32
    return %arg0, %c0_i32 : i32, i32
  }
  func.func @transform_1(%arg0: i32) -> (i32, i32) {
    %c0_i32 = arith.constant 0 : i32
    %c0_i32_0 = arith.constant 0 : i32
    return %arg0, %c0_i32 : i32, i32
  }
  func.func @transform_2(%arg0: i32) -> (i32, i32, i32) {
    %c0_i32 = arith.constant 0 : i32
    %c0_i32_0 = arith.constant 0 : i32
    %c0_i32_1 = arith.constant 0 : i32
    return %arg0, %c0_i32, %c0_i32_0 : i32, i32, i32
  }
}

</mosaic_0001>

<bundles_post_ra>
// kernel: tpu_custom_call.1
= control target key start
LH: loop header
LB: loop body
LE: loop exit
PB: predicated region body
PF: predicated region fallthrough
CT: control target
= control target key end

     0   :  { %8 = vsyncpa [#allocation3], 0  ;;  %s6730_s0 = inlined_call_operand.hbm [shape: f32[520,256], index: 0, kind: input, shape index: {}]   ;;  %s6731_s1 = inlined_call_operand.hbm [shape: f32[520,256], index: 1, kind: output, shape index: {0}]   ;;  %s6732_s2 = inlined_call_operand.hbm [shape: f32[2,1,384], index: 2, kind: output, shape index: {1}]  }
   0x1   :  { %10 = vsyncpa [#allocation3 + $0x1], 0 }
   0x2   :  { %11 = vsyncpa [#allocation4], 0 }
   0x3   :  { %13 = vsyncpa [#allocation4 + $0x1], 0 }
   0x4   :  { %14 = vsyncpa [#allocation7], 0 }
   0x5   :  { %16 = vsyncpa [#allocation7 + $0x1], 0  ;;  %s4025_s9 = smov 0   ;;  %s4027_s10 = smov 0  }
   0x6   :  { %s4029_s11 = smov 0   ;;  %s4031_s12 = smov 0  }
   0x7 LB: > { %s4046_s13 = sadd.s32 4294967295, %s4001_s12   ;;  %s3555_s14 = sadd.s32 4294967294, %s4001_s12   ;;  %s4001_s12 = sphi %s4031_s12, %s7260_s12   ;;  %s3997_s11 = sphi %s4029_s11, %s7259_s11   ;;  %s3993_s10 = sphi %s4027_s10, %s7258_s10   ;;  %s3989_s9 = sphi %s4025_s9, %s7257_s9  }
   0x8   : > { %s4050_s15 = sadd.s32 1, %s4001_s12   ;;  %s29_s16 = sadd.s32 1, %s3997_s11 }
   0x9   : > { %s26_s17 = ssub.s32 %s4001_s12, %s4050_s15  ;;  %p36_p0 = scmp.ne.s32.totalorder %s3997_s11, %s3993_s10 }
   0xa   : > { %p27_p1 = scmp.eq.s32.totalorder %s26_s17, 0  ;;  %p37_p2 = scmp.eq.s32.totalorder %s4001_s12, 0 }
   0xb   : > { %p42_p3 = scmp.ne.s32.totalorder %s3993_s10, %s3989_s9  ;;  %p43_p4 = scmp.eq.s32.totalorder %s4046_s13, 0 }
   0xc   : > { %s4062_s18 = scalar_select %p27_p1, %s3997_s11, %s29_s16  }
   0xd   : > { %p38_p5 = por %p37_p2, %p36_p0  ;;  %p4064_p6 = por %p43_p4, %p42_p3 }
   0xe   : > { %p66_p7 = scmp.eq.s32.totalorder %s4046_s13, 1  ;;  %p72_p8 = scmp.eq.s32.totalorder %s3555_s14, 1 }
   0xf   : > { %p6733_p11 = scmp.ge.s32.totalorder %s4001_s12, 2 }
  0x10   : > { %p4069_p9 = por %p66_p7, %p36_p0  ;;  %p4073_p10 = por %p72_p8, %p42_p3 }
  0x11   : > { %114 = sbr.rel (%p6733_p11) target bundleno = 60 (0x3c), region = 16 }
  0x16   : > { %117 = sbr.rel (!%p38_p5) target bundleno = 60 (0x3c), region = 20  ;;  %s118_s22 = sand.u32 (%p38_p5), 1, %s3997_s11  }
  0x17   : > { %s123_s23 = smul.u32 (%p38_p5), 48, %s4001_s12  ;;  %s4085_s29 = scalar_lea.sflag (%p38_p5), [#allocation3], %s118_s22 }
  0x18   : > { %s3599_s24 = smul.u32 (%p38_p5), 768, %s118_s22 }
  0x19   : > { %s124_s25 = ssub.s32 (%p38_p5), 65, %s123_s23 }
  0x1a   : > { %p125_p12 = scmp.lt.s32.totalorder (%p38_p5), %s124_s25, 48  ;;  %s122_s30 = scalar_lea.vmem (%p38_p5), [#allocation2], %s3599_s24 }
  0x1c   : > { %s7262_s25 = smov (!%p125_p12, %s124_s25), 48 }
  0x1d   : > { %s3591_s26 = sshll.u32 %s7262_s25, 4 }
  0x1e   : > { %s129_s27 = ssub.s32 768, %s3591_s26 }
  0x1f   : > { %s130_s28 = sshll.u32 %s129_s27, 4 }
  0x20   : > { %131 = vsyncadd %s4085_s29, %s130_s28  ;;  %p4088_p13 = scmp.ne.s32.totalorder %s3591_s26, 0  ;;  %s3597_s4 = smul.u32 768, %s4001_s12 }
  0x21   : > { %s4093_s5 = sshll.u32 %s122_s30, 4  ;;  %s3564_s6 = sshll.u32 %s7262_s25, 8  ;;  %s140_s5 = int_to_ptr.vmem [resolvable:$true] %s4093_s5 }
  0x22   : > { %s135_s14 = scalar_lea.hbm %s6730_s0, %s3597_s4  ;;  %s3855_s22 = sshrl.u32 %s3564_s6, 4 }
  0x23   : > { %s137_s16 = sshll.u32 %s135_s14, 4  ;;  %s3864_s27 = scalar_lea.hbm %s6730_s0, 1040  ;;  %s4100_s16 = int_to_ptr.hbm [resolvable:$true] %s137_s16 }
  0x24   : > { %s3853_s17 = sshra.s32 %s4100_s16, 4  ;;  %s3854_s17 = int_to_ptr.hbm [resolvable:$true] %s3853_s17 }
  0x25   : > { %s3860_s23 = scalar_lea.hbm %s3854_s17, %s3855_s22  ;;  %p3865_p3 = scmp.lt.s32.totalorder %s3854_s17, %s6730_s0 }
  0x26   : > { %p3861_p0 = scmp.ne.s32.totalorder %s3854_s17, %s3860_s23  ;;  %p3866_p4 = scmp.lt.s32.totalorder %s3864_s27, %s3860_s23 }
  0x28   : > { %p3862_p1 = pnand %p3861_p0, %p4088_p13  ;;  %p3867_p5 = por %p3866_p4, %p3865_p3 }
  0x2a   : > { %p3863_p2 = pneg %p3862_p1 }
  0x2c   : > { %p3868_p7 = pnand %p3867_p5, %p3863_p2 }
  0x2e   : > { %3871 = shalt.err (!%p3868_p7)
}
  0x2f   : > { %s3872_s4 = sshra.s32 %s140_s5, 4  ;;  %s4003_s8 = smov [#allocation2]   ;;  %s3873_s4 = int_to_ptr.vmem [resolvable:$true] %s3872_s4 }
  0x30   : > { %s3879_s7 = scalar_lea.vmem %s3873_s4, %s3855_s22  ;;  %s3883_s14 = scalar_lea.vmem %s4003_s8, 1536 }
  0x31   : > { %p3880_p8 = scmp.ne.s32.totalorder %s3873_s4, %s3879_s7  ;;  %p3885_p1 = scmp.lt.s32.totalorder %s3883_s14, %s3879_s7 }
  0x33   : > { %p3881_p12 = pnand %p3880_p8, %p4088_p13 }
  0x35   : > { %p3882_p0 = pneg %p3881_p12 }
  0x37   : > { %p3887_p11 = pnand %p3885_p1, %p3882_p0 }
  0x39   : > { %3890 = shalt.err (!%p3887_p11)
}
  0x3a   : > { %s4004_s17 = smov 256   ;;  %s4005_s23 = smov 16  }
  0x3b   : > { %145 = dma.hbm_to_vmem [thread:$0]  (%p4088_p13), %s4100_s16, %s3564_s6, %s140_s5, %s4085_s29, %s4004_s17, %s4004_s17, %s4005_s23  }
  0x3c PF: > { %p3565_p2 = scmp.ge.s32.totalorder %s4001_s12, 1  ;;  %p147_p3 = scmp.lt.s32.totalorder %s4001_s12, 3 }
  0x3e   : > { %p148_p4 = pnand %p3565_p2, %p147_p3 }
  0x40   : > { %151 = sbr.rel (%p148_p4) target bundleno = 803 (0x323), region = 24 }
  0x45   : > { %s4128_s22 = sand.u32 1, %s3993_s10  }
  0x46   : > { %s3600_s24 = smul.u32 768, %s4128_s22  ;;  %s154_s3 = scalar_lea.sflag [#allocation3], %s4128_s22 }
  0x48   : > { %s4134_s25 = scalar_lea.vmem [#allocation2], %s3600_s24 }
  0x49   : > { %3976 = dma.done.wait (%p4064_p6), %s154_s3, 12288  }
  0x4a   : > { %3978 = vsyncadd (%p4064_p6), %s154_s3, 4294955008  ;;  %v4141_v0 = vld [vmem:[%s4134_s25 + $0x40] sm:$0xff]  ;;  %v4144_v1 = vld [vmem:[%s4134_s25 + $0x48] sm:$0xff]  ;;  %s4653_s19 = scalar_lea.vmem [#allocation5], %s3600_s24  ;;  %s3601_s29 = smul.u32 3, %s4128_s22 }
  0x4b   : > { %v4147_v2 = vld [vmem:[%s4134_s25 + $0x20] sm:$0xff]  ;;  %v300_v3 = vand.u32 2147483647, %v4141_v0  ;;  %v301_v4 = vand.u32 2147483647, %v4144_v1  ;;  %v4152_v5 = vld [vmem:[%s4134_s25 + $0x28] sm:$0xff] }
  0x4c   : > { %v296_v6 = vand.u32 2147483647, %v4147_v2  ;;  %v4156_v7 = vld [vmem:[%s4134_s25] sm:$0xff]  ;;  %v4159_v8 = vld [vmem:[%s4134_s25 + $0x8] sm:$0xff]  ;;  %v297_v10 = vand.u32 2147483647, %v4152_v5 }
  0x4d   : > { %v400_v9 = vmax.f32 %v300_v3, %v301_v4  ;;  %v292_v11 = vand.u32 2147483647, %v4156_v7  ;;  %v4164_v12 = vld [vmem:[%s4134_s25 + $0x50] sm:$0xff]  ;;  %v293_v13 = vand.u32 2147483647, %v4159_v8  ;;  %v4168_v14 = vld [vmem:[%s4134_s25 + $0x58] sm:$0xff] }
  0x4e   : > { %v394_v15 = vmax.f32 %v296_v6, %v297_v10  ;;  %v302_v16 = vand.u32 2147483647, %v4164_v12  ;;  %v303_v17 = vand.u32 2147483647, %v4168_v14  ;;  %v4173_v18 = vld [vmem:[%s4134_s25 + $0x30] sm:$0xff]  ;;  %v4176_v20 = vld [vmem:[%s4134_s25 + $0x38] sm:$0xff] }
  0x4f   : > { %401 = vmax.xlane.f32.xlu2 %v400_v9  ;;  %v388_v19 = vmax.f32 %v292_v11, %v293_v13  ;;  %v4179_v21 = vld [vmem:[%s4134_s25 + $0x10] sm:$0xff]  ;;  %v4182_v22 = vld [vmem:[%s4134_s25 + $0x18] sm:$0xff]  ;;  %v298_v23 = vand.u32 2147483647, %v4173_v18  ;;  %v299_v24 = vand.u32 2147483647, %v4176_v20 }
  0x50   : > { %395 = vmax.xlane.f32.xlu1 %v394_v15  ;;  %v294_v25 = vand.u32 2147483647, %v4179_v21  ;;  %v295_v26 = vand.u32 2147483647, %v4182_v22  ;;  %v403_v27 = vmax.f32 %v302_v16, %v303_v17  ;;  %v4189_v28 = vld [vmem:[%s4134_s25 + $0x80] sm:$0xff]  ;;  %v4192_v29 = vld [vmem:[%s4134_s25 + $0x88] sm:$0xff] }
  0x51   : > { %389 = vmax.xlane.f32.xlu0 %v388_v19  ;;  %v397_v30 = vmax.f32 %v298_v23, %v299_v24  ;;  %v4195_v32 = vld [vmem:[%s4134_s25 + $0x70] sm:$0xff]  ;;  %v4198_v33 = vld [vmem:[%s4134_s25 + $0x78] sm:$0xff]  ;;  %v308_v34 = vand.u32 2147483647, %v4189_v28  ;;  %v309_v35 = vand.u32 2147483647, %v4192_v29 }
  0x52   : > { %v391_v31 = vmax.f32 %v294_v25, %v295_v26  ;;  %v4203_v36 = vld [vmem:[%s4134_s25 + $0x60] sm:$0xff]  ;;  %v4206_v37 = vld [vmem:[%s4134_s25 + $0x68] sm:$0xff]  ;;  %v306_v38 = vand.u32 2147483647, %v4195_v32  ;;  %v307_v39 = vand.u32 2147483647, %v4198_v33 }
  0x53   : > { %v304_v40 = vand.u32 2147483647, %v4203_v36  ;;  %v305_v41 = vand.u32 2147483647, %v4206_v37  ;;  %v412_v42 = vmax.f32 %v308_v34, %v309_v35  ;;  %v4213_v43 = vld [vmem:[%s4134_s25 + $0xb0] sm:$0xff]  ;;  %v4216_v44 = vld [vmem:[%s4134_s25 + $0xb8] sm:$0xff] }
  0x54   : > { %6814 = vst [vmem:[#allocation11_spill] sm:$0xff] %v4216_v44  ;;  %v409_v45 = vmax.f32 %v306_v38, %v307_v39  ;;  %v4219_v47 = vld [vmem:[%s4134_s25 + $0xa0] sm:$0xff]  ;;  %v4222_v48 = vld [vmem:[%s4134_s25 + $0xa8] sm:$0xff]  ;;  %v314_v49 = vand.u32 2147483647, %v4213_v43  ;;  %v4227_v51 = vld [vmem:[%s4134_s25 + $0x90] sm:$0xff] }
  0x55   : > { %v406_v46 = vmax.f32 %v304_v40, %v305_v41  ;;  %6815 = vst [vmem:[#allocation12_spill] sm:$0xff] %v4219_v47  ;;  %v315_v50 = vand.u32 2147483647, %v4216_v44  ;;  %v4230_v52 = vld [vmem:[%s4134_s25 + $0x98] sm:$0xff]  ;;  %v312_v53 = vand.u32 2147483647, %v4219_v47 }
  0x56   : > { %6816 = vst [vmem:[#allocation13_spill] sm:$0xff] %v4222_v48  ;;  %v313_v54 = vand.u32 2147483647, %v4222_v48  ;;  %v310_v55 = vand.u32 2147483647, %v4227_v51  ;;  %v4237_v58 = vld [vmem:[%s4134_s25 + $0xe0] sm:$0xff] }
  0x57   : > { %404 = vmax.xlane.f32.xlu2 %v403_v27  ;;  %6817 = vst [vmem:[#allocation14_spill] sm:$0xff] %v4227_v51  ;;  %v311_v56 = vand.u32 2147483647, %v4230_v52  ;;  %v421_v57 = vmax.f32 %v314_v49, %v315_v50  ;;  %v4240_v59 = vld [vmem:[%s4134_s25 + $0xe8] sm:$0xff]  ;;  %v4243_v62 = vld [vmem:[%s4134_s25 + $0xd0] sm:$0xff]  ;;  %v4246_v63 = vld [vmem:[%s4134_s25 + $0xd8] sm:$0xff] }
  0x58   : > { %398 = vmax.xlane.f32.xlu1 %v397_v30  ;;  %6818 = vst [vmem:[#allocation15_spill] sm:$0xff] %v4230_v52  ;;  %v418_v60 = vmax.f32 %v312_v53, %v313_v54  ;;  %v320_v3 = vand.u32 2147483647, %v4237_v58  ;;  %v321_v4 = vand.u32 2147483647, %v4240_v59  ;;  %v4251_v6 = vld [vmem:[%s4134_s25 + $0xc0] sm:$0xff] }
  0x59   : > { %392 = vmax.xlane.f32.xlu0 %v391_v31  ;;  %6819 = vst [vmem:[#allocation16_spill] sm:$0xff] %v4237_v58  ;;  %v415_v61 = vmax.f32 %v310_v55, %v311_v56  ;;  %v4254_v9 = vld [vmem:[%s4134_s25 + $0xc8] sm:$0xff]  ;;  %v318_v10 = vand.u32 2147483647, %v4243_v62  ;;  %v319_v11 = vand.u32 2147483647, %v4246_v63 }
  0x5a   : > { %6820 = vst [vmem:[#allocation17_spill] sm:$0xff] %v4240_v59  ;;  %v316_v13 = vand.u32 2147483647, %v4251_v6  ;;  %v317_v15 = vand.u32 2147483647, %v4254_v9  ;;  %v430_v16 = vmax.f32 %v320_v3, %v321_v4  ;;  %v4261_v17 = vld [vmem:[%s4134_s25 + $0x110] sm:$0xff] }
  0x5b   : > { %6821 = vst [vmem:[#allocation18_spill] sm:$0xff] %v4243_v62  ;;  %v4264_v19 = vld [vmem:[%s4134_s25 + $0x118] sm:$0xff]  ;;  %v427_v23 = vmax.f32 %v318_v10, %v319_v11  ;;  %v4267_v25 = vld [vmem:[%s4134_s25 + $0x100] sm:$0xff]  ;;  %v4270_v26 = vld [vmem:[%s4134_s25 + $0x108] sm:$0xff]  ;;  %v326_v27 = vand.u32 2147483647, %v4261_v17 }
  0x5c   : > { %6822 = vst [vmem:[#allocation19_spill] sm:$0xff] %v4246_v63  ;;  %v424_v24 = vmax.f32 %v316_v13, %v317_v15  ;;  %v327_v30 = vand.u32 2147483647, %v4264_v19  ;;  %v4275_v31 = vld [vmem:[%s4134_s25 + $0xf0] sm:$0xff]  ;;  %v4278_v34 = vld [vmem:[%s4134_s25 + $0xf8] sm:$0xff]  ;;  %v4299_v56 = vld [vmem:[%s4134_s25 + $0x200] sm:$0xff] }
  0x5d   : > { %6823 = vst [vmem:[#allocation20_spill] sm:$0xff] %v4251_v6  ;;  %v324_v35 = vand.u32 2147483647, %v4267_v25  ;;  %v325_v38 = vand.u32 2147483647, %v4270_v26  ;;  %v4291_v50 = vld [vmem:[%s4134_s25 + $0x210] sm:$0xff] }
  0x5e   : > { %6824 = vst [vmem:[#allocation21_spill] sm:$0xff] %v4254_v9  ;;  %v322_v39 = vand.u32 2147483647, %v4275_v31  ;;  %v323_v40 = vand.u32 2147483647, %v4278_v34  ;;  %v439_v41 = vmax.f32 %v326_v27, %v327_v30  ;;  %v4294_v53 = vld [vmem:[%s4134_s25 + $0x218] sm:$0xff] }
  0x5f   : > { %413 = vmax.xlane.f32.xlu2 %v412_v42  ;;  %6825 = vst [vmem:[#allocation22_spill] sm:$0xff] %v4261_v17  ;;  %v4285_v42 = vld [vmem:[%s4134_s25 + $0x120] sm:$0xff]  ;;  %v356_v3 = vand.u32 2147483647, %v4299_v56  ;;  %v4309_v11 = vld [vmem:[%s4134_s25 + $0x230] sm:$0xff]  ;;  %v4312_v13 = vld [vmem:[%s4134_s25 + $0x238] sm:$0xff] }
  0x60   : > { %410 = vmax.xlane.f32.xlu1 %v409_v45  ;;  %6826 = vst [vmem:[#allocation23_spill] sm:$0xff] %v4264_v19  ;;  %v4288_v45 = vld [vmem:[%s4134_s25 + $0x128] sm:$0xff]  ;;  %v433_v49 = vmax.f32 %v322_v39, %v323_v40  ;;  %v328_v54 = vand.u32 2147483647, %v4285_v42  ;;  %v362_v27 = vand.u32 2147483647, %v4309_v11 }
  0x61   : > { %407 = vmax.xlane.f32.xlu0 %v406_v46  ;;  %6827 = vst [vmem:[#allocation24_spill] sm:$0xff] %v4267_v25  ;;  %v436_v46 = vmax.f32 %v324_v35, %v325_v38  ;;  %v329_v55 = vand.u32 2147483647, %v4288_v45  ;;  %v363_v30 = vand.u32 2147483647, %v4312_v13  ;;  %v4323_v35 = vld [vmem:[%s4134_s25 + $0x220] sm:$0xff] }
  0x62   : > { %6828 = vst [vmem:[#allocation25_spill] sm:$0xff] %v4270_v26  ;;  %v4326_v38 = vld [vmem:[%s4134_s25 + $0x228] sm:$0xff]  ;;  %s5339_s5 = scalar_lea.vmem [#allocation6], %s3601_s29  ;;  %s3406_s6 = scalar_lea.sflag [#allocation4], %s4128_s22 }
  0x63   : > { %6829 = vst [vmem:[#allocation26_spill] sm:$0xff] %v4275_v31  ;;  %v442_v10 = vmax.f32 %v328_v54, %v329_v55  ;;  %v4333_v54 = vld [vmem:[%s4134_s25 + $0x160] sm:$0xff]  ;;  %v4336_v55 = vld [vmem:[%s4134_s25 + $0x168] sm:$0xff]  ;;  %s3418_s26 = smul.u32 (%p4069_p9), 48, %s4046_s13 }
  0x64   : > { %6830 = vst [vmem:[#allocation27_spill] sm:$0xff] %v4278_v34 }
  0x65   : > { %6831 = vst [vmem:[#allocation28_spill] sm:$0xff] %v4285_v42  ;;  %s3419_s27 = ssub.s32 (%p4069_p9), 65, %s3418_s26 }
  0x66   : > { %6832 = vst [vmem:[#allocation29_spill] sm:$0xff] %v4288_v45  ;;  %p3420_p6 = scmp.lt.s32.totalorder (%p4069_p9), %s3419_s27, 48 }
  0x67   : > { %422 = vmax.xlane.f32.xlu2 %v421_v57  ;;  %6833 = vst [vmem:[#allocation30_spill] sm:$0xff] %v4291_v50  ;;  %v4302_v57 = vld [vmem:[%s4134_s25 + $0x208] sm:$0xff] }
  0x68   : > { %419 = vmax.xlane.f32.xlu1 %v418_v60  ;;  %6834 = vst [vmem:[#allocation31_spill] sm:$0xff] %v4294_v53  ;;  %v358_v60 = vand.u32 2147483647, %v4291_v50  ;;  %v357_v4 = vand.u32 2147483647, %v4302_v57 }
  0x69   : > { %416 = vmax.xlane.f32.xlu0 %v415_v61  ;;  %6835 = vst [vmem:[#allocation32_spill] sm:$0xff] %v4299_v56  ;;  %v359_v61 = vand.u32 2147483647, %v4294_v53  ;;  %v6863_v53 = vlaneseq }
  0x6a   : > { %6836 = vst [vmem:[#allocation33_spill] sm:$0xff] %v4302_v57  ;;  %v275_v57 = vld [vmem:[%s4134_s25 + $0x278] sm:$0xff] }
  0x6b   : > { %6837 = vst [vmem:[#allocation34_spill] sm:$0xff] %v4309_v11  ;;  %v487_v15 = vmax.f32 %v358_v60, %v359_v61  ;;  %v274_v11 = vld [vmem:[%s4134_s25 + $0x270] sm:$0xff] }
  0x6c   : > { %6838 = vst [vmem:[#allocation35_spill] sm:$0xff] %v4312_v13  ;;  %v255_v13 = vld [vmem:[%s4134_s25 + $0x1d8] sm:$0xff] }
  0x6d   : > { %6841 = vst [vmem:[#allocation38_spill] sm:$0xff] %v4323_v35 }
  0x6e   : > { %6842 = vst [vmem:[#allocation39_spill] sm:$0xff] %v4326_v38 }
  0x6f   : > { %431 = vmax.xlane.f32.xlu2 %v430_v16  ;;  %v484_v16 = vmax.f32 %v356_v3, %v357_v4  ;;  %6843 = vst [vmem:[#allocation40_spill] sm:$0xff] %v4333_v54  ;;  %v4339_v3 = vld [vmem:[%s4134_s25 + $0x150] sm:$0xff]  ;;  %v4342_v4 = vld [vmem:[%s4134_s25 + $0x158] sm:$0xff] }
  0x70   : > { %428 = vmax.xlane.f32.xlu1 %v427_v23  ;;  %v4315_v23 = vld [vmem:[%s4134_s25 + $0x130] sm:$0xff]  ;;  %6844 = vst [vmem:[#allocation41_spill] sm:$0xff] %v4336_v55 }
  0x71   : > { %425 = vmax.xlane.f32.xlu0 %v424_v24  ;;  %6839 = vst [vmem:[#allocation36_spill] sm:$0xff] %v4315_v23  ;;  %v4318_v24 = vld [vmem:[%s4134_s25 + $0x138] sm:$0xff]  ;;  %v330_v39 = vand.u32 2147483647, %v4315_v23  ;;  %v257_v23 = vld [vmem:[%s4134_s25 + $0x1e8] sm:$0xff] }
  0x72   : > { %6840 = vst [vmem:[#allocation37_spill] sm:$0xff] %v4318_v24  ;;  %v331_v40 = vand.u32 2147483647, %v4318_v24 }
  0x73   : > { %6845 = vst [vmem:[#allocation42_spill] sm:$0xff] %v4339_v3 }
  0x74   : > { %v445_v60 = vmax.f32 %v330_v39, %v331_v40  ;;  %6846 = vst [vmem:[#allocation43_spill] sm:$0xff] %v4342_v4  ;;  %v335_v39 = vand.u32 2147483647, %v4342_v4 }
  0x77   : > { %440 = vmax.xlane.f32.xlu2 %v439_v41  ;;  %v360_v41 = vand.u32 2147483647, %v4323_v35  ;;  %v251_v35 = vld [vmem:[%s4134_s25 + $0x1b8] sm:$0xff] }
  0x78   : > { %437 = vmax.xlane.f32.xlu1 %v436_v46  ;;  %v361_v46 = vand.u32 2147483647, %v4326_v38 }
  0x79   : > { %434 = vmax.xlane.f32.xlu0 %v433_v49  ;;  %v493_v49 = vmax.f32 %v362_v27, %v363_v30  ;;  %v4350_v27 = vld [vmem:[%s4134_s25 + $0x148] sm:$0xff]  ;;  %v334_v30 = vand.u32 2147483647, %v4339_v3 }
  0x7a   : > { %v490_v61 = vmax.f32 %v360_v41, %v361_v46  ;;  %6848 = vst [vmem:[#allocation45_spill] sm:$0xff] %v4350_v27  ;;  %v333_v41 = vand.u32 2147483647, %v4350_v27  ;;  %v4366_v3 = vld [vmem:[%s4134_s25 + $0x188] sm:$0xff] }
  0x7b   : > { %6852 = vst [vmem:[#allocation49_spill] sm:$0xff] %v4366_v3 }
  0x7f   : > { %443 = vmax.xlane.f32.xlu2 %v442_v10  ;;  %v336_v10 = vand.u32 2147483647, %v4333_v54  ;;  %v451_v54 = vmax.f32 %v334_v30, %v335_v39  ;;  %v341_v39 = vand.u32 2147483647, %v4366_v3 }
  0x80   : > { %488 = vmax.xlane.f32.xlu1 %v487_v15  ;;  %v337_v15 = vand.u32 2147483647, %v4336_v55  ;;  %v4360_v55 = vld [vmem:[%s4134_s25 + $0x198] sm:$0xff] }
  0x81   : > { %485 = vmax.xlane.f32.xlu0 %v484_v16  ;;  %v4347_v16 = vld [vmem:[%s4134_s25 + $0x140] sm:$0xff]  ;;  %6850 = vst [vmem:[#allocation47_spill] sm:$0xff] %v4360_v55  ;;  %v343_v27 = vand.u32 2147483647, %v4360_v55  ;;  %v4384_v55 = vld [vmem:[%s4134_s25 + $0x1c8] sm:$0xff] }
  0x82   : > { %6847 = vst [vmem:[#allocation44_spill] sm:$0xff] %v4347_v16  ;;  %v332_v40 = vand.u32 2147483647, %v4347_v16  ;;  %v454_v46 = vmax.f32 %v336_v10, %v337_v15  ;;  %v4371_v10 = vld [vmem:[%s4134_s25 + $0x170] sm:$0xff]  ;;  %v4374_v15 = vld [vmem:[%s4134_s25 + $0x178] sm:$0xff] }
  0x83   : > { %6853 = vst [vmem:[#allocation50_spill] sm:$0xff] %v4371_v10 }
  0x84   : > { %v448_v38 = vmax.f32 %v332_v40, %v333_v41  ;;  %6854 = vst [vmem:[#allocation51_spill] sm:$0xff] %v4374_v15  ;;  %v338_v40 = vand.u32 2147483647, %v4371_v10  ;;  %v339_v41 = vand.u32 2147483647, %v4374_v15  ;;  %v248_v10 = vld [vmem:[%s4134_s25 + $0x1a0] sm:$0xff] }
  0x85   : > { %6856 = vst [vmem:[#allocation53_spill] sm:$0xff] %v4384_v55  ;;  %v249_v15 = vld [vmem:[%s4134_s25 + $0x1a8] sm:$0xff] }
  0x86   : > { %v457_v4 = vmax.f32 %v338_v40, %v339_v41  ;;  %v258_v41 = vld [vmem:[%s4134_s25 + $0x1f0] sm:$0xff] }
  0x87   : > { %494 = vmax.xlane.f32.xlu2 %v493_v49  ;;  %v4357_v49 = vld [vmem:[%s4134_s25 + $0x190] sm:$0xff] }
  0x88   : > { %446 = vmax.xlane.f32.xlu1 %v445_v60  ;;  %6849 = vst [vmem:[#allocation46_spill] sm:$0xff] %v4357_v49  ;;  %v4363_v60 = vld [vmem:[%s4134_s25 + $0x180] sm:$0xff] }
  0x89   : > { %491 = vmax.xlane.f32.xlu0 %v490_v61  ;;  %6851 = vst [vmem:[#allocation48_spill] sm:$0xff] %v4363_v60  ;;  %v342_v61 = vand.u32 2147483647, %v4357_v49  ;;  %v340_v30 = vand.u32 2147483647, %v4363_v60  ;;  %v4381_v49 = vld [vmem:[%s4134_s25 + $0x1c0] sm:$0xff] }
  0x8a   : > { %6855 = vst [vmem:[#allocation52_spill] sm:$0xff] %v4381_v49  ;;  %v348_v3 = vand.u32 2147483647, %v4381_v49  ;;  %v259_v60 = vld [vmem:[%s4134_s25 + $0x1f8] sm:$0xff]  ;;  %v256_v49 = vld [vmem:[%s4134_s25 + $0x1e0] sm:$0xff] }
  0x8b   : > { %v460_v16 = vmax.f32 %v340_v30, %v341_v39  ;;  %v344_v30 = vand.u32 2147483647, %v248_v10  ;;  %v345_v39 = vand.u32 2147483647, %v249_v15  ;;  %v351_v10 = vand.u32 2147483647, %v255_v13 }
  0x8d   : > { %v466_v24 = vmax.f32 %v344_v30, %v345_v39  ;;  %v270_v39 = vld [vmem:[%s4134_s25 + $0x250] sm:$0xff] }
  0x8f   : > { %455 = vmax.xlane.f32.xlu2 %v454_v46  ;;  %v463_v46 = vmax.f32 %v342_v61, %v343_v27  ;;  %v347_v61 = vand.u32 2147483647, %v251_v35  ;;  %v352_v35 = vand.u32 2147483647, %v256_v49  ;;  %v268_v49 = vld [vmem:[%s4134_s25 + $0x240] sm:$0xff] }
  0x90   : > { %452 = vmax.xlane.f32.xlu1 %v451_v54  ;;  %v250_v54 = vld [vmem:[%s4134_s25 + $0x1b0] sm:$0xff] }
  0x91   : > { %449 = vmax.xlane.f32.xlu0 %v448_v38  ;;  %v349_v38 = vand.u32 2147483647, %v4384_v55  ;;  %v346_v27 = vand.u32 2147483647, %v250_v54  ;;  %v354_v55 = vand.u32 2147483647, %v258_v41 }
  0x92   : > { %v254_v54 = vld [vmem:[%s4134_s25 + $0x1d0] sm:$0xff] }
  0x93   : > { %v472_v40 = vmax.f32 %v348_v3, %v349_v38  ;;  %v353_v3 = vand.u32 2147483647, %v257_v23  ;;  %v272_v38 = vld [vmem:[%s4134_s25 + $0x260] sm:$0xff]  ;;  %v366_v23 = vand.u32 2147483647, %v270_v39 }
  0x97   : > { %464 = vmax.xlane.f32.xlu2 %v463_v46  ;;  %v469_v46 = vmax.f32 %v346_v27, %v347_v61  ;;  %v273_v27 = vld [vmem:[%s4134_s25 + $0x268] sm:$0xff]  ;;  %v478_v61 = vmax.f32 %v352_v35, %v353_v3  ;;  %v279_v35 = vld [vmem:[%s4134_s25 + $0x298] sm:$0xff] }
  0x98   : > { %461 = vmax.xlane.f32.xlu1 %v460_v16  ;;  %v355_v16 = vand.u32 2147483647, %v259_v60  ;;  %v368_v60 = vand.u32 2147483647, %v272_v38  ;;  %v369_v41 = vand.u32 2147483647, %v273_v27 }
  0x99   : > { %458 = vmax.xlane.f32.xlu0 %v457_v4  ;;  %v350_v4 = vand.u32 2147483647, %v254_v54  ;;  %v278_v54 = vld [vmem:[%s4134_s25 + $0x290] sm:$0xff]  ;;  %v375_v27 = vand.u32 2147483647, %v279_v35 }
  0x9a   : > { %v481_v15 = vmax.f32 %v354_v55, %v355_v16  ;;  %v502_v16 = vmax.f32 %v368_v60, %v369_v41  ;;  %v374_v38 = vand.u32 2147483647, %v278_v54  ;;  %v371_v60 = vand.u32 2147483647, %v275_v57  ;;  %v285_v57 = vld [vmem:[%s4134_s25 + $0x2c8] sm:$0xff] }
  0x9b   : > { %v475_v30 = vmax.f32 %v350_v4, %v351_v10  ;;  %v276_v10 = vld [vmem:[%s4134_s25 + $0x280] sm:$0xff] }
  0x9f   : > { %473 = vmax.xlane.f32.xlu2 %v472_v40  ;;  %v271_v40 = vld [vmem:[%s4134_s25 + $0x258] sm:$0xff] }
  0xa0   : > { %470 = vmax.xlane.f32.xlu1 %v469_v46  ;;  %v269_v46 = vld [vmem:[%s4134_s25 + $0x248] sm:$0xff]  ;;  %v367_v13 = vand.u32 2147483647, %v271_v40  ;;  %v370_v40 = vand.u32 2147483647, %v274_v11  ;;  %v284_v11 = vld [vmem:[%s4134_s25 + $0x2c0] sm:$0xff] }
  0xa1   : > { %467 = vmax.xlane.f32.xlu0 %v466_v24  ;;  %v364_v24 = vand.u32 2147483647, %v268_v49  ;;  %v365_v55 = vand.u32 2147483647, %v269_v46  ;;  %v280_v46 = vld [vmem:[%s4134_s25 + $0x2a0] sm:$0xff]  ;;  %v281_v49 = vld [vmem:[%s4134_s25 + $0x2a8] sm:$0xff] }
  0xa2   : > { %v499_v3 = vmax.f32 %v366_v23, %v367_v13  ;;  %v511_v23 = vmax.f32 %v374_v38, %v375_v27  ;;  %v505_v27 = vmax.f32 %v370_v40, %v371_v60  ;;  %v381_v13 = vand.u32 2147483647, %v285_v57 }
  0xa3   : > { %v496_v4 = vmax.f32 %v364_v24, %v365_v55  ;;  %v282_v55 = vld [vmem:[%s4134_s25 + $0x2b0] sm:$0xff]  ;;  %v380_v24 = vand.u32 2147483647, %v284_v11  ;;  %v376_v57 = vand.u32 2147483647, %v280_v46  ;;  %v289_v11 = vld [vmem:[%s4134_s25 + $0x2e8] sm:$0xff] }
  0xa4   : > { %v378_v40 = vand.u32 2147483647, %v282_v55  ;;  %v377_v35 = vand.u32 2147483647, %v281_v49  ;;  %v290_v46 = vld [vmem:[%s4134_s25 + $0x2f0] sm:$0xff]  ;;  %v291_v49 = vld [vmem:[%s4134_s25 + $0x2f8] sm:$0xff] }
  0xa5   : > { %v520_v38 = vmax.f32 %v380_v24, %v381_v13  ;;  %v387_v54 = vand.u32 2147483647, %v291_v49 }
  0xa7   : > { %482 = vmax.xlane.f32.xlu2 %v481_v15  ;;  %v277_v15 = vld [vmem:[%s4134_s25 + $0x288] sm:$0xff] }
  0xa8   : > { %479 = vmax.xlane.f32.xlu1 %v478_v61  ;;  %v372_v61 = vand.u32 2147483647, %v276_v10  ;;  %v373_v39 = vand.u32 2147483647, %v277_v15  ;;  %v286_v10 = vld [vmem:[%s4134_s25 + $0x2d0] sm:$0xff] }
  0xa9   : > { %476 = vmax.xlane.f32.xlu0 %v475_v30  ;;  %v382_v15 = vand.u32 2147483647, %v286_v10 }
  0xaf   : > { %503 = vmax.xlane.f32.xlu2 %v502_v16  ;;  %v283_v16 = vld [vmem:[%s4134_s25 + $0x2b8] sm:$0xff] }
  0xb0   : > { %500 = vmax.xlane.f32.xlu1 %v499_v3  ;;  %v379_v60 = vand.u32 2147483647, %v283_v16  ;;  %v287_v3 = vld [vmem:[%s4134_s25 + $0x2d8] sm:$0xff] }
  0xb1   : > { %497 = vmax.xlane.f32.xlu0 %v496_v4  ;;  %v508_v4 = vmax.f32 %v372_v61, %v373_v39  ;;  %v288_v61 = vld [vmem:[%s4134_s25 + $0x2e0] sm:$0xff] }
  0xb2   : > { %v517_v13 = vmax.f32 %v378_v40, %v379_v60 }
  0xb7   : > { %512 = vmax.xlane.f32.xlu2 %v511_v23  ;;  %v386_v23 = vand.u32 2147483647, %v290_v46 }
  0xb8   : > { %509 = vmax.xlane.f32.xlu1 %v508_v4  ;;  %v514_v4 = vmax.f32 %v376_v57, %v377_v35  ;;  %v384_v35 = vand.u32 2147483647, %v288_v61  ;;  %v385_v57 = vand.u32 2147483647, %v289_v11 }
  0xb9   : > { %506 = vmax.xlane.f32.xlu0 %v505_v27  ;;  %v383_v27 = vand.u32 2147483647, %v287_v3  ;;  %v529_v45 = vmax.f32 %v386_v23, %v387_v54 }
  0xba   : > { %v526_v39 = vmax.f32 %v384_v35, %v385_v57 }
  0xbb   : > { %v523_v50 = vmax.f32 %v382_v15, %v383_v27 }
  0xbf   : > { %521 = vmax.xlane.f32.xlu2 %v520_v38  ;;  %v4470_v38 = vshrl.u32 %v6863_v53, 7 }
  0xc0   : > { %518 = vmax.xlane.f32.xlu1 %v517_v13 }
  0xc1   : > { %515 = vmax.xlane.f32.xlu0 %v514_v4  ;;  %v3225_v46 = vadd.s32 32, %v4470_v38  ;;  %v3223_v35 = vadd.s32 16, %v4470_v38  ;;  %v3224_v15 = vadd.s32 24, %v4470_v38 }
  0xc2   : > { %v402_v16 = vpop.xlane.xlu2 %401 }
  0xc3   : > { %v536_v60 = vmul.f32 0.0078125, %v402_v16  ;;  %v396_v49 = vpop.xlane.xlu1 %395 }
  0xc4   : > { %v534_v3 = vmul.f32 0.0078125, %v396_v49  ;;  %v390_v56 = vpop.xlane.xlu0 %389  ;;  %v6781_v49 = vmov 0.0  }
  0xc5   : > { %v584_v10 = vmax.f32 %v536_v60, 1e-05  ;;  %v532_v23 = vmul.f32 0.0078125, %v390_v56  ;;  %v4481_v60 = vand.u32 127, %v6863_v53  ;;  %v3226_v56 = vadd.s32 40, %v4470_v38 }
  0xc6   : > { %v582_v30 = vmax.f32 %v534_v3, 1e-05 }
  0xc7   : > { %v4477_v61 = vmin.f32 %v584_v10, 10000.0  ;;  %530 = vmax.xlane.f32.xlu2 %v529_v45  ;;  %v580_v57 = vmax.f32 %v532_v23, 1e-05  ;;  %vm3243_vm0 = vcmp.eq.s32.totalorder %v3225_v46, %v4481_v60  ;;  %vm3241_vm1 = vcmp.eq.s32.totalorder %v3223_v35, %v4481_v60 }
  0xc8   : > { %527 = vmax.xlane.f32.xlu1 %v526_v39  ;;  %v4490_v11 = vmin.f32 %v582_v30, 10000.0  ;;  %vm3239_vm2 = vcmp.eq.s32.totalorder %v4470_v38, %v4481_v60  ;;  %vm3244_vm3 = vcmp.eq.s32.totalorder %v3226_v56, %v4481_v60  ;;  %vm3242_vm4 = vcmp.eq.s32.totalorder %v3224_v15, %v4481_v60 }
  0xc9   : > { %3652 = vrcp.f32 %v4477_v61  ;;  %v4492_v13 = vmin.f32 %v580_v57, 10000.0  ;;  %524 = vmax.xlane.f32.xlu0 %v523_v50  ;;  %v745_v46 = vand.u32 2147483647, %v4477_v61  ;;  %v747_v35 = vand.u32 2147483648, %v4477_v61 }
  0xca   : > { %v405_v40 = vpop.xlane.xlu2 %404  ;;  %3654 = vrcp.f32 %v4490_v11  ;;  %v4510_v55 = vsel %vm3243_vm0, 1.0, %v6781_v49  ;;  %v4513_v10 = vsel %vm3241_vm1, 1.0, %v6781_v49  ;;  %v4517_v30 = vsel %vm3239_vm2, 1.0, %v6781_v49 }
  0xcb   : > { %v537_v16 = vmul.f32 0.0078125, %v405_v40  ;;  %v399_v3 = vpop.xlane.xlu1 %398  ;;  %3656 = vrcp.f32 %v4492_v13  ;;  %v4520_v40 = vsel %vm3244_vm3, 1.0, %v6781_v49  ;;  %v4523_v57 = vsel %vm3242_vm4, 1.0, %v6781_v49 }
  0xcc   : > { %v535_v56 = vmul.f32 0.0078125, %v399_v3  ;;  %vm741_vm5 = vweird.f32 %v4477_v61  ;;  %v715_v50 = vand.u32 2147483647, %v4490_v11  ;;  %v717_v54 = vand.u32 2147483648, %v4490_v11  ;;  %v393_v31 = vpop.xlane.xlu0 %392 }
  0xcd   : > { %v585_v24 = vmax.f32 %v537_v16, 1e-05  ;;  %vm4530_vm6 = vcmp.eq.f32.partialorder %v745_v46, 8.507059e+37  ;;  %v748_v27 = vor.u32 1.1754944e-38, %v747_v35  ;;  %v685_v41 = vand.u32 2147483647, %v4492_v13 }
  0xce   : > { %v687_v42 = vand.u32 2147483648, %v4492_v13  ;;  %v583_v34 = vmax.f32 %v535_v56, 1e-05  ;;  %vm711_vm8 = vweird.f32 %v4490_v11  ;;  %vm4540_vm9 = vcmp.eq.f32.partialorder %v715_v50, 8.507059e+37 }
  0xcf   : > { %v3653_v39 = vpop.eup %3652  ;;  %v4528_v23 = vmin.f32 %v585_v24, 10000.0  ;;  %v718_v26 = vor.u32 1.1754944e-38, %v717_v54  ;;  %vm681_vm10 = vweird.f32 %v4492_v13  ;;  %vm4545_vm11 = vcmp.eq.f32.partialorder %v685_v41, 8.507059e+37 }
  0xd0   : > { %v737_v15 = vmul.f32 %v3653_v39, %v4477_v61  ;;  %v3655_v16 = vpop.eup %3654  ;;  %vm742_vm7 = vweird.f32 %v3653_v39  ;;  %v4549_v56 = vmul.f32 0.0078125, %v393_v31  ;;  %v4553_v50 = vmin.f32 %v583_v34, 10000.0 }
  0xd1   : > { %v3657_v4 = vpop.eup %3656  ;;  %v707_v49 = vmul.f32 %v3655_v16, %v4490_v11  ;;  %3658 = vrcp.f32 %v4528_v23  ;;  %vm743_vm12 = vmor %vm741_vm5, %vm742_vm7  ;;  %vm712_vm13 = vweird.f32 %v3655_v16  ;;  %v760_v9 = vand.u32 2147483647, %v4528_v23 }
  0xd2   : > { %v738_v3 = vsub.f32 1.0, %v737_v15  ;;  %v677_v46 = vmul.f32 %v3657_v4, %v4492_v13  ;;  %vm682_vm14 = vweird.f32 %v3657_v4  ;;  %vm713_vm15 = vmor %vm711_vm8, %vm712_vm13  ;;  %vm756_vm1 = vweird.f32 %v4528_v23 }
  0xd3   : > { %v708_v15 = vsub.f32 1.0, %v707_v49  ;;  %v688_v49 = vor.u32 1.1754944e-38, %v687_v42  ;;  %vm683_vm0 = vmor %vm681_vm10, %vm682_vm14  ;;  %3660 = vrcp.f32 %v4553_v50  ;;  %vm4581_vm2 = vcmp.eq.f32.partialorder %v760_v9, 8.507059e+37 }
  0xd4   : > { %v739_v24 = vmul.f32 %v3653_v39, %v738_v3  ;;  %v678_v19 = vsub.f32 1.0, %v677_v46 }
  0xd5   : > { %v709_v3 = vmul.f32 %v3655_v16, %v708_v15  ;;  %v762_v15 = vand.u32 2147483648, %v4528_v23 }
  0xd6   : > { %v740_v25 = vadd.f32 %v3653_v39, %v739_v24  ;;  %v679_v54 = vmul.f32 %v3657_v4, %v678_v19  ;;  %v4556_v24 = vadd.s32 8, %v4470_v38 }
  0xd7   : > { %v4558_v41 = vpop.eup %3658  ;;  %v710_v46 = vadd.f32 %v3655_v16, %v709_v3 }
  0xd8   : > { %v744_v53 = vsel %vm743_vm12, %v3653_v39, %v740_v25  ;;  %v680_v19 = vadd.f32 %v3657_v4, %v679_v54  ;;  %v752_v25 = vmul.f32 %v4558_v41, %v4528_v23  ;;  %vm757_vm5 = vweird.f32 %v4558_v41 }
  0xd9   : > { %v749_v31 = vsel %vm4530_vm6, %v748_v27, %v744_v53  ;;  %v714_v39 = vsel %vm713_vm15, %v3655_v16, %v710_v46  ;;  %vm758_vm8 = vmor %vm756_vm1, %vm757_vm5  ;;  %vm726_vm12 = vweird.f32 %v4553_v50 }
  0xda   : > { %v1404_v42 = vmul.f32 %v749_v31, %v4141_v0  ;;  %v1405_v34 = vmul.f32 %v749_v31, %v4144_v1  ;;  %v719_v3 = vsel %vm4540_vm9, %v718_v26, %v714_v39  ;;  %v684_v31 = vsel %vm683_vm0, %v3657_v4, %v680_v19 }
  0xdb   : > { %v1400_v54 = vmul.f32 %v719_v3, %v4147_v2  ;;  %v1401_v6 = vmul.f32 %v719_v3, %v4152_v5  ;;  %v689_v16 = vsel %vm4545_vm11, %v688_v49, %v684_v31  ;;  %v753_v46 = vsub.f32 1.0, %v752_v25 }
  0xdc   : > { %v1500_v27 = vand.u32 2147483647, %v1404_v42  ;;  %v1501_v45 = vand.u32 2147483647, %v1405_v34  ;;  %v763_v42 = vor.u32 1.1754944e-38, %v762_v15  ;;  %v1396_v35 = vmul.f32 %v689_v16, %v4156_v7  ;;  %v4598_v15 = vpop.eup %3660 }
  0xdd   : > { %v1496_v26 = vand.u32 2147483647, %v1400_v54  ;;  %v1497_v4 = vand.u32 2147483647, %v1401_v6  ;;  %v4591_v19 = vmul.f32 %v689_v16, %v4159_v8  ;;  %v754_v25 = vmul.f32 %v4558_v41, %v753_v46 }
  0xde   : > { %v1692_v63 = vmax.f32 %v1500_v27, 0.0001  ;;  %v1693_v62 = vmax.f32 %v1501_v45, 0.0001  ;;  %vm4585_vm3 = vcmp.lt.f32.partialorder %v1500_v27, 0.5  ;;  %vm4593_vm4 = vcmp.lt.f32.partialorder %v1501_v45, 0.5 }
  0xdf   : > { %v1688_v39 = vmax.f32 %v1496_v26, 0.0001  ;;  %v1689_v27 = vmax.f32 %v1497_v4, 0.0001  ;;  %vm4602_vm6 = vcmp.lt.f32.partialorder %v1496_v26, 0.5  ;;  %v722_v53 = vmul.f32 %v4598_v15, %v4553_v50 }
  0xe0   : > { %v1788_v9 = vmin.f32 %v1692_v63, 10000.0  ;;  %v1789_v49 = vmin.f32 %v1693_v62, 10000.0  ;;  %v1492_v45 = vand.u32 2147483647, %v1396_v35  ;;  %v755_v63 = vadd.f32 %v4558_v41, %v754_v25 }
  0xe1   : > { %v1784_v62 = vmin.f32 %v1688_v39, 10000.0  ;;  %v1785_v16 = vmin.f32 %v1689_v27, 10000.0  ;;  %v1493_v46 = vand.u32 2147483647, %v4591_v19  ;;  %vm4610_vm7 = vcmp.lt.f32.partialorder %v1497_v4, 0.5 }
  0xe2   : > { %v1884_v3 = vmul.f32 1.3333334, %v1788_v9  ;;  %v1885_v31 = vmul.f32 1.3333334, %v1789_v49  ;;  %v1684_v26 = vmax.f32 %v1492_v45, 0.0001  ;;  %v759_v19 = vsel %vm758_vm8, %v4558_v41, %v755_v63 }
  0xe3   : > { %v1880_v35 = vmul.f32 1.3333334, %v1784_v62  ;;  %v1881_v9 = vmul.f32 1.3333334, %v1785_v16  ;;  %vm4618_vm9 = vcmp.lt.f32.partialorder %v1492_v45, 0.5  ;;  %v764_v51 = vsel %vm4581_vm2, %v763_v42, %v759_v19 }
  0xe4   : > { %v2076_v58 = vand.u32 2139095040, %v1884_v3  ;;  %v2077_v52 = vand.u32 2139095040, %v1885_v31  ;;  %v1685_v4 = vmax.f32 %v1493_v46, 0.0001  ;;  %v1780_v27 = vmin.f32 %v1684_v26, 10000.0 }
  0xe5   : > { %v2072_v3 = vand.u32 2139095040, %v1880_v35  ;;  %v2073_v31 = vand.u32 2139095040, %v1881_v9  ;;  %v723_v48 = vsub.f32 1.0, %v722_v53  ;;  %v4630_v35 = vmul.f32 %v764_v51, %v4164_v12 }
  0xe6   : > { %v2268_v25 = vmax.f32 %v2076_v58, 1.0  ;;  %v2269_v39 = vmax.f32 %v2077_v52, 1.0  ;;  %v1781_v16 = vmin.f32 %v1685_v4, 10000.0  ;;  %v1876_v47 = vmul.f32 1.3333334, %v1780_v27 }
  0xe7   : > { %v2264_v58 = vmax.f32 %v2072_v3, 1.0  ;;  %v2265_v52 = vmax.f32 %v2073_v31, 1.0  ;;  %v4633_v59 = vmul.f32 %v764_v51, %v4168_v14  ;;  %v6896_v51 = vand.u32 2147483648, %v4144_v1 }
  0xe8   : > { %v2364_v62 = vsel %vm4585_vm3, 0.0, %v2268_v25  ;;  %v2365_v45 = vsel %vm4593_vm4, 0.0, %v2269_v39  ;;  %v1877_v63 = vmul.f32 1.3333334, %v1781_v16  ;;  %v2068_v26 = vand.u32 2139095040, %v1876_v47 }
  0xe9   : > { %v2460_v44 = vmin.f32 %v2364_v62, 64.0  ;;  %v2461_v41 = vmin.f32 %v2365_v45, 64.0  ;;  %v2360_v34 = vsel %vm4602_vm6, 0.0, %v2264_v58  ;;  %v2361_v17 = vsel %vm4610_vm7, 0.0, %v2265_v52 }
  0xea   : > { %v2456_v9 = vmin.f32 %v2360_v34, 64.0  ;;  %v2457_v19 = vmin.f32 %v2361_v17, 64.0  ;;  %v2069_v47 = vand.u32 2139095040, %v1877_v63  ;;  %v2260_v25 = vmax.f32 %v2068_v26, 1.0 }
  0xeb   : > { %v2556_v53 = vmul.f32 %v2460_v44, %v4477_v61  ;;  %v2557_v42 = vmul.f32 %v2461_v41, %v4477_v61  ;;  %v6895_v39 = vand.u32 2147483648, %v4141_v0  ;;  %v1502_v44 = vand.u32 2147483647, %v4630_v35 }
  0xec   : > { %v1503_v3 = vand.u32 2147483647, %v4633_v59  ;;  %v2552_v54 = vmul.f32 %v2456_v9, %v4490_v11  ;;  %v2553_v31 = vmul.f32 %v2457_v19, %v4490_v11  ;;  %v2261_v6 = vmax.f32 %v2069_v47, 1.0 }
  0xed   : > { %v2940_v4 = vor.u32 %v6895_v39, %v2556_v53  ;;  %v2941_v27 = vor.u32 %v6896_v51, %v2557_v42  ;;  %v2356_v62 = vsel %vm4618_vm9, 0.0, %v2260_v25  ;;  %vm1589_vm10 = vcmp.lt.f32.partialorder %v1493_v46, 0.5 }
  0xee   : > { %v2452_v0 = vmin.f32 %v2356_v62, 64.0  ;;  %v1694_v1 = vmax.f32 %v1502_v44, 0.0001  ;;  %vm3240_vm11 = vcmp.eq.s32.totalorder %v4556_v24, %v4481_v60  ;;  %v6897_v45 = vand.u32 2147483648, %v4147_v2  ;;  %v3748_v62 = vld [vmem:[%s4134_s25 + $0x30] sm:$0xff] }
  0xef   : > { %3132 = vst [vmem:[%s4653_s19 + $0x40] sm:$0xff] %v2940_v4  ;;  %v6898_v49 = vand.u32 2147483648, %v4152_v5  ;;  %v2357_v58 = vsel %vm1589_vm10, 0.0, %v2261_v6  ;;  %v1695_v52 = vmax.f32 %v1503_v3, 0.0001  ;;  %v724_v46 = vmul.f32 %v4598_v15, %v723_v48 }
  0xf0   : > { %3133 = vst [vmem:[%s4653_s19 + $0x48] sm:$0xff] %v2941_v27  ;;  %v2936_v16 = vor.u32 %v6897_v45, %v2552_v54  ;;  %v2453_v63 = vmin.f32 %v2357_v58, 64.0  ;;  %v2548_v26 = vmul.f32 %v2452_v0, %v4492_v13  ;;  %v1790_v35 = vmin.f32 %v1694_v1, 10000.0  ;;  %v3749_v1 = vld [vmem:[%s4134_s25 + $0x38] sm:$0xff] }
  0xf1   : > { %v2937_v41 = vor.u32 %v6898_v49, %v2553_v31  ;;  %v1791_v59 = vmin.f32 %v1695_v52, 10000.0  ;;  %vm727_vm13 = vweird.f32 %v4598_v15  ;;  %v732_v2 = vand.u32 2147483648, %v4553_v50 }
  0xf2   : > { %3128 = vst [vmem:[%s4653_s19 + $0x20] sm:$0xff] %v2936_v16  ;;  %v2549_v5 = vmul.f32 %v2453_v63, %v4492_v13  ;;  %v6899_v53 = vand.u32 2147483648, %v4156_v7  ;;  %v1886_v34 = vmul.f32 1.3333334, %v1790_v35  ;;  %v725_v17 = vadd.f32 %v4598_v15, %v724_v46  ;;  %vm728_vm14 = vmor %vm726_vm12, %vm727_vm13 }
  0xf3   : > { %3129 = vst [vmem:[%s4653_s19 + $0x28] sm:$0xff] %v2937_v41  ;;  %v1887_v48 = vmul.f32 1.3333334, %v1791_v59  ;;  %v733_v9 = vor.u32 1.1754944e-38, %v732_v2  ;;  %v6900_v19 = vmov 0.0   ;;  %v6902_v7 = vand.u32 2147483648, %v4159_v8  ;;  %v414_v59 = vpop.xlane.xlu2 %413 }
  0xf4   : > { %v2932_v42 = vor.u32 %v6899_v53, %v2548_v26  ;;  %v4678_v47 = vsel %vm3240_vm11, 1.0, %v6900_v19  ;;  %v6901_v25 = vmax.f32 %v4549_v56, 1e-05  ;;  %v2078_v51 = vand.u32 2139095040, %v1886_v34 }
  0xf5   : > { %v2933_v4 = vor.u32 %v6902_v7, %v2549_v5  ;;  %v729_v27 = vsel %vm728_vm14, %v4598_v15, %v725_v17  ;;  %v6903_v54 = vand.u32 2147483647, %v4553_v50  ;;  %v3291_v24 = vmul.f32 %v4510_v55, %v4477_v61 }
  0xf6   : > { %v4682_v39 = vmin.f32 %v6901_v25, 10000.0  ;;  %3124 = vst [vmem:[%s4653_s19] sm:$0xff] %v2932_v42  ;;  %v2079_v31 = vand.u32 2139095040, %v1887_v48  ;;  %v3289_v56 = vmul.f32 %v4513_v10, %v4490_v11  ;;  %v2270_v8 = vmax.f32 %v2078_v51, 1.0 }
  0xf7   : > { %vm731_vm15 = vcmp.eq.f32.partialorder %v6903_v54, 8.507059e+37  ;;  %3125 = vst [vmem:[%s4653_s19 + $0x8] sm:$0xff] %v2933_v4  ;;  %v3287_v15 = vmul.f32 %v4517_v30, %v4492_v13  ;;  %vm1598_vm0 = vcmp.lt.f32.partialorder %v1502_v44, 0.5  ;;  %vm1599_vm1 = vcmp.lt.f32.partialorder %v1503_v3, 0.5 }
  0xf8   : > { %v734_v6 = vsel %vm731_vm15, %v733_v9, %v729_v27  ;;  %3662 = vrcp.f32 %v4682_v39  ;;  %v2271_v16 = vmax.f32 %v2079_v31, 1.0  ;;  %v3288_v61 = vmul.f32 %v4678_v47, %v4682_v39  ;;  %v411_v9 = vpop.xlane.xlu1 %410 }
  0xf9   : > { %v1402_v0 = vmul.f32 %v3748_v62, %v734_v6  ;;  %v1403_v45 = vmul.f32 %v3749_v1, %v734_v6  ;;  %v2366_v49 = vsel %vm1598_vm0, 0.0, %v2270_v8  ;;  %v3292_v63 = vmul.f32 %v4520_v40, %v4528_v23 }
  0xfa   : > { %v2367_v52 = vsel %vm1599_vm1, 0.0, %v2271_v16  ;;  %v2462_v11 = vmin.f32 %v2366_v49, 64.0  ;;  %v3303_v26 = vadd.f32 %v3288_v61, %v3287_v15  ;;  %v3290_v13 = vmul.f32 %v4523_v57, %v4553_v50 }
  0xfb   : > { %v1498_v41 = vand.u32 2147483647, %v1402_v0  ;;  %v1499_v58 = vand.u32 2147483647, %v1403_v45  ;;  %v2463_v35 = vmin.f32 %v2367_v52, 64.0  ;;  %v4707_v44 = vadd.s32 64, %v4470_v38 }
  0xfc   : > { %v2558_v3 = vmul.f32 %v2462_v11, %v4528_v23  ;;  %vm696_vm2 = vweird.f32 %v4682_v39  ;;  %v3304_v53 = vadd.f32 %v3303_v26, %v3289_v56  ;;  %v702_v48 = vand.u32 2147483648, %v4682_v39 }
  0xfd   : > { %v1690_v46 = vmax.f32 %v1498_v41, 0.0001  ;;  %v1691_v5 = vmax.f32 %v1499_v58, 0.0001  ;;  %v2559_v42 = vmul.f32 %v2463_v35, %v4528_v23  ;;  %v6904_v25 = vand.u32 2147483648, %v4164_v12 }
  0xfe   : > { %v3663_v2 = vpop.eup %3662  ;;  %v3305_v51 = vadd.f32 %v3304_v53, %v3290_v13  ;;  %v540_v27 = vmul.f32 0.0078125, %v414_v59  ;;  %v6905_v54 = vand.u32 2147483648, %v4168_v14  ;;  %v700_v23 = vand.u32 2147483647, %v4682_v39 }
  0xff   : > { %v1786_v34 = vmin.f32 %v1690_v46, 10000.0  ;;  %v692_v17 = vmul.f32 %v3663_v2, %v4682_v39  ;;  %v2942_v7 = vor.u32 %v6904_v25, %v2558_v3  ;;  %v1787_v4 = vmin.f32 %v1691_v5, 10000.0 }
 0x100   : > { %v2943_v31 = vor.u32 %v6905_v54, %v2559_v42  ;;  %v588_v62 = vmax.f32 %v540_v27, 1e-05  ;;  %v539_v0 = vmul.f32 0.0078125, %v411_v9  ;;  %v3306_v1 = vadd.f32 %v3305_v51, %v3291_v24  ;;  %v6906_v54 = vld [vmem:[#allocation52_spill] sm:$0xff] }
 0x101   : > { %v1882_v6 = vmul.f32 1.3333334, %v1786_v34  ;;  %v693_v56 = vsub.f32 1.0, %v692_v17  ;;  %3134 = vst [vmem:[%s4653_s19 + $0x50] sm:$0xff] %v2942_v7  ;;  %v1883_v8 = vmul.f32 1.3333334, %v1787_v4  ;;  %vm697_vm3 = vweird.f32 %v3663_v2 }
 0x102   : > { %3135 = vst [vmem:[%s4653_s19 + $0x58] sm:$0xff] %v2943_v31  ;;  %vm3247_vm4 = vcmp.eq.s32.totalorder %v4707_v44, %v4481_v60  ;;  %v703_v16 = vor.u32 1.1754944e-38, %v702_v48  ;;  %v4723_v14 = vmin.f32 %v588_v62, 10000.0  ;;  %v3228_v61 = vadd.s32 56, %v4470_v38  ;;  %vm698_vm6 = vmor %vm696_vm2, %vm697_vm3  ;;  %v3751_v34 = vld [vmem:[%s4134_s25 + $0x18] sm:$0xff] }
 0x103   : > { %v2074_v45 = vand.u32 2139095040, %v1882_v6  ;;  %v694_v15 = vmul.f32 %v3663_v2, %v693_v56  ;;  %v2075_v12 = vand.u32 2139095040, %v1883_v8  ;;  %v3227_v11 = vadd.s32 48, %v4470_v38  ;;  %v6907_v6 = vld [vmem:[#allocation53_spill] sm:$0xff] }
 0x104   : > { %v4727_v26 = vadd.f32 %v3306_v1, %v3292_v63  ;;  %vm1594_vm5 = vcmp.lt.f32.partialorder %v1498_v41, 0.5  ;;  %3664 = vrcp.f32 %v4723_v14  ;;  %v587_v35 = vmax.f32 %v539_v0, 1e-05  ;;  %v408_v63 = vpop.xlane.xlu0 %407  ;;  %v3750_v41 = vld [vmem:[%s4134_s25 + $0x10] sm:$0xff] }
 0x105   : > { %v2266_v49 = vmax.f32 %v2074_v45, 1.0  ;;  %v695_v52 = vadd.f32 %v3663_v2, %v694_v15  ;;  %v2267_v24 = vmax.f32 %v2075_v12, 1.0  ;;  %vm1595_vm7 = vcmp.lt.f32.partialorder %v1499_v58, 0.5  ;;  %v423_v15 = vpop.xlane.xlu2 %422 }
 0x106   : > { %vm701_vm8 = vcmp.eq.f32.partialorder %v700_v23, 8.507059e+37  ;;  %vm3246_vm9 = vcmp.eq.s32.totalorder %v3228_v61, %v4481_v60  ;;  %vm3245_vm10 = vcmp.eq.s32.totalorder %v3227_v11, %v4481_v60  ;;  %v805_v58 = vand.u32 2147483647, %v4723_v14 }
 0x107   : > { %v2362_v46 = vsel %vm1594_vm5, 0.0, %v2266_v49  ;;  %v699_v13 = vsel %vm698_vm6, %v3663_v2, %v695_v52  ;;  %v2363_v59 = vsel %vm1595_vm7, 0.0, %v2267_v24  ;;  %v807_v2 = vand.u32 2147483648, %v4723_v14 }
 0x108   : > { %v2458_v3 = vmin.f32 %v2362_v46, 64.0  ;;  %v704_v5 = vsel %vm701_vm8, %v703_v16, %v699_v13  ;;  %v2459_v53 = vmin.f32 %v2363_v59, 64.0  ;;  %v4739_v9 = vmin.f32 %v587_v35, 10000.0 }
 0x109   : > { %v1398_v42 = vmul.f32 %v3750_v41, %v704_v5  ;;  %v1399_v17 = vmul.f32 %v3751_v34, %v704_v5  ;;  %v538_v51 = vmul.f32 0.0078125, %v408_v63  ;;  %v6908_v23 = vand.u32 2147483648, %v4173_v18 }
 0x10a   : > { %v2554_v48 = vmul.f32 %v2458_v3, %v4553_v50  ;;  %v2555_v25 = vmul.f32 %v2459_v53, %v4553_v50  ;;  %v3665_v27 = vpop.eup %3664  ;;  %3666 = vrcp.f32 %v4739_v9  ;;  %v6909_v62 = vand.u32 2147483648, %v4176_v20 }
 0x10b   : > { %v1494_v7 = vand.u32 2147483647, %v1398_v42  ;;  %v1495_v4 = vand.u32 2147483647, %v1399_v17  ;;  %v4753_v50 = vsel %vm3247_vm4, 1.0, %v6900_v19  ;;  %v4758_v45 = vsel %vm3246_vm9, 1.0, %v6900_v19 }
 0x10c   : > { %v2938_v8 = vor.u32 %v6908_v23, %v2554_v48  ;;  %v2939_v0 = vor.u32 %v6909_v62, %v2555_v25  ;;  %6910 = vst [vmem:[#allocation52_spill] sm:$0xff] %v4753_v50  ;;  %v797_v12 = vmul.f32 %v3665_v27, %v4723_v14  ;;  %vm4762_vm11 = vcmp.eq.f32.partialorder %v805_v58, 8.507059e+37 }
 0x10d   : > { %v1686_v1 = vmax.f32 %v1494_v7, 0.0001  ;;  %v1687_v18 = vmax.f32 %v1495_v4, 0.0001  ;;  %v808_v16 = vor.u32 1.1754944e-38, %v807_v2  ;;  %v4769_v44 = vsel %vm3245_vm10, 1.0, %v6900_v19 }
 0x10e   : > { %3130 = vst [vmem:[%s4653_s19 + $0x30] sm:$0xff] %v2938_v8  ;;  %vm801_vm12 = vweird.f32 %v4723_v14  ;;  %v790_v61 = vand.u32 2147483647, %v4739_v9  ;;  %v586_v52 = vmax.f32 %v538_v51, 1e-05  ;;  %v798_v35 = vsub.f32 1.0, %v797_v12 }
 0x10f   : > { %3131 = vst [vmem:[%s4653_s19 + $0x38] sm:$0xff] %v2939_v0  ;;  %v1782_v49 = vmin.f32 %v1686_v1, 10000.0  ;;  %v1783_v24 = vmin.f32 %v1687_v18, 10000.0  ;;  %v792_v46 = vand.u32 2147483648, %v4739_v9  ;;  %v543_v13 = vmul.f32 0.0078125, %v423_v15 }
 0x110   : > { %vm4775_vm13 = vcmp.lt.f32.partialorder %v1494_v7, 0.5  ;;  %vm786_vm14 = vweird.f32 %v4739_v9  ;;  %v4780_v11 = vmin.f32 %v586_v52, 10000.0  ;;  %v3667_v5 = vpop.eup %3666  ;;  %v799_v53 = vmul.f32 %v3665_v27, %v798_v35  ;;  %v3753_v35 = vld [vmem:[%s4134_s25 + $0x88] sm:$0xff] }
 0x111   : > { %v1878_v3 = vmul.f32 1.3333334, %v1782_v49  ;;  %v1879_v63 = vmul.f32 1.3333334, %v1783_v24  ;;  %vm802_vm15 = vweird.f32 %v3665_v27  ;;  %v591_v41 = vmax.f32 %v543_v13, 1e-05 }
 0x112   : > { %vm4782_vm0 = vcmp.lt.f32.partialorder %v1495_v4, 0.5  ;;  %v782_v17 = vmul.f32 %v3667_v5, %v4739_v9  ;;  %3668 = vrcp.f32 %v4780_v11  ;;  %v800_v58 = vadd.f32 %v3665_v27, %v799_v53  ;;  %vm803_vm2 = vmor %vm801_vm12, %vm802_vm15  ;;  %v3752_v24 = vld [vmem:[%s4134_s25 + $0x80] sm:$0xff] }
 0x113   : > { %v2070_v34 = vand.u32 2139095040, %v1878_v3  ;;  %v2071_v48 = vand.u32 2139095040, %v1879_v63  ;;  %vm4788_vm1 = vcmp.eq.f32.partialorder %v790_v61, 8.507059e+37  ;;  %v793_v25 = vor.u32 1.1754944e-38, %v792_v46 }
 0x114   : > { %v3294_v7 = vmul.f32 %v4758_v45, %v4739_v9  ;;  %v783_v51 = vsub.f32 1.0, %v782_v17  ;;  %vm787_vm3 = vweird.f32 %v3667_v5  ;;  %v775_v23 = vand.u32 2147483647, %v4780_v11 }
 0x115   : > { %v2262_v4 = vmax.f32 %v2070_v34, 1.0  ;;  %v2263_v8 = vmax.f32 %v2071_v48, 1.0  ;;  %v804_v62 = vsel %vm803_vm2, %v3665_v27, %v800_v58  ;;  %v777_v0 = vand.u32 2147483648, %v4780_v11  ;;  %vm788_vm4 = vmor %vm786_vm14, %vm787_vm3 }
 0x116   : > { %v4798_v1 = vmin.f32 %v591_v41, 10000.0  ;;  %v809_v18 = vsel %vm4762_vm11, %v808_v16, %v804_v62  ;;  %v784_v12 = vmul.f32 %v3667_v5, %v783_v51  ;;  %v3293_v49 = vmul.f32 %v4769_v44, %v4780_v11 }
 0x117   : > { %v2358_v15 = vsel %vm4775_vm13, 0.0, %v2262_v4  ;;  %v2359_v61 = vsel %vm4782_vm0, 0.0, %v2263_v8  ;;  %v1412_v27 = vmul.f32 %v3752_v24, %v809_v18  ;;  %v1413_v46 = vmul.f32 %v3753_v35, %v809_v18  ;;  %v3754_v18 = vld [vmem:[%s4134_s25 + $0x70] sm:$0xff] }
 0x118   : > { %v2454_v52 = vmin.f32 %v2358_v15, 64.0  ;;  %v3669_v13 = vpop.eup %3668  ;;  %v2455_v3 = vmin.f32 %v2359_v61, 64.0  ;;  %v785_v63 = vadd.f32 %v3667_v5, %v784_v12  ;;  %v3308_v59 = vadd.f32 %v4727_v26, %v3293_v49  ;;  %v3755_v12 = vld [vmem:[%s4134_s25 + $0x78] sm:$0xff] }
 0x119   : > { %3670 = vrcp.f32 %v4798_v1  ;;  %v1508_v16 = vand.u32 2147483647, %v1412_v27  ;;  %v1509_v53 = vand.u32 2147483647, %v1413_v46  ;;  %v767_v41 = vmul.f32 %v3669_v13, %v4780_v11 }
 0x11a   : > { %v2550_v20 = vmul.f32 %v2454_v52, %v4682_v39  ;;  %v2551_v42 = vmul.f32 %v2455_v3, %v4682_v39  ;;  %v789_v34 = vsel %vm788_vm4, %v3667_v5, %v785_v63  ;;  %vm771_vm5 = vweird.f32 %v4780_v11 }
 0x11b   : > { %v4819_v26 = vadd.f32 %v3308_v59, %v3294_v7  ;;  %v6919_v17 = vand.u32 2147483648, %v4179_v21  ;;  %v1700_v58 = vmax.f32 %v1508_v16, 0.0001  ;;  %vm4823_vm6 = vcmp.eq.f32.partialorder %v775_v23, 8.507059e+37 }
 0x11c   : > { %v778_v51 = vor.u32 1.1754944e-38, %v777_v0  ;;  %v6922_v8 = vand.u32 2147483648, %v4182_v22  ;;  %v1701_v39 = vmax.f32 %v1509_v53, 0.0001  ;;  %v794_v5 = vsel %vm4788_vm1, %v793_v25, %v789_v34 }
 0x11d   : > { %v2934_v48 = vor.u32 %v6919_v17, %v2550_v20  ;;  %v768_v15 = vsub.f32 1.0, %v767_v41  ;;  %v1796_v7 = vmin.f32 %v1700_v58, 10000.0  ;;  %v1410_v21 = vmul.f32 %v3754_v18, %v794_v5 }
 0x11e   : > { %v2935_v62 = vor.u32 %v6922_v8, %v2551_v42  ;;  %v1411_v49 = vmul.f32 %v3755_v12, %v794_v5  ;;  %vm772_vm7 = vweird.f32 %v3669_v13  ;;  %vm4837_vm8 = vcmp.lt.f32.partialorder %v1508_v16, 0.5 }
 0x11f   : > { %3126 = vst [vmem:[%s4653_s19 + $0x10] sm:$0xff] %v2934_v48  ;;  %v4834_v23 = vpop.eup %3670  ;;  %v1797_v22 = vmin.f32 %v1701_v39, 10000.0  ;;  %v769_v61 = vmul.f32 %v3669_v13, %v768_v15  ;;  %v850_v2 = vand.u32 2147483647, %v4798_v1  ;;  %v1892_v25 = vmul.f32 1.3333334, %v1796_v7  ;;  %vm773_vm11 = vmor %vm771_vm5, %vm772_vm7 }
 0x120   : > { %3127 = vst [vmem:[%s4653_s19 + $0x18] sm:$0xff] %v2935_v62  ;;  %v1506_v52 = vand.u32 2147483647, %v1410_v21  ;;  %v1507_v24 = vand.u32 2147483647, %v1411_v49  ;;  %v842_v27 = vmul.f32 %v4834_v23, %v4798_v1  ;;  %vm4844_vm9 = vcmp.lt.f32.partialorder %v1509_v53, 0.5 }
 0x121   : > { %v1893_v46 = vmul.f32 1.3333334, %v1797_v22  ;;  %v770_v3 = vadd.f32 %v3669_v13, %v769_v61  ;;  %vm846_vm10 = vweird.f32 %v4798_v1  ;;  %v2084_v63 = vand.u32 2139095040, %v1892_v25  ;;  %v3756_v39 = vld [vmem:[%s4134_s25 + $0x60] sm:$0xff]  ;;  %v3757_v15 = vld [vmem:[%s4134_s25 + $0x68] sm:$0xff] }
 0x122   : > { %v1698_v59 = vmax.f32 %v1506_v52, 0.0001  ;;  %vm847_vm12 = vweird.f32 %v4834_v23  ;;  %v852_v20 = vand.u32 2147483648, %v4798_v1  ;;  %v1699_v53 = vmax.f32 %v1507_v24, 0.0001 }
 0x123   : > { %v2085_v16 = vand.u32 2139095040, %v1893_v46  ;;  %v774_v41 = vsel %vm773_vm11, %v3669_v13, %v770_v3  ;;  %v843_v42 = vsub.f32 1.0, %v842_v27  ;;  %v2276_v34 = vmax.f32 %v2084_v63, 1.0  ;;  %vm848_vm0 = vmor %vm846_vm10, %vm847_vm12 }
 0x124   : > { %v1794_v17 = vmin.f32 %v1698_v59, 10000.0  ;;  %v779_v48 = vsel %vm4823_vm6, %v778_v51, %v774_v41  ;;  %vm4856_vm13 = vcmp.eq.f32.partialorder %v850_v2, 8.507059e+37  ;;  %v1795_v62 = vmin.f32 %v1699_v53, 10000.0 }
 0x125   : > { %v2277_v8 = vmax.f32 %v2085_v16, 1.0  ;;  %v1408_v5 = vmul.f32 %v3756_v39, %v779_v48  ;;  %v1409_v7 = vmul.f32 %v3757_v15, %v779_v48  ;;  %v2372_v18 = vsel %vm4837_vm8, 0.0, %v2276_v34  ;;  %v3758_v15 = vld [vmem:[%s4134_s25 + $0xb0] sm:$0xff] }
 0x126   : > { %vm4864_vm14 = vcmp.lt.f32.partialorder %v1506_v52, 0.5  ;;  %v1890_v21 = vmul.f32 1.3333334, %v1794_v17  ;;  %v844_v4 = vmul.f32 %v4834_v23, %v843_v42  ;;  %v2468_v12 = vmin.f32 %v2372_v18, 64.0 }
 0x127   : > { %v2373_v51 = vsel %vm4844_vm9, 0.0, %v2277_v8  ;;  %v1891_v49 = vmul.f32 1.3333334, %v1795_v62  ;;  %v1504_v22 = vand.u32 2147483647, %v1408_v5  ;;  %vm4873_vm15 = vcmp.lt.f32.partialorder %v1507_v24, 0.5 }
 0x128   : > { %v2469_v61 = vmin.f32 %v2373_v51, 64.0  ;;  %v2082_v2 = vand.u32 2139095040, %v1890_v21  ;;  %v1505_v25 = vand.u32 2147483647, %v1409_v7  ;;  %v845_v27 = vadd.f32 %v4834_v23, %v844_v4  ;;  %v3760_v4 = vld [vmem:[%s4134_s25 + $0xb8] sm:$0xff] }
 0x129   : > { %v2564_v0 = vmul.f32 %v2468_v12, %v4723_v14  ;;  %v2083_v46 = vand.u32 2139095040, %v1891_v49  ;;  %v1696_v3 = vmax.f32 %v1504_v22, 0.0001  ;;  %v853_v16 = vor.u32 1.1754944e-38, %v852_v20 }
 0x12a   : > { %v2565_v35 = vmul.f32 %v2469_v61, %v4723_v14  ;;  %v2274_v63 = vmax.f32 %v2082_v2, 1.0  ;;  %v1697_v59 = vmax.f32 %v1505_v25, 0.0001  ;;  %v6933_v53 = vand.u32 2147483648, %v4189_v28 }
 0x12b   : > { %v2275_v41 = vmax.f32 %v2083_v46, 1.0  ;;  %v1792_v42 = vmin.f32 %v1696_v3, 10000.0  ;;  %v849_v34 = vsel %vm848_vm0, %v4834_v23, %v845_v27  ;;  %v6934_v17 = vand.u32 2147483648, %v4192_v29  ;;  %v420_v23 = vpop.xlane.xlu1 %419  ;;  %v4898_v29 = vld [vmem:[%s4134_s25 + $0x1b0] sm:$0xff] }
 0x12c   : > { %v2948_v24 = vor.u32 %v6933_v53, %v2564_v0  ;;  %v2370_v8 = vsel %vm4864_vm14, 0.0, %v2274_v63  ;;  %v1793_v62 = vmin.f32 %v1697_v59, 10000.0  ;;  %v854_v20 = vsel %vm4856_vm13, %v853_v16, %v849_v34  ;;  %v417_v34 = vpop.xlane.xlu0 %416 }
 0x12d   : > { %v2949_v48 = vor.u32 %v6934_v17, %v2565_v35  ;;  %v2371_v28 = vsel %vm4873_vm15, 0.0, %v2275_v41  ;;  %v2466_v39 = vmin.f32 %v2370_v8, 64.0  ;;  %v1888_v5 = vmul.f32 1.3333334, %v1792_v42 }
 0x12e   : > { %3140 = vst [vmem:[%s4653_s19 + $0x80] sm:$0xff] %v2948_v24  ;;  %v4895_v7 = vmul.f32 %v3758_v15, %v854_v20  ;;  %v2467_v13 = vmin.f32 %v2371_v28, 64.0  ;;  %v1889_v21 = vmul.f32 1.3333334, %v1793_v62  ;;  %v1419_v58 = vmul.f32 %v3760_v4, %v854_v20 }
 0x12f   : > { %3141 = vst [vmem:[%s4653_s19 + $0x88] sm:$0xff] %v2949_v48  ;;  %v3295_v51 = vmul.f32 %v4753_v50, %v4723_v14  ;;  %v2562_v12 = vmul.f32 %v2466_v39, %v4739_v9  ;;  %v2080_v49 = vand.u32 2139095040, %v1888_v5  ;;  %v542_v52 = vmul.f32 0.0078125, %v420_v23 }
 0x130   : > { %v1514_v61 = vand.u32 2147483647, %v4895_v7  ;;  %v2563_v2 = vmul.f32 %v2467_v13, %v4739_v9  ;;  %v2081_v27 = vand.u32 2139095040, %v1889_v21  ;;  %v1515_v0 = vand.u32 2147483647, %v1419_v58  ;;  %v4929_v13 = vld [vmem:[%s4134_s25 + $0x1a0] sm:$0xff] }
 0x131   : > { %v6935_v46 = vand.u32 2147483648, %v4195_v32  ;;  %v2272_v35 = vmax.f32 %v2080_v49, 1.0  ;;  %v3232_v63 = vadd.s32 88, %v4470_v38  ;;  %v6936_v14 = vand.u32 2147483648, %v4198_v33 }
 0x132   : > { %v1706_v59 = vmax.f32 %v1514_v61, 0.0001  ;;  %vm1600_vm1 = vcmp.lt.f32.partialorder %v1504_v22, 0.5  ;;  %v2273_v53 = vmax.f32 %v2081_v27, 1.0  ;;  %v1707_v24 = vmax.f32 %v1515_v0, 0.0001  ;;  %v432_v27 = vpop.xlane.xlu2 %431 }
 0x133   : > { %v2946_v3 = vor.u32 %v6935_v46, %v2562_v12  ;;  %v2947_v16 = vor.u32 %v6936_v14, %v2563_v2  ;;  %vm1601_vm2 = vcmp.lt.f32.partialorder %v1505_v25, 0.5  ;;  %v2368_v9 = vsel %vm1600_vm1, 0.0, %v2272_v35  ;;  %v429_v35 = vpop.xlane.xlu1 %428 }
 0x134   : > { %v1802_v41 = vmin.f32 %v1706_v59, 10000.0  ;;  %v590_v42 = vmax.f32 %v542_v52, 1e-05  ;;  %v2369_v17 = vsel %vm1601_vm2, 0.0, %v2273_v53  ;;  %v2464_v32 = vmin.f32 %v2368_v9, 64.0  ;;  %v4938_v52 = vld [vmem:[%s4134_s25 + $0x1a8] sm:$0xff] }
 0x135   : > { %3138 = vst [vmem:[%s4653_s19 + $0x70] sm:$0xff] %v2946_v3  ;;  %v1803_v48 = vmin.f32 %v1707_v24, 10000.0  ;;  %v3310_v8 = vadd.f32 %v4819_v26, %v3295_v51  ;;  %v2465_v62 = vmin.f32 %v2369_v17, 64.0  ;;  %v3230_v22 = vadd.s32 72, %v4470_v38  ;;  %v4925_v26 = vld [vmem:[%s4134_s25 + $0x1b8] sm:$0xff] }
 0x136   : > { %3139 = vst [vmem:[%s4653_s19 + $0x78] sm:$0xff] %v2947_v16  ;;  %v1898_v33 = vmul.f32 1.3333334, %v1802_v41  ;;  %v4916_v20 = vmin.f32 %v590_v42, 10000.0  ;;  %v2560_v25 = vmul.f32 %v2464_v32, %v4780_v11  ;;  %vm3250_vm3 = vcmp.eq.s32.totalorder %v3232_v63, %v4481_v60 }
 0x137   : > { %v1899_v28 = vmul.f32 1.3333334, %v1803_v48  ;;  %v541_v39 = vmul.f32 0.0078125, %v417_v34  ;;  %v2561_v5 = vmul.f32 %v2465_v62, %v4780_v11  ;;  %v3231_v7 = vadd.s32 80, %v4470_v38 }
 0x138   : > { %v2090_v15 = vand.u32 2139095040, %v1898_v33  ;;  %3672 = vrcp.f32 %v4916_v20  ;;  %v6937_v4 = vand.u32 2147483648, %v4203_v36  ;;  %v6938_v11 = vand.u32 2147483648, %v4206_v37 }
 0x139   : > { %v2091_v51 = vand.u32 2139095040, %v1899_v28  ;;  %vm3248_vm4 = vcmp.eq.s32.totalorder %v3230_v22, %v4481_v60  ;;  %v589_v2 = vmax.f32 %v541_v39, 1e-05  ;;  %v4945_v3 = vsel %vm3250_vm3, 1.0, %v6900_v19 }
 0x13a   : > { %v2944_v58 = vor.u32 %v6937_v4, %v2560_v25  ;;  %v2945_v12 = vor.u32 %v6938_v11, %v2561_v5  ;;  %v2282_v49 = vmax.f32 %v2090_v15, 1.0  ;;  %6939 = vst [vmem:[#allocation53_spill] sm:$0xff] %v4945_v3  ;;  %vm1610_vm5 = vcmp.lt.f32.partialorder %v1514_v61, 0.5  ;;  %v6942_v5 = vld [vmem:[#allocation11_spill] sm:$0xff] }
 0x13b   : > { %v2283_v36 = vmax.f32 %v2091_v51, 1.0  ;;  %vm1611_vm6 = vcmp.lt.f32.partialorder %v1515_v0, 0.5  ;;  %vm3249_vm7 = vcmp.eq.s32.totalorder %v3231_v7, %v4481_v60  ;;  %v4949_v59 = vmin.f32 %v589_v2, 10000.0 }
 0x13c   : > { %3136 = vst [vmem:[%s4653_s19 + $0x60] sm:$0xff] %v2944_v58  ;;  %v2378_v37 = vsel %vm1610_vm5, 0.0, %v2282_v49  ;;  %v4954_v53 = vsel %vm3248_vm4, 1.0, %v6900_v19  ;;  %v546_v63 = vmul.f32 0.0078125, %v432_v27  ;;  %v3298_v61 = vmul.f32 %v4945_v3, %v4798_v1 }
 0x13d   : > { %3137 = vst [vmem:[%s4653_s19 + $0x68] sm:$0xff] %v2945_v12  ;;  %v2379_v14 = vsel %vm1611_vm6, 0.0, %v2283_v36  ;;  %v2474_v16 = vmin.f32 %v2378_v37, 64.0  ;;  %3674 = vrcp.f32 %v4949_v59  ;;  %v545_v0 = vmul.f32 0.0078125, %v429_v35  ;;  %v426_v37 = vpop.xlane.xlu0 %425 }
 0x13e   : > { %v3673_v24 = vpop.eup %3672  ;;  %v2475_v9 = vmin.f32 %v2379_v14, 64.0  ;;  %v4961_v42 = vsel %vm3249_vm7, 1.0, %v6900_v19  ;;  %vm831_vm8 = vweird.f32 %v4916_v20  ;;  %v835_v32 = vand.u32 2147483647, %v4916_v20 }
 0x13f   : > { %v2570_v41 = vmul.f32 %v2474_v16, %v4798_v1  ;;  %6940 = vst [vmem:[#allocation54_spill] sm:$0xff] %v4961_v42  ;;  %v827_v34 = vmul.f32 %v3673_v24, %v4916_v20  ;;  %v837_v48 = vand.u32 2147483648, %v4916_v20  ;;  %v3296_v62 = vmul.f32 %v4954_v53, %v4949_v59 }
 0x140   : > { %v2571_v17 = vmul.f32 %v2475_v9, %v4798_v1  ;;  %v6941_v33 = vand.u32 2147483648, %v4213_v43  ;;  %v3235_v28 = vadd.s32 112, %v4470_v38  ;;  %v594_v39 = vmax.f32 %v546_v63, 1e-05 }
 0x141   : > { %v828_v25 = vsub.f32 1.0, %v827_v34  ;;  %v6943_v15 = vand.u32 2147483648, %v6942_v5  ;;  %v820_v1 = vand.u32 2147483647, %v4949_v59  ;;  %v3311_v4 = vadd.f32 %v3310_v8, %v3296_v62  ;;  %v3764_v62 = vld [vmem:[%s4134_s25 + $0xa0] sm:$0xff] }
 0x142   : > { %v2954_v22 = vor.u32 %v6941_v33, %v2570_v41  ;;  %v593_v58 = vmax.f32 %v545_v0, 1e-05  ;;  %vm832_vm9 = vweird.f32 %v3673_v24  ;;  %v3297_v11 = vmul.f32 %v4961_v42, %v4916_v20 }
 0x143   : > { %v2955_v7 = vor.u32 %v6943_v15, %v2571_v17  ;;  %v829_v51 = vmul.f32 %v3673_v24, %v828_v25  ;;  %v4979_v12 = vmin.f32 %v594_v39, 10000.0  ;;  %v3675_v43 = vpop.eup %3674  ;;  %vm4982_vm10 = vcmp.eq.f32.partialorder %v835_v32, 8.507059e+37  ;;  %vm833_vm12 = vmor %vm831_vm8, %vm832_vm9 }
 0x144   : > { %3146 = vst [vmem:[%s4653_s19 + $0xb0] sm:$0xff] %v2954_v22  ;;  %v838_v2 = vor.u32 1.1754944e-38, %v837_v48  ;;  %v4987_v27 = vadd.s32 104, %v4470_v38  ;;  %v4989_v8 = vmin.f32 %v593_v58, 10000.0  ;;  %v812_v35 = vmul.f32 %v3675_v43, %v4949_v59  ;;  %v3765_v22 = vld [vmem:[%s4134_s25 + $0xa8] sm:$0xff] }
 0x145   : > { %3147 = vst [vmem:[%s4653_s19 + $0xb8] sm:$0xff] %v2955_v7  ;;  %v830_v36 = vadd.f32 %v3673_v24, %v829_v51  ;;  %vm3253_vm11 = vcmp.eq.s32.totalorder %v3235_v28, %v4481_v60  ;;  %3676 = vrcp.f32 %v4979_v12  ;;  %vm816_vm13 = vweird.f32 %v4949_v59 }
 0x146   : > { %vm4997_vm14 = vcmp.eq.f32.partialorder %v820_v1, 8.507059e+37  ;;  %v822_v16 = vand.u32 2147483648, %v4949_v59  ;;  %v3312_v63 = vadd.f32 %v3311_v4, %v3297_v11  ;;  %v813_v0 = vsub.f32 1.0, %v812_v35 }
 0x147   : > { %v834_v9 = vsel %vm833_vm12, %v3673_v24, %v830_v36  ;;  %3678 = vrcp.f32 %v4989_v8  ;;  %v3233_v41 = vadd.s32 96, %v4470_v38  ;;  %v895_v17 = vand.u32 2147483647, %v4979_v12 }
 0x148   : > { %v839_v34 = vsel %vm4982_vm10, %v838_v2, %v834_v9  ;;  %v897_v32 = vand.u32 2147483648, %v4979_v12  ;;  %v544_v48 = vmul.f32 0.0078125, %v426_v37  ;;  %v814_v39 = vmul.f32 %v3675_v43, %v813_v0 }
 0x149   : > { %v1416_v33 = vmul.f32 %v3764_v62, %v839_v34  ;;  %v1417_v25 = vmul.f32 %v3765_v22, %v839_v34  ;;  %v882_v24 = vand.u32 2147483648, %v4989_v8  ;;  %vm817_vm15 = vweird.f32 %v3675_v43  ;;  %v3766_v62 = vld [vmem:[%s4134_s25 + $0x90] sm:$0xff]  ;;  %v3767_v22 = vld [vmem:[%s4134_s25 + $0x98] sm:$0xff] }
 0x14a   : > { %v823_v5 = vor.u32 1.1754944e-38, %v822_v16  ;;  %v5014_v15 = vsel %vm3253_vm11, 1.0, %v6900_v19  ;;  %v5016_v7 = vadd.f32 %v3312_v63, %v3298_v61  ;;  %v815_v51 = vadd.f32 %v3675_v43, %v814_v39  ;;  %vm818_vm1 = vmor %vm816_vm13, %vm817_vm15 }
 0x14b   : > { %v3677_v1 = vpop.eup %3676  ;;  %v1512_v4 = vand.u32 2147483647, %v1416_v33  ;;  %v1513_v58 = vand.u32 2147483647, %v1417_v25  ;;  %vm891_vm0 = vweird.f32 %v4979_v12  ;;  %v898_v49 = vor.u32 1.1754944e-38, %v897_v32 }
 0x14c   : > { %v887_v11 = vmul.f32 %v3677_v1, %v4979_v12  ;;  %v880_v2 = vand.u32 2147483647, %v4989_v8  ;;  %v592_v36 = vmax.f32 %v544_v48, 1e-05  ;;  %vm5026_vm2 = vcmp.eq.f32.partialorder %v895_v17, 8.507059e+37 }
 0x14d   : > { %v5021_v35 = vpop.eup %3678  ;;  %v1704_v28 = vmax.f32 %v1512_v4, 0.0001  ;;  %v1705_v37 = vmax.f32 %v1513_v58, 0.0001  ;;  %v5030_v16 = vor.u32 1.1754944e-38, %v882_v24  ;;  %vm3251_vm3 = vcmp.eq.s32.totalorder %v3233_v41, %v4481_v60 }
 0x14e   : > { %v819_v63 = vsel %vm818_vm1, %v3675_v43, %v815_v51  ;;  %v888_v9 = vsub.f32 1.0, %v887_v11  ;;  %vm892_vm4 = vweird.f32 %v3677_v1  ;;  %v872_v0 = vmul.f32 %v5021_v35, %v4989_v8 }
 0x14f   : > { %v1800_v34 = vmin.f32 %v1704_v28, 10000.0  ;;  %v1801_v32 = vmin.f32 %v1705_v37, 10000.0  ;;  %v824_v48 = vsel %vm4997_vm14, %v823_v5, %v819_v63  ;;  %vm876_vm5 = vweird.f32 %v4989_v8  ;;  %vm893_vm8 = vmor %vm891_vm0, %vm892_vm4 }
 0x150   : > { %v5038_v17 = vmin.f32 %v592_v36, 10000.0  ;;  %v1414_v33 = vmul.f32 %v3766_v62, %v824_v48  ;;  %v1415_v25 = vmul.f32 %v3767_v22, %v824_v48  ;;  %v889_v39 = vmul.f32 %v3677_v1, %v888_v9 }
 0x151   : > { %v873_v43 = vsub.f32 1.0, %v872_v0  ;;  %v1896_v24 = vmul.f32 1.3333334, %v1800_v34  ;;  %v1897_v51 = vmul.f32 1.3333334, %v1801_v32  ;;  %v5045_v11 = vsel %vm3251_vm3, 1.0, %v6900_v19 }
 0x152   : > { %3680 = vrcp.f32 %v5038_v17  ;;  %v1510_v14 = vand.u32 2147483647, %v1414_v33  ;;  %v1511_v5 = vand.u32 2147483647, %v1415_v25  ;;  %v890_v28 = vadd.f32 %v3677_v1, %v889_v39 }
 0x153   : > { %v874_v36 = vmul.f32 %v5021_v35, %v873_v43  ;;  %vm5049_vm6 = vcmp.lt.f32.partialorder %v1512_v4, 0.5  ;;  %vm5053_vm7 = vcmp.lt.f32.partialorder %v1513_v58, 0.5  ;;  %v2088_v9 = vand.u32 2139095040, %v1896_v24 }
 0x154   : > { %v2089_v0 = vand.u32 2139095040, %v1897_v51  ;;  %v1702_v41 = vmax.f32 %v1510_v14, 0.0001  ;;  %v1703_v34 = vmax.f32 %v1511_v5, 0.0001  ;;  %vm877_vm9 = vweird.f32 %v5021_v35 }
 0x155   : > { %vm5061_vm10 = vcmp.eq.f32.partialorder %v880_v2, 8.507059e+37  ;;  %v865_v58 = vand.u32 2147483647, %v5038_v17  ;;  %v2280_v32 = vmax.f32 %v2088_v9, 1.0  ;;  %v894_v62 = vsel %vm893_vm8, %v3677_v1, %v890_v28  ;;  %v3768_v9 = vld [vmem:[%s4134_s25 + $0xe0] sm:$0xff]  ;;  %v3769_v1 = vld [vmem:[%s4134_s25 + $0xe8] sm:$0xff]  ;;  %vm5082_vm11 = vmor %vm876_vm5, %vm877_vm9 }
 0x156   : > { %v2281_v48 = vmax.f32 %v2089_v0, 1.0  ;;  %v875_v33 = vadd.f32 %v5021_v35, %v874_v36  ;;  %v1798_v22 = vmin.f32 %v1702_v41, 10000.0  ;;  %v1799_v25 = vmin.f32 %v1703_v34, 10000.0 }
 0x157   : > { %v899_v39 = vsel %vm5026_vm2, %v898_v49, %v894_v62  ;;  %v867_v43 = vand.u32 2147483648, %v5038_v17  ;;  %v2376_v2 = vsel %vm5049_vm6, 0.0, %v2280_v32  ;;  %vm861_vm12 = vweird.f32 %v5038_v17 }
 0x158   : > { %v5070_v24 = vpop.eup %3680  ;;  %v2377_v51 = vsel %vm5053_vm7, 0.0, %v2281_v48  ;;  %v1424_v0 = vmul.f32 %v3768_v9, %v899_v39  ;;  %v1425_v28 = vmul.f32 %v3769_v1, %v899_v39  ;;  %v2472_v36 = vmin.f32 %v2376_v2, 64.0 }
 0x159   : > { %v2473_v41 = vmin.f32 %v2377_v51, 64.0  ;;  %v1894_v34 = vmul.f32 1.3333334, %v1798_v22  ;;  %v1895_v46 = vmul.f32 1.3333334, %v1799_v25  ;;  %v879_v63 = vsel %vm5082_vm11, %v5021_v35, %v875_v33  ;;  %v6962_v51 = vld [vmem:[#allocation12_spill] sm:$0xff] }
 0x15a   : > { %v1520_v61 = vand.u32 2147483647, %v1424_v0  ;;  %v1521_v37 = vand.u32 2147483647, %v1425_v28  ;;  %v857_v32 = vmul.f32 %v5070_v24, %v5038_v17  ;;  %v2568_v48 = vmul.f32 %v2472_v36, %v4916_v20  ;;  %v6964_v0 = vld [vmem:[#allocation13_spill] sm:$0xff] }
 0x15b   : > { %v2569_v62 = vmul.f32 %v2473_v41, %v4916_v20  ;;  %v2086_v22 = vand.u32 2139095040, %v1894_v34  ;;  %v2087_v25 = vand.u32 2139095040, %v1895_v46  ;;  %vm5094_vm13 = vcmp.lt.f32.partialorder %v1510_v14, 0.5 }
 0x15c   : > { %vm5098_vm14 = vcmp.lt.f32.partialorder %v1511_v5, 0.5  ;;  %v1712_v35 = vmax.f32 %v1520_v61, 0.0001  ;;  %v1713_v33 = vmax.f32 %v1521_v37, 0.0001  ;;  %v6963_v9 = vand.u32 2147483648, %v6962_v51 }
 0x15d   : > { %v6965_v46 = vand.u32 2147483648, %v6964_v0  ;;  %v2278_v28 = vmax.f32 %v2086_v22, 1.0  ;;  %v2279_v14 = vmax.f32 %v2087_v25, 1.0  ;;  %vm3252_vm15 = vcmp.eq.s32.totalorder %v4987_v27, %v4481_v60  ;;  %v3770_v22 = vld [vmem:[%s4134_s25 + $0xd0] sm:$0xff] }
 0x15e   : > { %v2952_v20 = vor.u32 %v6963_v9, %v2568_v48  ;;  %v1808_v36 = vmin.f32 %v1712_v35, 10000.0  ;;  %v1809_v41 = vmin.f32 %v1713_v33, 10000.0  ;;  %v884_v5 = vsel %vm5061_vm10, %v5030_v16, %v879_v63  ;;  %v3771_v35 = vld [vmem:[%s4134_s25 + $0xd8] sm:$0xff] }
 0x15f   : > { %v2953_v1 = vor.u32 %v6965_v46, %v2569_v62  ;;  %v858_v34 = vsub.f32 1.0, %v857_v32  ;;  %vm5111_vm0 = vcmp.eq.f32.partialorder %v865_v58, 8.507059e+37  ;;  %v2374_v48 = vsel %vm5094_vm13, 0.0, %v2278_v28  ;;  %v3773_v46 = vld [vmem:[%s4134_s25 + $0xc8] sm:$0xff] }
 0x160   : > { %3144 = vst [vmem:[%s4653_s19 + $0xa0] sm:$0xff] %v2952_v20  ;;  %v2375_v62 = vsel %vm5098_vm14, 0.0, %v2279_v14  ;;  %v1422_v25 = vmul.f32 %v3770_v22, %v884_v5  ;;  %v1423_v33 = vmul.f32 %v3771_v35, %v884_v5  ;;  %v2470_v51 = vmin.f32 %v2374_v48, 64.0 }
 0x161   : > { %3145 = vst [vmem:[%s4653_s19 + $0xa8] sm:$0xff] %v2953_v1  ;;  %v2471_v4 = vmin.f32 %v2375_v62, 64.0  ;;  %v1904_v16 = vmul.f32 1.3333334, %v1808_v36  ;;  %v859_v58 = vmul.f32 %v5070_v24, %v858_v34  ;;  %v1905_v63 = vmul.f32 1.3333334, %v1809_v41  ;;  %v441_v36 = vpop.xlane.xlu2 %440 }
 0x162   : > { %v1518_v32 = vand.u32 2147483647, %v1422_v25  ;;  %v1519_v9 = vand.u32 2147483647, %v1423_v33  ;;  %vm862_vm1 = vweird.f32 %v5070_v24  ;;  %v2566_v39 = vmul.f32 %v2470_v51, %v4949_v59  ;;  %v6972_v41 = vld [vmem:[#allocation14_spill] sm:$0xff] }
 0x163   : > { %v2567_v2 = vmul.f32 %v2471_v4, %v4949_v59  ;;  %v2096_v20 = vand.u32 2139095040, %v1904_v16  ;;  %v860_v0 = vadd.f32 %v5070_v24, %v859_v58  ;;  %vm5128_vm2 = vcmp.lt.f32.partialorder %v1520_v61, 0.5  ;;  %v6974_v59 = vld [vmem:[#allocation15_spill] sm:$0xff]  ;;  %vm863_vm4 = vmor %vm861_vm12, %vm862_vm1 }
 0x164   : > { %vm5132_vm3 = vcmp.lt.f32.partialorder %v1521_v37, 0.5  ;;  %v2097_v28 = vand.u32 2139095040, %v1905_v63  ;;  %v1710_v14 = vmax.f32 %v1518_v32, 0.0001  ;;  %v6973_v5 = vand.u32 2147483648, %v6972_v41 }
 0x165   : > { %v6975_v48 = vand.u32 2147483648, %v6974_v59  ;;  %v2288_v22 = vmax.f32 %v2096_v20, 1.0  ;;  %v1711_v25 = vmax.f32 %v1519_v9, 0.0001  ;;  %v864_v35 = vsel %vm863_vm4, %v5070_v24, %v860_v0  ;;  %v3772_v0 = vld [vmem:[%s4134_s25 + $0xc0] sm:$0xff] }
 0x166   : > { %v2950_v34 = vor.u32 %v6973_v5, %v2566_v39  ;;  %v2289_v61 = vmax.f32 %v2097_v28, 1.0  ;;  %v1806_v37 = vmin.f32 %v1710_v14, 10000.0  ;;  %v868_v33 = vor.u32 1.1754944e-38, %v867_v43 }
 0x167   : > { %v2951_v62 = vor.u32 %v6975_v48, %v2567_v2  ;;  %v2384_v51 = vsel %vm5128_vm2, 0.0, %v2288_v22  ;;  %v1807_v4 = vmin.f32 %v1711_v25, 10000.0  ;;  %v3299_v16 = vmul.f32 %v5045_v11, %v5038_v17 }
 0x168   : > { %3142 = vst [vmem:[%s4653_s19 + $0x90] sm:$0xff] %v2950_v34  ;;  %v549_v58 = vmul.f32 0.0078125, %v441_v36  ;;  %v2385_v63 = vsel %vm5132_vm3, 0.0, %v2289_v61  ;;  %v2480_v39 = vmin.f32 %v2384_v51, 64.0  ;;  %v1902_v2 = vmul.f32 1.3333334, %v1806_v37 }
 0x169   : > { %3143 = vst [vmem:[%s4653_s19 + $0x98] sm:$0xff] %v2951_v62  ;;  %v869_v24 = vsel %vm5111_vm0, %v868_v33, %v864_v35  ;;  %v2481_v20 = vmin.f32 %v2385_v63, 64.0  ;;  %v1903_v43 = vmul.f32 1.3333334, %v1807_v4  ;;  %v5162_v1 = vsel %vm3252_vm15, 1.0, %v6900_v19  ;;  %v6976_v62 = vld [vmem:[#allocation16_spill] sm:$0xff] }
 0x16a   : > { %v1420_v28 = vmul.f32 %v3772_v0, %v869_v24  ;;  %v1421_v14 = vmul.f32 %v3773_v46, %v869_v24  ;;  %v2576_v41 = vmul.f32 %v2480_v39, %v4979_v12  ;;  %v2094_v36 = vand.u32 2139095040, %v1902_v2  ;;  %v6980_v35 = vld [vmem:[#allocation17_spill] sm:$0xff]  ;;  %v438_v24 = vpop.xlane.xlu1 %437 }
 0x16b   : > { %v597_v5 = vmax.f32 %v549_v58, 1e-05  ;;  %v2577_v49 = vmul.f32 %v2481_v20, %v4979_v12  ;;  %v2095_v34 = vand.u32 2139095040, %v1903_v43  ;;  %v6977_v22 = vand.u32 2147483648, %v6976_v62  ;;  %v5185_v20 = vld [vmem:[%s4134_s25 + $0x1f0] sm:$0xff] }
 0x16c   : > { %v1516_v59 = vand.u32 2147483647, %v1420_v28  ;;  %v1517_v48 = vand.u32 2147483647, %v1421_v14  ;;  %vm5167_vm5 = vcmp.lt.f32.partialorder %v1518_v32, 0.5  ;;  %v2286_v27 = vmax.f32 %v2094_v36, 1.0 }
 0x16d   : > { %v2960_v25 = vor.u32 %v6977_v22, %v2576_v41  ;;  %v5171_v37 = vmin.f32 %v597_v5, 10000.0  ;;  %v6981_v33 = vand.u32 2147483648, %v6980_v35  ;;  %vm5175_vm6 = vcmp.lt.f32.partialorder %v1519_v9, 0.5 }
 0x16e   : > { %v2287_v58 = vmax.f32 %v2095_v34, 1.0  ;;  %v3314_v63 = vadd.f32 %v5016_v7, %v3299_v16  ;;  %v2382_v32 = vsel %vm5167_vm5, 0.0, %v2286_v27  ;;  %v1708_v39 = vmax.f32 %v1516_v59, 0.0001  ;;  %v5194_v16 = vld [vmem:[%s4134_s25 + $0x1f8] sm:$0xff] }
 0x16f   : > { %v2961_v51 = vor.u32 %v6981_v33, %v2577_v49  ;;  %3152 = vst [vmem:[%s4653_s19 + $0xe0] sm:$0xff] %v2960_v25  ;;  %v1709_v2 = vmax.f32 %v1517_v48, 0.0001  ;;  %3682 = vrcp.f32 %v5171_v37  ;;  %v2478_v0 = vmin.f32 %v2382_v32, 64.0  ;;  %v6986_v27 = vld [vmem:[#allocation18_spill] sm:$0xff]  ;;  %v6988_v32 = vld [vmem:[#allocation19_spill] sm:$0xff] }
 0x170   : > { %v2383_v9 = vsel %vm5175_vm6, 0.0, %v2287_v58  ;;  %v3300_v7 = vmul.f32 %v5162_v1, %v4989_v8  ;;  %v1804_v14 = vmin.f32 %v1708_v39, 10000.0  ;;  %v3301_v36 = vmul.f32 %v5014_v15, %v4979_v12  ;;  %v435_v58 = vpop.xlane.xlu0 %434 }
 0x171   : > { %3153 = vst [vmem:[%s4653_s19 + $0xe8] sm:$0xff] %v2961_v51  ;;  %v2479_v46 = vmin.f32 %v2383_v9, 64.0  ;;  %v1805_v41 = vmin.f32 %v1709_v2, 10000.0  ;;  %v2574_v5 = vmul.f32 %v2478_v0, %v4989_v8  ;;  %v548_v34 = vmul.f32 0.0078125, %v438_v24 }
 0x172   : > { %v3315_v49 = vadd.f32 %v3314_v63, %v3300_v7  ;;  %vm5201_vm7 = vcmp.lt.f32.partialorder %v1516_v59, 0.5  ;;  %v1900_v25 = vmul.f32 1.3333334, %v1804_v14  ;;  %v6987_v35 = vand.u32 2147483648, %v6986_v27 }
 0x173   : > { %v2575_v62 = vmul.f32 %v2479_v46, %v4989_v8  ;;  %v1901_v61 = vmul.f32 1.3333334, %v1805_v41  ;;  %v940_v51 = vand.u32 2147483647, %v5171_v37  ;;  %v942_v12 = vand.u32 2147483648, %v5171_v37 }
 0x174   : > { %v2958_v33 = vor.u32 %v6987_v35, %v2574_v5  ;;  %v596_v4 = vmax.f32 %v548_v34, 1e-05  ;;  %v6989_v39 = vand.u32 2147483648, %v6988_v32  ;;  %vm5211_vm8 = vcmp.lt.f32.partialorder %v1517_v48, 0.5  ;;  %v489_v35 = vpop.xlane.xlu1 %488 }
 0x175   : > { %v3683_v63 = vpop.eup %3682  ;;  %v2092_v2 = vand.u32 2139095040, %v1900_v25  ;;  %v2093_v24 = vand.u32 2139095040, %v1901_v61  ;;  %vm936_vm9 = vweird.f32 %v5171_v37  ;;  %v3236_v7 = vadd.s32 120, %v4470_v38  ;;  %v444_v25 = vpop.xlane.xlu2 %443 }
 0x176   : > { %v2959_v8 = vor.u32 %v6989_v39, %v2575_v62  ;;  %3150 = vst [vmem:[%s4653_s19 + $0xd0] sm:$0xff] %v2958_v33  ;;  %v932_v9 = vmul.f32 %v3683_v63, %v5171_v37  ;;  %v5218_v0 = vmin.f32 %v596_v4, 10000.0  ;;  %v3330_v48 = vmul.f32 %v4678_v47, %v5171_v37 }
 0x177   : > { %v2284_v46 = vmax.f32 %v2092_v2, 1.0  ;;  %v2285_v14 = vmax.f32 %v2093_v24, 1.0  ;;  %v547_v41 = vmul.f32 0.0078125, %v435_v58  ;;  %vm5224_vm10 = vcmp.eq.f32.partialorder %v940_v51, 8.507059e+37 }
 0x178   : > { %3151 = vst [vmem:[%s4653_s19 + $0xd8] sm:$0xff] %v2959_v8  ;;  %v933_v5 = vsub.f32 1.0, %v932_v9  ;;  %v943_v62 = vor.u32 1.1754944e-38, %v942_v12  ;;  %3684 = vrcp.f32 %v5218_v0  ;;  %vm937_vm11 = vweird.f32 %v3683_v63 }
 0x179   : > { %v2380_v61 = vsel %vm5201_vm7, 0.0, %v2284_v46  ;;  %v2381_v38 = vsel %vm5211_vm8, 0.0, %v2285_v14  ;;  %v3329_v27 = vmul.f32 %v4517_v30, %v5218_v0  ;;  %vm3254_vm12 = vcmp.eq.s32.totalorder %v3236_v7, %v4481_v60  ;;  %vm938_vm13 = vmor %vm936_vm9, %vm937_vm11  ;;  %v6994_v14 = vld [vmem:[#allocation20_spill] sm:$0xff] }
 0x17a   : > { %v2476_v33 = vmin.f32 %v2380_v61, 64.0  ;;  %v2477_v51 = vmin.f32 %v2381_v38, 64.0  ;;  %v934_v4 = vmul.f32 %v3683_v63, %v933_v5  ;;  %v925_v12 = vand.u32 2147483647, %v5218_v0 }
 0x17b   : > { %v5237_v58 = vadd.f32 %v3330_v48, %v3329_v27  ;;  %v595_v32 = vmax.f32 %v547_v41, 1e-05  ;;  %v550_v22 = vmul.f32 0.0078125, %v444_v25  ;;  %v565_v2 = vmul.f32 0.0078125, %v489_v35  ;;  %v6996_v41 = vld [vmem:[#allocation21_spill] sm:$0xff] }
 0x17c   : > { %v2572_v39 = vmul.f32 %v2476_v33, %v5038_v17  ;;  %v2573_v8 = vmul.f32 %v2477_v51, %v5038_v17  ;;  %v935_v59 = vadd.f32 %v3683_v63, %v934_v4  ;;  %v5245_v60 = vsel %vm3254_vm12, 1.0, %v6900_v19  ;;  %v3777_v35 = vld [vmem:[%s4134_s25 + $0x118] sm:$0xff] }
 0x17d   : > { %v3316_v24 = vadd.f32 %v3315_v49, %v3301_v36  ;;  %v5247_v9 = vmin.f32 %v595_v32, 10000.0  ;;  %v598_v7 = vmax.f32 %v550_v22, 1e-05  ;;  %v6995_v48 = vand.u32 2147483648, %v6994_v14  ;;  %v3776_v36 = vld [vmem:[%s4134_s25 + $0x110] sm:$0xff] }
 0x17e   : > { %v3685_v46 = vpop.eup %3684  ;;  %v6997_v5 = vand.u32 2147483648, %v6996_v41  ;;  %v939_v61 = vsel %vm938_vm13, %v3683_v63, %v935_v59  ;;  %v927_v38 = vand.u32 2147483648, %v5218_v0  ;;  %vm921_vm14 = vweird.f32 %v5218_v0 }
 0x17f   : > { %v2956_v17 = vor.u32 %v6995_v48, %v2572_v39  ;;  %v944_v19 = vsel %vm5224_vm10, %v943_v62, %v939_v61  ;;  %v917_v27 = vmul.f32 %v3685_v46, %v5218_v0  ;;  %3686 = vrcp.f32 %v5247_v9 }
 0x180   : > { %v2957_v25 = vor.u32 %v6997_v5, %v2573_v8  ;;  %v1430_v49 = vmul.f32 %v3776_v36, %v944_v19  ;;  %v1431_v33 = vmul.f32 %v3777_v35, %v944_v19  ;;  %vm5262_vm15 = vcmp.eq.f32.partialorder %v925_v12, 8.507059e+37 }
 0x181   : > { %3148 = vst [vmem:[%s4653_s19 + $0xc0] sm:$0xff] %v2956_v17  ;;  %v613_v63 = vmax.f32 %v565_v2, 1e-05  ;;  %v918_v4 = vsub.f32 1.0, %v917_v27  ;;  %v912_v34 = vand.u32 2147483648, %v5247_v9  ;;  %v3302_v62 = vmul.f32 %v5245_v60, %v5247_v9 }
 0x182   : > { %3149 = vst [vmem:[%s4653_s19 + $0xc8] sm:$0xff] %v2957_v25  ;;  %v5270_v32 = vmin.f32 %v598_v7, 10000.0  ;;  %v1526_v22 = vand.u32 2147483647, %v1430_v49  ;;  %v1527_v39 = vand.u32 2147483647, %v1431_v33  ;;  %vm922_vm0 = vweird.f32 %v3685_v46 }
 0x183   : > { %v928_v8 = vor.u32 1.1754944e-38, %v927_v38  ;;  %v919_v59 = vmul.f32 %v3685_v46, %v918_v4  ;;  %v910_v12 = vand.u32 2147483647, %v5247_v9  ;;  %v3317_v14 = vadd.f32 %v3316_v24, %v3302_v62  ;;  %vm923_vm4 = vmor %vm921_vm14, %vm922_vm0 }
 0x184   : > { %3688 = vrcp.f32 %v5270_v32  ;;  %v1718_v2 = vmax.f32 %v1526_v22, 0.0001  ;;  %v1719_v48 = vmax.f32 %v1527_v39, 0.0001  ;;  %vm906_vm1 = vweird.f32 %v5247_v9 }
 0x185   : > { %v5275_v17 = vmin.f32 %v613_v63, 10000.0  ;;  %v3687_v41 = vpop.eup %3686  ;;  %vm5277_vm2 = vcmp.lt.f32.partialorder %v1526_v22, 0.5  ;;  %v920_v5 = vadd.f32 %v3685_v46, %v919_v59  ;;  %v913_v25 = vor.u32 1.1754944e-38, %v912_v34  ;;  %v3778_v59 = vld [vmem:[%s4134_s25 + $0x100] sm:$0xff] }
 0x186   : > { %v3318_v61 = vrot.slane %v3317_v14, 4  ;;  %vm5281_vm3 = vcmp.lt.f32.partialorder %v1527_v39, 0.5  ;;  %v1814_v24 = vmin.f32 %v1718_v2, 10000.0  ;;  %v1815_v19 = vmin.f32 %v1719_v48, 10000.0  ;;  %v3779_v48 = vld [vmem:[%s4134_s25 + $0x108] sm:$0xff] }
 0x187   : > { %v902_v27 = vmul.f32 %v3687_v41, %v5247_v9  ;;  %v924_v36 = vsel %vm923_vm4, %v3685_v46, %v920_v5  ;;  %v7004_v49 = vlaneseq  ;;  %vm907_vm6 = vweird.f32 %v3687_v41 }
 0x188   : > { %vm5294_vm7 = vcmp.eq.f32.partialorder %v910_v12, 8.507059e+37  ;;  %v3319_v63 = vadd.f32 %v3318_v61, %v3317_v14  ;;  %v955_v4 = vand.u32 2147483647, %v5270_v32  ;;  %v1910_v34 = vmul.f32 1.3333334, %v1814_v24  ;;  %vm908_vm10 = vmor %vm906_vm1, %vm907_vm6 }
 0x189   : > { %vm5290_vm5 = vcmp.lt.s32.totalorder %v7004_v49, 128  ;;  %v1911_v62 = vmul.f32 1.3333334, %v1815_v19  ;;  %v929_v22 = vsel %vm5262_vm15, %v928_v8, %v924_v36  ;;  %v903_v46 = vsub.f32 1.0, %v902_v27 }
 0x18a   : > { %v5301_v39 = vpop.eup %3688  ;;  %v5304_v2 = vmul.f32 %v3778_v59, %v929_v22  ;;  %v5307_v12 = vmul.f32 %v3779_v48, %v929_v22  ;;  %v3320_v5 = vrot.slane %v3319_v63, 2  ;;  %v957_v14 = vand.u32 2147483648, %v5270_v32 }
 0x18b   : > { %v2102_v61 = vand.u32 2139095040, %v1910_v34  ;;  %v2103_v49 = vand.u32 2139095040, %v1911_v62  ;;  %v904_v24 = vmul.f32 %v3687_v41, %v903_v46  ;;  %v947_v51 = vmul.f32 %v5301_v39, %v5270_v32 }
 0x18c   : > { %v1524_v8 = vand.u32 2147483647, %v5304_v2  ;;  %v1525_v19 = vand.u32 2147483647, %v5307_v12  ;;  %v3321_v27 = vadd.f32 %v3320_v5, %v3319_v63  ;;  %vm951_vm8 = vweird.f32 %v5270_v32 }
 0x18d   : > { %v2294_v36 = vmax.f32 %v2102_v61, 1.0  ;;  %v2295_v22 = vmax.f32 %v2103_v49, 1.0  ;;  %v905_v59 = vadd.f32 %v3687_v41, %v904_v24  ;;  %v948_v48 = vsub.f32 1.0, %v947_v51 }
 0x18e   : > { %vm5316_vm9 = vcmp.eq.f32.partialorder %v955_v4, 8.507059e+37  ;;  %v1716_v34 = vmax.f32 %v1524_v8, 0.0001  ;;  %v1717_v62 = vmax.f32 %v1525_v19, 0.0001  ;;  %vm952_vm11 = vweird.f32 %v5301_v39 }
 0x18f   : > { %v958_v46 = vor.u32 1.1754944e-38, %v957_v14  ;;  %v2390_v63 = vsel %vm5277_vm2, 0.0, %v2294_v36  ;;  %v2391_v2 = vsel %vm5281_vm3, 0.0, %v2295_v22  ;;  %v909_v4 = vsel %vm908_vm10, %v3687_v41, %v905_v59  ;;  %v3780_v59 = vld [vmem:[%s4134_s25 + $0xf0] sm:$0xff]  ;;  %vm953_vm12 = vmor %vm951_vm8, %vm952_vm11 }
 0x190   : > { %v3322_v12 = vrot.slane %v3321_v27, 1  ;;  %v2486_v5 = vmin.f32 %v2390_v63, 64.0  ;;  %v2487_v61 = vmin.f32 %v2391_v2, 64.0  ;;  %v1812_v49 = vmin.f32 %v1716_v34, 10000.0  ;;  %v3781_v2 = vld [vmem:[%s4134_s25 + $0xf8] sm:$0xff] }
 0x191   : > { %v1813_v24 = vmin.f32 %v1717_v62, 10000.0  ;;  %v914_v51 = vsel %vm5294_vm7, %v913_v25, %v909_v4  ;;  %v949_v14 = vmul.f32 %v5301_v39, %v948_v48  ;;  %v3331_v7 = vmul.f32 %v4513_v10, %v5270_v32  ;;  %v7013_v4 = vld [vmem:[#allocation23_spill] sm:$0xff] }
 0x192   : > { %v3323_v43 = vadd.f32 %v3322_v12, %v3321_v27  ;;  %v2582_v38 = vmul.f32 %v2486_v5, %v5171_v37  ;;  %v2583_v41 = vmul.f32 %v2487_v61, %v5171_v37  ;;  %v1908_v36 = vmul.f32 1.3333334, %v1812_v49  ;;  %v486_v37 = vpop.xlane.xlu0 %485  ;;  %v7011_v27 = vld [vmem:[#allocation22_spill] sm:$0xff] }
 0x193   : > { %v1909_v22 = vmul.f32 1.3333334, %v1813_v24  ;;  %v1426_v63 = vmul.f32 %v3780_v59, %v914_v51  ;;  %v1427_v34 = vmul.f32 %v3781_v2, %v914_v51  ;;  %v950_v25 = vadd.f32 %v5301_v39, %v949_v14 }
 0x194   : > { %3328 = vst.msk [vmem:[%s5339_s5] sm:$0x1] %vm5290_vm5, %v3323_v43  ;;  %v5346_v33 = vadd.f32 %v5237_v58, %v3331_v7  ;;  %v7012_v48 = vand.u32 2147483648, %v7011_v27  ;;  %v7014_v12 = vand.u32 2147483648, %v7013_v4  ;;  %v2100_v61 = vand.u32 2139095040, %v1908_v36  ;;  %v3782_v36 = vld [vmem:[%s4134_s25 + $0x120] sm:$0xff] }
 0x195   : > { %v2101_v49 = vand.u32 2139095040, %v1909_v22  ;;  %v1522_v43 = vand.u32 2147483647, %v1426_v63  ;;  %v1523_v24 = vand.u32 2147483647, %v1427_v34  ;;  %v954_v58 = vsel %vm953_vm12, %v5301_v39, %v950_v25  ;;  %v3783_v39 = vld [vmem:[%s4134_s25 + $0x128] sm:$0xff] }
 0x196   : > { %v2966_v62 = vor.u32 %v7012_v48, %v2582_v38  ;;  %v2967_v5 = vor.u32 %v7014_v12, %v2583_v41  ;;  %3690 = vrcp.f32 %v5275_v17  ;;  %v2292_v51 = vmax.f32 %v2100_v61, 1.0 }
 0x197   : > { %v2293_v14 = vmax.f32 %v2101_v49, 1.0  ;;  %v959_v7 = vsel %vm5316_vm9, %v958_v46, %v954_v58  ;;  %v564_v38 = vmul.f32 0.0078125, %v486_v37  ;;  %vm1620_vm13 = vcmp.lt.f32.partialorder %v1524_v8, 0.5 }
 0x198   : > { %3158 = vst [vmem:[%s4653_s19 + $0x110] sm:$0xff] %v2966_v62  ;;  %vm1621_vm14 = vcmp.lt.f32.partialorder %v1525_v19, 0.5  ;;  %v1714_v41 = vmax.f32 %v1522_v43, 0.0001  ;;  %v1432_v22 = vmul.f32 %v3782_v36, %v959_v7  ;;  %v2388_v59 = vsel %vm1620_vm13, 0.0, %v2292_v51  ;;  %v7019_v51 = vld [vmem:[#allocation24_spill] sm:$0xff] }
 0x199   : > { %3159 = vst [vmem:[%s4653_s19 + $0x118] sm:$0xff] %v2967_v5  ;;  %v2389_v63 = vsel %vm1621_vm14, 0.0, %v2293_v14  ;;  %v1715_v2 = vmax.f32 %v1523_v24, 0.0001  ;;  %v1433_v34 = vmul.f32 %v3783_v39, %v959_v7  ;;  %v2484_v25 = vmin.f32 %v2388_v59, 64.0 }
 0x19a   : > { %v2485_v27 = vmin.f32 %v2389_v63, 64.0  ;;  %v1810_v48 = vmin.f32 %v1714_v41, 10000.0  ;;  %v1528_v62 = vand.u32 2147483647, %v1432_v22  ;;  %vm5364_vm15 = vcmp.lt.f32.partialorder %v1522_v43, 0.5  ;;  %v7021_v41 = vld [vmem:[#allocation25_spill] sm:$0xff] }
 0x19b   : > { %vm5368_vm0 = vcmp.lt.f32.partialorder %v1523_v24, 0.5  ;;  %v1811_v8 = vmin.f32 %v1715_v2, 10000.0  ;;  %v1529_v19 = vand.u32 2147483647, %v1433_v34  ;;  %vm1176_vm1 = vweird.f32 %v5275_v17 }
 0x19c   : > { %v3691_v46 = vpop.eup %3690  ;;  %v2580_v37 = vmul.f32 %v2484_v25, %v5218_v0  ;;  %v2581_v12 = vmul.f32 %v2485_v27, %v5218_v0  ;;  %v1906_v5 = vmul.f32 1.3333334, %v1810_v48  ;;  %v1180_v61 = vand.u32 2147483647, %v5275_v17  ;;  %v495_v25 = vpop.xlane.xlu2 %494  ;;  %v5434_v48 = vld [vmem:[%s4134_s25 + $0x1e8] sm:$0xff] }
 0x19d   : > { %v1907_v49 = vmul.f32 1.3333334, %v1811_v8  ;;  %v1720_v43 = vmax.f32 %v1528_v62, 0.0001  ;;  %v1172_v24 = vmul.f32 %v3691_v46, %v5275_v17  ;;  %v1182_v58 = vand.u32 2147483648, %v5275_v17 }
 0x19e   : > { %v7020_v14 = vand.u32 2147483648, %v7019_v51  ;;  %v7022_v36 = vand.u32 2147483648, %v7021_v41  ;;  %v2098_v59 = vand.u32 2139095040, %v1906_v5  ;;  %v1721_v63 = vmax.f32 %v1529_v19, 0.0001 }
 0x19f   : > { %v2099_v0 = vand.u32 2139095040, %v1907_v49  ;;  %vm5382_vm2 = vcmp.lt.f32.partialorder %v1528_v62, 0.5  ;;  %v1816_v39 = vmin.f32 %v1720_v43, 10000.0  ;;  %v1173_v34 = vsub.f32 1.0, %v1172_v24  ;;  %v7031_v62 = vld [vmem:[#allocation27_spill] sm:$0xff] }
 0x1a0   : > { %v2964_v7 = vor.u32 %v7020_v14, %v2580_v37  ;;  %v2965_v22 = vor.u32 %v7022_v36, %v2581_v12  ;;  %v2290_v27 = vmax.f32 %v2098_v59, 1.0  ;;  %vm5387_vm3 = vcmp.lt.f32.partialorder %v1529_v19, 0.5 }
 0x1a1   : > { %v1817_v8 = vmin.f32 %v1721_v63, 10000.0  ;;  %vm1177_vm4 = vweird.f32 %v3691_v46  ;;  %v2291_v37 = vmax.f32 %v2099_v0, 1.0  ;;  %v1912_v12 = vmul.f32 1.3333334, %v1816_v39 }
 0x1a2   : > { %3156 = vst [vmem:[%s4653_s19 + $0x100] sm:$0xff] %v2964_v7  ;;  %v1174_v5 = vmul.f32 %v3691_v46, %v1173_v34  ;;  %vm5392_vm6 = vcmp.eq.f32.partialorder %v1180_v61, 8.507059e+37  ;;  %v2386_v49 = vsel %vm5364_vm15, 0.0, %v2290_v27  ;;  %v612_v24 = vmax.f32 %v564_v38, 1e-05  ;;  %vm1178_vm7 = vmor %vm1176_vm1, %vm1177_vm4 }
 0x1a3   : > { %3157 = vst [vmem:[%s4653_s19 + $0x108] sm:$0xff] %v2965_v22  ;;  %v1913_v43 = vmul.f32 1.3333334, %v1817_v8  ;;  %v567_v51 = vmul.f32 0.0078125, %v495_v25  ;;  %v2387_v19 = vsel %vm5368_vm0, 0.0, %v2291_v37  ;;  %v2482_v14 = vmin.f32 %v2386_v49, 64.0 }
 0x1a4   : > { %v2104_v7 = vand.u32 2139095040, %v1912_v12  ;;  %v1175_v41 = vadd.f32 %v3691_v46, %v1174_v5  ;;  %v2483_v36 = vmin.f32 %v2387_v19, 64.0  ;;  %v1183_v61 = vor.u32 1.1754944e-38, %v1182_v58  ;;  %v7029_v25 = vld [vmem:[#allocation26_spill] sm:$0xff]  ;;  %v3784_v37 = vld [vmem:[%s4134_s25 + $0x210] sm:$0xff] }
 0x1a5   : > { %v2105_v22 = vand.u32 2139095040, %v1913_v43  ;;  %v5403_v4 = vmin.f32 %v612_v24, 10000.0  ;;  %v2578_v38 = vmul.f32 %v2482_v14, %v5247_v9  ;;  %v615_v63 = vmax.f32 %v567_v51, 1e-05  ;;  %v5417_v49 = vld [vmem:[%s4134_s25 + $0x1e0] sm:$0xff] }
 0x1a6   : > { %v2296_v59 = vmax.f32 %v2104_v7, 1.0  ;;  %v1179_v28 = vsel %vm1178_vm7, %v3691_v46, %v1175_v41  ;;  %v2579_v0 = vmul.f32 %v2483_v36, %v5247_v9  ;;  %v7030_v27 = vand.u32 2147483648, %v7029_v25  ;;  %v3785_v46 = vld [vmem:[%s4134_s25 + $0x218] sm:$0xff]  ;;  %v447_v41 = vpop.xlane.xlu1 %446  ;;  %v7045_v9 = vld [vmem:[#allocation31_spill] sm:$0xff] }
 0x1a7   : > { %v2297_v39 = vmax.f32 %v2105_v22, 1.0  ;;  %v1184_v34 = vsel %vm5392_vm6, %v1183_v61, %v1179_v28  ;;  %3692 = vrcp.f32 %v5403_v4  ;;  %v7032_v43 = vand.u32 2147483648, %v7031_v62  ;;  %v5438_v28 = vld [vmem:[%s4134_s25 + $0x1d0] sm:$0xff] }
 0x1a8   : > { %v2962_v58 = vor.u32 %v7030_v27, %v2578_v38  ;;  %v2392_v8 = vsel %vm5382_vm2, 0.0, %v2296_v59  ;;  %v1462_v12 = vmul.f32 %v3784_v37, %v1184_v34  ;;  %v1463_v5 = vmul.f32 %v3785_v46, %v1184_v34  ;;  %v5443_v27 = vld [vmem:[%s4134_s25 + $0x1d8] sm:$0xff] }
 0x1a9   : > { %v2963_v24 = vor.u32 %v7032_v43, %v2579_v0  ;;  %v2393_v51 = vsel %vm5387_vm3, 0.0, %v2297_v39  ;;  %v2488_v19 = vmin.f32 %v2392_v8, 64.0  ;;  %v3368_v22 = vmul.f32 %v4678_v47, %v5275_v17  ;;  %v7033_v47 = vld [vmem:[#allocation28_spill] sm:$0xff]  ;;  %v3791_v0 = vld [vmem:[%s4134_s25 + $0x200] sm:$0xff] }
 0x1aa   : > { %3154 = vst [vmem:[%s4653_s19 + $0xf0] sm:$0xff] %v2962_v58  ;;  %v2489_v2 = vmin.f32 %v2393_v51, 64.0  ;;  %v1558_v14 = vand.u32 2147483647, %v1462_v12  ;;  %v1559_v7 = vand.u32 2147483647, %v1463_v5  ;;  %v3367_v61 = vmul.f32 %v4517_v30, %v5403_v4  ;;  %v492_v51 = vpop.xlane.xlu0 %491 }
 0x1ab   : > { %3155 = vst [vmem:[%s4653_s19 + $0xf8] sm:$0xff] %v2963_v24  ;;  %v2584_v36 = vmul.f32 %v2488_v19, %v5270_v32  ;;  %v5431_v38 = vmin.f32 %v615_v63, 10000.0  ;;  %v7034_v63 = vand.u32 2147483648, %v7033_v47  ;;  %v551_v37 = vmul.f32 0.0078125, %v447_v41  ;;  %v5449_v12 = vld [vmem:[%s4134_s25 + $0x260] sm:$0xff]  ;;  %v7035_v5 = vld [vmem:[#allocation29_spill] sm:$0xff] }
 0x1ac   : > { %v2585_v39 = vmul.f32 %v2489_v2, %v5270_v32  ;;  %v1750_v34 = vmax.f32 %v1558_v14, 0.0001  ;;  %v1751_v8 = vmax.f32 %v1559_v7, 0.0001  ;;  %v7036_v62 = vand.u32 2147483648, %v7035_v5 }
 0x1ad   : > { %v3693_v25 = vpop.eup %3692  ;;  %v2968_v58 = vor.u32 %v7034_v63, %v2584_v36  ;;  %v1165_v2 = vand.u32 2147483647, %v5403_v4  ;;  %v5457_v30 = vadd.f32 %v3368_v22, %v3367_v61  ;;  %3694 = vrcp.f32 %v5431_v38  ;;  %v456_v61 = vpop.xlane.xlu2 %455 }
 0x1ae   : > { %v2969_v43 = vor.u32 %v7036_v62, %v2585_v39  ;;  %v1846_v32 = vmin.f32 %v1750_v34, 10000.0  ;;  %v1157_v24 = vmul.f32 %v3693_v25, %v5403_v4  ;;  %v1847_v19 = vmin.f32 %v1751_v8, 10000.0  ;;  %v3792_v39 = vld [vmem:[%s4134_s25 + $0x208] sm:$0xff] }
 0x1af   : > { %3160 = vst [vmem:[%s4653_s19 + $0x120] sm:$0xff] %v2968_v58  ;;  %vm1161_vm8 = vweird.f32 %v5403_v4  ;;  %v1167_v47 = vand.u32 2147483648, %v5403_v4  ;;  %vm5463_vm9 = vcmp.lt.f32.partialorder %v1558_v14, 0.5  ;;  %v599_v63 = vmax.f32 %v551_v37, 1e-05 }
 0x1b0   : > { %3161 = vst [vmem:[%s4653_s19 + $0x128] sm:$0xff] %v2969_v43  ;;  %v1942_v41 = vmul.f32 1.3333334, %v1846_v32  ;;  %v1158_v36 = vsub.f32 1.0, %v1157_v24  ;;  %v1943_v34 = vmul.f32 1.3333334, %v1847_v19  ;;  %vm1162_vm10 = vweird.f32 %v3693_v25 }
 0x1b1   : > { %v566_v58 = vmul.f32 0.0078125, %v492_v51  ;;  %v1212_v22 = vand.u32 2147483648, %v5431_v38  ;;  %vm5468_vm11 = vcmp.lt.f32.partialorder %v1559_v7, 0.5  ;;  %v1210_v32 = vand.u32 2147483647, %v5431_v38  ;;  %vm1163_vm13 = vmor %vm1161_vm8, %vm1162_vm10 }
 0x1b2   : > { %v2134_v8 = vand.u32 2139095040, %v1942_v41  ;;  %v1159_v5 = vmul.f32 %v3693_v25, %v1158_v36  ;;  %v2135_v43 = vand.u32 2139095040, %v1943_v34  ;;  %v5473_v14 = vmin.f32 %v599_v63, 10000.0 }
 0x1b3   : > { %vm1166_vm12 = vcmp.eq.f32.partialorder %v1165_v2, 8.507059e+37  ;;  %v1168_v37 = vor.u32 1.1754944e-38, %v1167_v47  ;;  %v3695_v51 = vpop.eup %3694  ;;  %vm1206_vm14 = vweird.f32 %v5431_v38  ;;  %v614_v7 = vmax.f32 %v566_v58, 1e-05 }
 0x1b4   : > { %v2326_v24 = vmax.f32 %v2134_v8, 1.0  ;;  %v1160_v46 = vadd.f32 %v3693_v25, %v1159_v5  ;;  %v2327_v19 = vmax.f32 %v2135_v43, 1.0  ;;  %3696 = vrcp.f32 %v5473_v14 }
 0x1b5   : > { %v5479_v41 = vmul.f32 0.0078125, %v456_v61  ;;  %v1202_v2 = vmul.f32 %v3695_v51, %v5431_v38  ;;  %v1213_v47 = vor.u32 1.1754944e-38, %v1212_v22  ;;  %vm5486_vm15 = vcmp.eq.f32.partialorder %v1210_v32, 8.507059e+37 }
 0x1b6   : > { %v2422_v36 = vsel %vm5463_vm9, 0.0, %v2326_v24  ;;  %v1164_v34 = vsel %vm1163_vm13, %v3693_v25, %v1160_v46  ;;  %v2423_v63 = vsel %vm5468_vm11, 0.0, %v2327_v19  ;;  %v970_v58 = vand.u32 2147483647, %v5473_v14 }
 0x1b7   : > { %v2518_v8 = vmin.f32 %v2422_v36, 64.0  ;;  %v1169_v5 = vsel %vm1166_vm12, %v1168_v37, %v1164_v34  ;;  %v2519_v61 = vmin.f32 %v2423_v63, 64.0  ;;  %v1203_v25 = vsub.f32 1.0, %v1202_v2  ;;  %v453_v37 = vpop.xlane.xlu1 %452 }
 0x1b8   : > { %v1460_v59 = vmul.f32 %v3791_v0, %v1169_v5  ;;  %v1461_v24 = vmul.f32 %v3792_v39, %v1169_v5  ;;  %v972_v22 = vand.u32 2147483648, %v5473_v14  ;;  %v3332_v62 = vmul.f32 %v4523_v57, %v5473_v14  ;;  %v7043_v5 = vld [vmem:[#allocation30_spill] sm:$0xff] }
 0x1b9   : > { %v2614_v46 = vmul.f32 %v2518_v8, %v5275_v17  ;;  %v5497_v32 = vmin.f32 %v614_v7, 10000.0  ;;  %v2615_v19 = vmul.f32 %v2519_v61, %v5275_v17  ;;  %v1204_v0 = vmul.f32 %v3695_v51, %v1203_v25 }
 0x1ba   : > { %v1556_v36 = vand.u32 2147483647, %v1460_v59  ;;  %v1557_v34 = vand.u32 2147483647, %v1461_v24  ;;  %v3697_v63 = vpop.eup %3696  ;;  %v7044_v2 = vand.u32 2147483648, %v7043_v5  ;;  %vm1207_vm0 = vweird.f32 %v3695_v51 }
 0x1bb   : > { %v5503_v8 = vadd.f32 %v5346_v33, %v3332_v62  ;;  %3698 = vrcp.f32 %v5497_v32  ;;  %v7046_v7 = vand.u32 2147483648, %v7045_v9  ;;  %v602_v17 = vmax.f32 %v5479_v41, 1e-05  ;;  %vm1208_vm4 = vmor %vm1206_vm14, %vm1207_vm0 }
 0x1bc   : > { %v2998_v39 = vor.u32 %v7044_v2, %v2614_v46  ;;  %v1748_v23 = vmax.f32 %v1556_v36, 0.0001  ;;  %v5509_v59 = vmul.f32 0.0078125, %v453_v37  ;;  %v1749_v61 = vmax.f32 %v1557_v34, 0.0001 }
 0x1bd   : > { %v2999_v21 = vor.u32 %v7046_v7, %v2615_v19  ;;  %v1205_v24 = vadd.f32 %v3695_v51, %v1204_v0  ;;  %v962_v25 = vmul.f32 %v3697_v63, %v5473_v14  ;;  %vm966_vm1 = vweird.f32 %v5473_v14  ;;  %v3794_v7 = vld [vmem:[%s4134_s25 + $0x238] sm:$0xff] }
 0x1be   : > { %3190 = vst [vmem:[%s4653_s19 + $0x210] sm:$0xff] %v2998_v39  ;;  %vm5515_vm2 = vcmp.lt.f32.partialorder %v1556_v36, 0.5  ;;  %vm5519_vm3 = vcmp.lt.f32.partialorder %v1557_v34, 0.5  ;;  %v1844_v41 = vmin.f32 %v1748_v23, 10000.0  ;;  %vm5526_vm6 = vcmp.eq.f32.partialorder %v970_v58, 8.507059e+37  ;;  %v3793_v58 = vld [vmem:[%s4134_s25 + $0x230] sm:$0xff] }
 0x1bf   : > { %3191 = vst [vmem:[%s4653_s19 + $0x218] sm:$0xff] %v2999_v21  ;;  %v973_v21 = vor.u32 1.1754944e-38, %v972_v22  ;;  %v1845_v62 = vmin.f32 %v1749_v61, 10000.0  ;;  %v1209_v37 = vsel %vm1208_vm4, %v3695_v51, %v1205_v24  ;;  %v963_v19 = vsub.f32 1.0, %v962_v25 }
 0x1c0   : > { %v3369_v36 = vmul.f32 %v4513_v10, %v5497_v32  ;;  %v1940_v34 = vmul.f32 1.3333334, %v1844_v41  ;;  %v1214_v23 = vsel %vm5486_vm15, %v1213_v47, %v1209_v37  ;;  %vm967_vm7 = vweird.f32 %v3697_v63 }
 0x1c1   : > { %v1195_v0 = vand.u32 2147483647, %v5497_v32  ;;  %v3699_v5 = vpop.eup %3698  ;;  %v1941_v2 = vmul.f32 1.3333334, %v1845_v62  ;;  %v1466_v39 = vmul.f32 %v3793_v58, %v1214_v23  ;;  %v1467_v18 = vmul.f32 %v3794_v7, %v1214_v23  ;;  %vm968_vm10 = vmor %vm966_vm1, %vm967_vm7 }
 0x1c2   : > { %v964_v22 = vmul.f32 %v3697_v63, %v963_v19  ;;  %v2132_v61 = vand.u32 2139095040, %v1940_v34  ;;  %v1187_v51 = vmul.f32 %v3699_v5, %v5497_v32  ;;  %vm1191_vm8 = vweird.f32 %v5497_v32 }
 0x1c3   : > { %v5540_v10 = vadd.f32 %v5457_v30, %v3369_v36  ;;  %v2133_v43 = vand.u32 2139095040, %v1941_v2  ;;  %v1562_v47 = vand.u32 2147483647, %v1466_v39  ;;  %v1563_v24 = vand.u32 2147483647, %v1467_v18 }
 0x1c4   : > { %v965_v25 = vadd.f32 %v3697_v63, %v964_v22  ;;  %v2324_v41 = vmax.f32 %v2132_v61, 1.0  ;;  %v1188_v37 = vsub.f32 1.0, %v1187_v51  ;;  %vm5542_vm9 = vcmp.eq.f32.partialorder %v1195_v0, 8.507059e+37 }
 0x1c5   : > { %v1197_v19 = vand.u32 2147483648, %v5497_v32  ;;  %v2325_v34 = vmax.f32 %v2133_v43, 1.0  ;;  %v1754_v23 = vmax.f32 %v1562_v47, 0.0001  ;;  %vm1192_vm11 = vweird.f32 %v3699_v5  ;;  %v3795_v43 = vld [vmem:[%s4134_s25 + $0x130] sm:$0xff] }
 0x1c6   : > { %v5550_v30 = vmin.f32 %v602_v17, 10000.0  ;;  %v2420_v18 = vsel %vm5515_vm2, 0.0, %v2324_v41  ;;  %v1755_v36 = vmax.f32 %v1563_v24, 0.0001  ;;  %v969_v0 = vsel %vm968_vm10, %v3697_v63, %v965_v25  ;;  %v3796_v17 = vld [vmem:[%s4134_s25 + $0x138] sm:$0xff]  ;;  %vm1193_vm12 = vmor %vm1191_vm8, %vm1192_vm11 }
 0x1c7   : > { %v1189_v2 = vmul.f32 %v3699_v5, %v1188_v37  ;;  %v2421_v58 = vsel %vm5519_vm3, 0.0, %v2325_v34  ;;  %v2516_v39 = vmin.f32 %v2420_v18, 64.0  ;;  %v1850_v7 = vmin.f32 %v1754_v23, 10000.0 }
 0x1c8   : > { %v974_v22 = vsel %vm5526_vm6, %v973_v21, %v969_v0  ;;  %v2517_v61 = vmin.f32 %v2421_v58, 64.0  ;;  %v1851_v51 = vmin.f32 %v1755_v36, 10000.0  ;;  %3700 = vrcp.f32 %v5550_v30  ;;  %v7055_v21 = vld [vmem:[#allocation32_spill] sm:$0xff] }
 0x1c9   : > { %v1434_v56 = vmul.f32 %v3795_v43, %v974_v22  ;;  %v1435_v31 = vmul.f32 %v3796_v17, %v974_v22  ;;  %v2612_v33 = vmul.f32 %v2516_v39, %v5403_v4  ;;  %v1946_v41 = vmul.f32 1.3333334, %v1850_v7  ;;  %v3798_v17 = vld [vmem:[%s4134_s25 + $0x228] sm:$0xff] }
 0x1ca   : > { %v1190_v63 = vadd.f32 %v3699_v5, %v1189_v2  ;;  %v2613_v9 = vmul.f32 %v2517_v61, %v5403_v4  ;;  %v1947_v25 = vmul.f32 1.3333334, %v1851_v51  ;;  %v7056_v34 = vand.u32 2147483648, %v7055_v21  ;;  %v7057_v2 = vld [vmem:[#allocation33_spill] sm:$0xff] }
 0x1cb   : > { %v1530_v37 = vand.u32 2147483647, %v1434_v56  ;;  %v1531_v46 = vand.u32 2147483647, %v1435_v31  ;;  %v2138_v18 = vand.u32 2139095040, %v1946_v41  ;;  %v1198_v0 = vor.u32 1.1754944e-38, %v1197_v19 }
 0x1cc   : > { %v2996_v23 = vor.u32 %v7056_v34, %v2612_v33  ;;  %v1194_v36 = vsel %vm1193_vm12, %v3699_v5, %v1190_v63  ;;  %v7058_v58 = vand.u32 2147483648, %v7057_v2  ;;  %vm5570_vm13 = vcmp.lt.f32.partialorder %v1562_v47, 0.5  ;;  %v3797_v47 = vld [vmem:[%s4134_s25 + $0x220] sm:$0xff] }
 0x1cd   : > { %v2139_v31 = vand.u32 2139095040, %v1947_v25  ;;  %v601_v56 = vmax.f32 %v5509_v59, 1e-05  ;;  %v2330_v7 = vmax.f32 %v2138_v18, 1.0  ;;  %v1722_v22 = vmax.f32 %v1530_v37, 0.0001 }
 0x1ce   : > { %v2997_v39 = vor.u32 %v7058_v58, %v2613_v9  ;;  %3188 = vst [vmem:[%s4653_s19 + $0x200] sm:$0xff] %v2996_v23  ;;  %v1723_v61 = vmax.f32 %v1531_v46, 0.0001  ;;  %v1199_v51 = vsel %vm5542_vm9, %v1198_v0, %v1194_v36  ;;  %vm5579_vm14 = vcmp.lt.f32.partialorder %v1563_v24, 0.5  ;;  %v3701_v41 = vpop.eup %3700 }
 0x1cf   : > { %v2331_v19 = vmax.f32 %v2139_v31, 1.0  ;;  %v1464_v43 = vmul.f32 %v3797_v47, %v1199_v51  ;;  %v1465_v33 = vmul.f32 %v3798_v17, %v1199_v51  ;;  %v2426_v59 = vsel %vm5570_vm13, 0.0, %v2330_v7 }
 0x1d0   : > { %3189 = vst [vmem:[%s4653_s19 + $0x208] sm:$0xff] %v2997_v39  ;;  %vm5587_vm15 = vcmp.lt.f32.partialorder %v1530_v37, 0.5  ;;  %v1818_v62 = vmin.f32 %v1722_v22, 10000.0  ;;  %v1819_v9 = vmin.f32 %v1723_v61, 10000.0  ;;  %v2522_v25 = vmin.f32 %v2426_v59, 64.0  ;;  %v7067_v61 = vld [vmem:[#allocation34_spill] sm:$0xff] }
 0x1d1   : > { %v2427_v24 = vsel %vm5579_vm14, 0.0, %v2331_v19  ;;  %v1560_v21 = vand.u32 2147483647, %v1464_v43  ;;  %v1561_v34 = vand.u32 2147483647, %v1465_v33  ;;  %vm1011_vm0 = vweird.f32 %v5550_v30 }
 0x1d2   : > { %v2523_v23 = vmin.f32 %v2427_v24, 64.0  ;;  %v1914_v18 = vmul.f32 1.3333334, %v1818_v62  ;;  %v1915_v36 = vmul.f32 1.3333334, %v1819_v9  ;;  %v1007_v0 = vmul.f32 %v3701_v41, %v5550_v30  ;;  %v5647_v24 = vld [vmem:[%s4134_s25 + $0x258] sm:$0xff] }
 0x1d3   : > { %v2618_v37 = vmul.f32 %v2522_v25, %v5431_v38  ;;  %vm5596_vm1 = vcmp.lt.f32.partialorder %v1531_v46, 0.5  ;;  %v1752_v58 = vmax.f32 %v1560_v21, 0.0001  ;;  %v1015_v39 = vand.u32 2147483647, %v5550_v30  ;;  %v7069_v46 = vld [vmem:[#allocation35_spill] sm:$0xff] }
 0x1d4   : > { %v2619_v4 = vmul.f32 %v2523_v23, %v5431_v38  ;;  %v2106_v31 = vand.u32 2139095040, %v1914_v18  ;;  %v2107_v7 = vand.u32 2139095040, %v1915_v36  ;;  %v1753_v22 = vmax.f32 %v1561_v34, 0.0001  ;;  %7081 = vst [vmem:[#allocation13_spill] sm:$0xff] %v5647_v24 }
 0x1d5   : > { %v7068_v51 = vand.u32 2147483648, %v7067_v61  ;;  %v1848_v19 = vmin.f32 %v1752_v58, 10000.0  ;;  %v1008_v47 = vsub.f32 1.0, %v1007_v0  ;;  %v1017_v43 = vand.u32 2147483648, %v5550_v30 }
 0x1d6   : > { %v7070_v17 = vand.u32 2147483648, %v7069_v46  ;;  %v2298_v59 = vmax.f32 %v2106_v31, 1.0  ;;  %v2299_v62 = vmax.f32 %v2107_v7, 1.0  ;;  %v1849_v9 = vmin.f32 %v1753_v22, 10000.0  ;;  %v450_v7 = vpop.xlane.xlu0 %449 }
 0x1d7   : > { %v3002_v5 = vor.u32 %v7068_v51, %v2618_v37  ;;  %vm5608_vm2 = vcmp.lt.f32.partialorder %v1560_v21, 0.5  ;;  %v1944_v25 = vmul.f32 1.3333334, %v1848_v19  ;;  %v1009_v23 = vmul.f32 %v3701_v41, %v1008_v47 }
 0x1d8   : > { %v3003_v33 = vor.u32 %v7070_v17, %v2619_v4  ;;  %vm1012_vm3 = vweird.f32 %v3701_v41  ;;  %v2394_v18 = vsel %vm5587_vm15, 0.0, %v2298_v59  ;;  %v2395_v36 = vsel %vm5596_vm1, 0.0, %v2299_v62  ;;  %v7075_v17 = vld [vmem:[#allocation36_spill] sm:$0xff]  ;;  %v3799_v62 = vld [vmem:[%s4134_s25 + $0x160] sm:$0xff] }
 0x1d9   : > { %3194 = vst [vmem:[%s4653_s19 + $0x230] sm:$0xff] %v3002_v5  ;;  %vm5617_vm4 = vcmp.lt.f32.partialorder %v1561_v34, 0.5  ;;  %v1945_v37 = vmul.f32 1.3333334, %v1849_v9  ;;  %v2490_v58 = vmin.f32 %v2394_v18, 64.0  ;;  %v2491_v21 = vmin.f32 %v2395_v36, 64.0  ;;  %vm1013_vm6 = vmor %vm1011_vm0, %vm1012_vm3 }
 0x1da   : > { %3195 = vst [vmem:[%s4653_s19 + $0x238] sm:$0xff] %v3003_v33  ;;  %v2136_v4 = vand.u32 2139095040, %v1944_v25  ;;  %v1010_v31 = vadd.f32 %v3701_v41, %v1009_v23  ;;  %vm1016_vm7 = vcmp.eq.f32.partialorder %v1015_v39, 8.507059e+37  ;;  %v1018_v63 = vor.u32 1.1754944e-38, %v1017_v43  ;;  %v5636_v9 = vld [vmem:[%s4134_s25 + $0x268] sm:$0xff] }
 0x1db   : > { %v2137_v22 = vand.u32 2139095040, %v1945_v37  ;;  %v5623_v2 = vmin.f32 %v601_v56, 10000.0  ;;  %v2586_v34 = vmul.f32 %v2490_v58, %v5473_v14  ;;  %v2587_v61 = vmul.f32 %v2491_v21, %v5473_v14  ;;  %v7077_v56 = vld [vmem:[#allocation37_spill] sm:$0xff]  ;;  %7079 = vst [vmem:[#allocation11_spill] sm:$0xff] %v5636_v9  ;;  %v3801_v36 = vld [vmem:[%s4134_s25 + $0x168] sm:$0xff] }
 0x1dc   : > { %v2328_v51 = vmax.f32 %v2136_v4, 1.0  ;;  %v1014_v5 = vsel %vm1013_vm6, %v3701_v41, %v1010_v31  ;;  %v552_v46 = vmul.f32 0.0078125, %v450_v7  ;;  %v7076_v39 = vand.u32 2147483648, %v7075_v17  ;;  %v5643_v58 = vld [vmem:[%s4134_s25 + $0x250] sm:$0xff] }
 0x1dd   : > { %v2329_v19 = vmax.f32 %v2137_v22, 1.0  ;;  %v1019_v47 = vsel %vm1016_vm7, %v1018_v63, %v1014_v5  ;;  %3702 = vrcp.f32 %v5623_v2  ;;  %v7078_v33 = vand.u32 2147483648, %v7077_v56  ;;  %7080 = vst [vmem:[#allocation12_spill] sm:$0xff] %v5643_v58  ;;  %v465_v22 = vpop.xlane.xlu2 %464  ;;  %v5652_v63 = vld [vmem:[%s4134_s25 + $0x240] sm:$0xff]  ;;  %v3810_v58 = vld [vmem:[%s4134_s25 + $0x198] sm:$0xff] }
 0x1de   : > { %v2970_v43 = vor.u32 %v7076_v39, %v2586_v34  ;;  %v2424_v14 = vsel %vm5608_vm2, 0.0, %v2328_v51  ;;  %v1440_v41 = vmul.f32 %v3799_v62, %v1019_v47  ;;  %v1441_v37 = vmul.f32 %v3801_v36, %v1019_v47  ;;  %7082 = vst [vmem:[#allocation14_spill] sm:$0xff] %v5652_v63  ;;  %v462_v36 = vpop.xlane.xlu1 %461  ;;  %v3808_v63 = vld [vmem:[%s4134_s25 + $0x148] sm:$0xff] }
 0x1df   : > { %v2971_v59 = vor.u32 %v7078_v33, %v2587_v61  ;;  %v2425_v23 = vsel %vm5617_vm4, 0.0, %v2329_v19  ;;  %v2520_v18 = vmin.f32 %v2424_v14, 64.0  ;;  %v600_v51 = vmax.f32 %v552_v46, 1e-05 }
 0x1e0   : > { %3162 = vst [vmem:[%s4653_s19 + $0x130] sm:$0xff] %v2970_v43  ;;  %v2521_v31 = vmin.f32 %v2425_v23, 64.0  ;;  %v1536_v7 = vand.u32 2147483647, %v1440_v41  ;;  %v1537_v61 = vand.u32 2147483647, %v1441_v37  ;;  %v5660_v47 = vmul.f32 %v4769_v44, %v5550_v30 }
 0x1e1   : > { %3163 = vst [vmem:[%s4653_s19 + $0x138] sm:$0xff] %v2971_v59  ;;  %v2616_v34 = vmul.f32 %v2520_v18, %v5497_v32  ;;  %v1000_v17 = vand.u32 2147483647, %v5623_v2  ;;  %v7083_v43 = vld [vmem:[#allocation38_spill] sm:$0xff]  ;;  %v5665_v14 = vmin.f32 %v600_v51, 10000.0  ;;  %v557_v62 = vmul.f32 0.0078125, %v465_v22 }
 0x1e2   : > { %v2617_v5 = vmul.f32 %v2521_v31, %v5497_v32  ;;  %v1728_v19 = vmax.f32 %v1536_v7, 0.0001  ;;  %v7084_v56 = vand.u32 2147483648, %v7083_v43  ;;  %v1729_v59 = vmax.f32 %v1537_v61, 0.0001  ;;  %v7085_v41 = vld [vmem:[#allocation39_spill] sm:$0xff] }
 0x1e3   : > { %v3703_v39 = vpop.eup %3702  ;;  %v7086_v46 = vand.u32 2147483648, %v7085_v41  ;;  %vm996_vm8 = vweird.f32 %v5623_v2  ;;  %v1002_v31 = vand.u32 2147483648, %v5623_v2  ;;  %3704 = vrcp.f32 %v5665_v14 }
 0x1e4   : > { %v3000_v33 = vor.u32 %v7084_v56, %v2616_v34  ;;  %v1824_v32 = vmin.f32 %v1728_v19, 10000.0  ;;  %v992_v18 = vmul.f32 %v3703_v39, %v5623_v2  ;;  %v1825_v37 = vmin.f32 %v1729_v59, 10000.0 }
 0x1e5   : > { %v3001_v23 = vor.u32 %v7086_v46, %v2617_v5  ;;  %v3334_v34 = vmul.f32 %v4520_v40, %v5623_v2  ;;  %vm5677_vm9 = vcmp.eq.f32.partialorder %v1000_v17, 8.507059e+37  ;;  %v3333_v19 = vmul.f32 %v4510_v55, %v5665_v14  ;;  %v459_v5 = vpop.xlane.xlu0 %458 }
 0x1e6   : > { %3192 = vst [vmem:[%s4653_s19 + $0x220] sm:$0xff] %v3000_v33  ;;  %v1920_v22 = vmul.f32 1.3333334, %v1824_v32  ;;  %v993_v51 = vsub.f32 1.0, %v992_v18  ;;  %vm5683_vm10 = vcmp.lt.f32.partialorder %v1536_v7, 0.5  ;;  %v556_v59 = vmul.f32 0.0078125, %v462_v36 }
 0x1e7   : > { %3193 = vst [vmem:[%s4653_s19 + $0x228] sm:$0xff] %v3001_v23  ;;  %v1921_v56 = vmul.f32 1.3333334, %v1825_v37  ;;  %v605_v33 = vmax.f32 %v557_v62, 1e-05  ;;  %vm997_vm11 = vweird.f32 %v3703_v39  ;;  %v3348_v23 = vadd.f32 %v5503_v8, %v3333_v19 }
 0x1e8   : > { %v2112_v41 = vand.u32 2139095040, %v1920_v22  ;;  %v994_v46 = vmul.f32 %v3703_v39, %v993_v51  ;;  %v1003_v17 = vor.u32 1.1754944e-38, %v1002_v31  ;;  %v985_v18 = vand.u32 2147483647, %v5665_v14  ;;  %vm998_vm13 = vmor %vm996_vm8, %vm997_vm11 }
 0x1e9   : > { %v2113_v32 = vand.u32 2139095040, %v1921_v56  ;;  %v5689_v0 = vmin.f32 %v605_v33, 10000.0  ;;  %vm5691_vm12 = vcmp.lt.f32.partialorder %v1537_v61, 0.5  ;;  %v3349_v37 = vadd.f32 %v3348_v23, %v3334_v34  ;;  %v3705_v62 = vpop.eup %3704 }
 0x1ea   : > { %v2304_v7 = vmax.f32 %v2112_v41, 1.0  ;;  %v995_v21 = vadd.f32 %v3703_v39, %v994_v46  ;;  %vm981_vm14 = vweird.f32 %v5665_v14  ;;  %v604_v8 = vmax.f32 %v556_v59, 1e-05  ;;  %v3805_v41 = vld [vmem:[%s4134_s25 + $0x150] sm:$0xff]  ;;  %v3806_v46 = vld [vmem:[%s4134_s25 + $0x158] sm:$0xff] }
 0x1eb   : > { %v2305_v36 = vmax.f32 %v2113_v32, 1.0  ;;  %3706 = vrcp.f32 %v5689_v0  ;;  %v977_v22 = vmul.f32 %v3705_v62, %v5665_v14  ;;  %v987_v34 = vand.u32 2147483648, %v5665_v14 }
 0x1ec   : > { %v2400_v61 = vsel %vm5683_vm10, 0.0, %v2304_v7  ;;  %v999_v31 = vsel %vm998_vm13, %v3703_v39, %v995_v21  ;;  %vm5707_vm15 = vcmp.eq.f32.partialorder %v985_v18, 8.507059e+37  ;;  %v1060_v32 = vand.u32 2147483647, %v5689_v0 }
 0x1ed   : > { %v2401_v51 = vsel %vm5691_vm12, 0.0, %v2305_v36  ;;  %v2496_v19 = vmin.f32 %v2400_v61, 64.0  ;;  %v1004_v56 = vsel %vm5677_vm9, %v1003_v17, %v999_v31  ;;  %v978_v39 = vsub.f32 1.0, %v977_v22 }
 0x1ee   : > { %v2497_v59 = vmin.f32 %v2401_v51, 64.0  ;;  %v1438_v43 = vmul.f32 %v3805_v41, %v1004_v56  ;;  %v1439_v21 = vmul.f32 %v3806_v46, %v1004_v56  ;;  %v1062_v4 = vand.u32 2147483648, %v5689_v0  ;;  %v7095_v51 = vld [vmem:[#allocation40_spill] sm:$0xff]  ;;  %v7097_v41 = vld [vmem:[#allocation41_spill] sm:$0xff] }
 0x1ef   : > { %v2592_v23 = vmul.f32 %v2496_v19, %v5550_v30  ;;  %v5716_v7 = vmin.f32 %v604_v8, 10000.0  ;;  %v979_v61 = vmul.f32 %v3705_v62, %v978_v39  ;;  %v7096_v22 = vand.u32 2147483648, %v7095_v51 }
 0x1f0   : > { %v2593_v17 = vmul.f32 %v2497_v59, %v5550_v30  ;;  %v1534_v18 = vand.u32 2147483647, %v1438_v43  ;;  %v1535_v36 = vand.u32 2147483647, %v1439_v21  ;;  %vm982_vm0 = vweird.f32 %v3705_v62 }
 0x1f1   : > { %v5719_v31 = vpop.eup %3706  ;;  %v2976_v56 = vor.u32 %v7096_v22, %v2592_v23  ;;  %v988_v19 = vor.u32 1.1754944e-38, %v987_v34  ;;  %3708 = vrcp.f32 %v5716_v7  ;;  %v7098_v46 = vand.u32 2147483648, %v7097_v41  ;;  %vm983_vm4 = vmor %vm981_vm14, %vm982_vm0 }
 0x1f2   : > { %v1726_v25 = vmax.f32 %v1534_v18, 0.0001  ;;  %vm1056_vm1 = vweird.f32 %v5689_v0  ;;  %v555_v30 = vmul.f32 0.0078125, %v459_v5  ;;  %v1727_v59 = vmax.f32 %v1535_v36, 0.0001 }
 0x1f3   : > { %v2977_v8 = vor.u32 %v7098_v46, %v2593_v17  ;;  %3168 = vst [vmem:[%s4653_s19 + $0x160] sm:$0xff] %v2976_v56  ;;  %v980_v43 = vadd.f32 %v3705_v62, %v979_v61  ;;  %v1052_v21 = vmul.f32 %v5719_v31, %v5689_v0  ;;  %v1063_v39 = vor.u32 1.1754944e-38, %v1062_v4  ;;  %v3807_v46 = vld [vmem:[%s4134_s25 + $0x140] sm:$0xff] }
 0x1f4   : > { %vm5731_vm2 = vcmp.lt.f32.partialorder %v1534_v18, 0.5  ;;  %vm5735_vm3 = vcmp.lt.f32.partialorder %v1535_v36, 0.5  ;;  %v1822_v17 = vmin.f32 %v1726_v25, 10000.0  ;;  %vm1057_vm6 = vweird.f32 %v5719_v31 }
 0x1f5   : > { %3169 = vst [vmem:[%s4653_s19 + $0x168] sm:$0xff] %v2977_v8  ;;  %vm5743_vm7 = vcmp.eq.f32.partialorder %v1060_v32, 8.507059e+37  ;;  %v1823_v5 = vmin.f32 %v1727_v59, 10000.0  ;;  %v984_v18 = vsel %vm983_vm4, %v3705_v62, %v980_v43  ;;  %v1053_v61 = vsub.f32 1.0, %v1052_v21  ;;  %vm1058_vm10 = vmor %vm1056_vm1, %vm1057_vm6 }
 0x1f6   : > { %v5748_v36 = vadd.f32 %v3349_v37, %v5660_v47  ;;  %v1918_v51 = vmul.f32 1.3333334, %v1822_v17  ;;  %v989_v25 = vsel %vm5707_vm15, %v988_v19, %v984_v18  ;;  %v1045_v22 = vand.u32 2147483647, %v5716_v7 }
 0x1f7   : > { %v1047_v56 = vand.u32 2147483648, %v5716_v7  ;;  %v5754_v41 = vpop.eup %3708  ;;  %v1919_v32 = vmul.f32 1.3333334, %v1823_v5  ;;  %v1436_v8 = vmul.f32 %v3807_v46, %v989_v25  ;;  %v1437_v59 = vmul.f32 %v3808_v63, %v989_v25 }
 0x1f8   : > { %v1054_v62 = vmul.f32 %v5719_v31, %v1053_v61  ;;  %vm1041_vm8 = vweird.f32 %v5716_v7  ;;  %v2110_v47 = vand.u32 2139095040, %v1918_v51  ;;  %v1037_v37 = vmul.f32 %v5754_v41, %v5716_v7 }
 0x1f9   : > { %v5764_v33 = vmul.f32 %v4753_v50, %v5716_v7  ;;  %v603_v19 = vmax.f32 %v555_v30, 1e-05  ;;  %v2111_v43 = vand.u32 2139095040, %v1919_v32  ;;  %v1532_v21 = vand.u32 2147483647, %v1436_v8 }
 0x1fa   : > { %v1533_v17 = vand.u32 2147483647, %v1437_v59  ;;  %v1055_v5 = vadd.f32 %v5719_v31, %v1054_v62  ;;  %v2302_v18 = vmax.f32 %v2110_v47, 1.0  ;;  %v1038_v63 = vsub.f32 1.0, %v1037_v37 }
 0x1fb   : > { %vm5767_vm9 = vcmp.eq.f32.partialorder %v1045_v22, 8.507059e+37  ;;  %v1048_v51 = vor.u32 1.1754944e-38, %v1047_v56  ;;  %v2303_v25 = vmax.f32 %v2111_v43, 1.0  ;;  %v1724_v46 = vmax.f32 %v1532_v21, 0.0001 }
 0x1fc   : > { %vm1042_vm11 = vweird.f32 %v5754_v41  ;;  %v5776_v30 = vmin.f32 %v603_v19, 10000.0  ;;  %v2398_v22 = vsel %vm5731_vm2, 0.0, %v2302_v18  ;;  %v1725_v32 = vmax.f32 %v1533_v17, 0.0001  ;;  %v3809_v19 = vld [vmem:[%s4134_s25 + $0x190] sm:$0xff]  ;;  %v474_v18 = vpop.xlane.xlu2 %473 }
 0x1fd   : > { %v1059_v8 = vsel %vm1058_vm10, %v5719_v31, %v1055_v5  ;;  %v1039_v56 = vmul.f32 %v5754_v41, %v1038_v63  ;;  %v2399_v59 = vsel %vm5735_vm3, 0.0, %v2303_v25  ;;  %v2494_v62 = vmin.f32 %v2398_v22, 64.0  ;;  %vm1043_vm12 = vmor %vm1041_vm8, %vm1042_vm11 }
 0x1fe   : > { %v1820_v47 = vmin.f32 %v1724_v46, 10000.0  ;;  %v1064_v37 = vsel %vm5743_vm7, %v1063_v39, %v1059_v8  ;;  %v2495_v43 = vmin.f32 %v2399_v59, 64.0  ;;  %v1821_v50 = vmin.f32 %v1725_v32, 10000.0 }
 0x1ff   : > { %v1446_v24 = vmul.f32 %v3809_v19, %v1064_v37  ;;  %v1447_v23 = vmul.f32 %v3810_v58, %v1064_v37  ;;  %v2590_v9 = vmul.f32 %v2494_v62, %v5623_v2  ;;  %v1040_v5 = vadd.f32 %v5754_v41, %v1039_v56  ;;  %v7107_v58 = vld [vmem:[#allocation42_spill] sm:$0xff] }
 0x200   : > { %v1916_v31 = vmul.f32 1.3333334, %v1820_v47  ;;  %3710 = vrcp.f32 %v5776_v30  ;;  %v2591_v34 = vmul.f32 %v2495_v43, %v5623_v2  ;;  %v1917_v63 = vmul.f32 1.3333334, %v1821_v50  ;;  %v7109_v2 = vld [vmem:[#allocation43_spill] sm:$0xff] }
 0x201   : > { %v1542_v4 = vand.u32 2147483647, %v1446_v24  ;;  %v1543_v39 = vand.u32 2147483647, %v1447_v23  ;;  %v7108_v25 = vand.u32 2147483648, %v7107_v58  ;;  %v1044_v32 = vsel %vm1043_vm12, %v5754_v41, %v1040_v5 }
 0x202   : > { %v2108_v22 = vand.u32 2139095040, %v1916_v31  ;;  %v5799_v8 = vmul.f32 0.0078125, %v474_v18  ;;  %v7110_v50 = vand.u32 2147483648, %v7109_v2  ;;  %vm5803_vm13 = vcmp.lt.f32.partialorder %v1532_v21, 0.5  ;;  %v3811_v21 = vld [vmem:[%s4134_s25 + $0x180] sm:$0xff] }
 0x203   : > { %v2974_v46 = vor.u32 %v7108_v25, %v2590_v9  ;;  %vm5807_vm14 = vcmp.lt.f32.partialorder %v1533_v17, 0.5  ;;  %v2109_v62 = vand.u32 2139095040, %v1917_v63  ;;  %v1734_v47 = vmax.f32 %v1542_v4, 0.0001  ;;  %v3812_v17 = vld [vmem:[%s4134_s25 + $0x188] sm:$0xff] }
 0x204   : > { %v2975_v24 = vor.u32 %v7110_v50, %v2591_v34  ;;  %v2300_v9 = vmax.f32 %v2108_v22, 1.0  ;;  %v1735_v37 = vmax.f32 %v1543_v39, 0.0001  ;;  %v1049_v41 = vsel %vm5767_vm9, %v1048_v51, %v1044_v32 }
 0x205   : > { %3166 = vst [vmem:[%s4653_s19 + $0x150] sm:$0xff] %v2974_v46  ;;  %v2301_v43 = vmax.f32 %v2109_v62, 1.0  ;;  %vm5815_vm15 = vcmp.lt.f32.partialorder %v1542_v4, 0.5  ;;  %v1444_v23 = vmul.f32 %v3811_v21, %v1049_v41  ;;  %v1445_v18 = vmul.f32 %v3812_v17, %v1049_v41  ;;  %v7121_v41 = vld [vmem:[#allocation44_spill] sm:$0xff] }
 0x206   : > { %3167 = vst [vmem:[%s4653_s19 + $0x158] sm:$0xff] %v2975_v24  ;;  %v3711_v31 = vpop.eup %3710  ;;  %v2396_v5 = vsel %vm5803_vm13, 0.0, %v2300_v9  ;;  %vm5823_vm0 = vcmp.lt.f32.partialorder %v1543_v39, 0.5  ;;  %v1830_v61 = vmin.f32 %v1734_v47, 10000.0  ;;  %v1831_v51 = vmin.f32 %v1735_v37, 10000.0 }
 0x207   : > { %v2397_v63 = vsel %vm5807_vm14, 0.0, %v2301_v43  ;;  %v2492_v4 = vmin.f32 %v2396_v5, 64.0  ;;  %v1540_v58 = vand.u32 2147483647, %v1444_v23  ;;  %v1541_v25 = vand.u32 2147483647, %v1445_v18 }
 0x208   : > { %vm1026_vm1 = vweird.f32 %v5776_v30  ;;  %v2493_v46 = vmin.f32 %v2397_v63, 64.0  ;;  %v1926_v22 = vmul.f32 1.3333334, %v1830_v61  ;;  %v1927_v32 = vmul.f32 1.3333334, %v1831_v51  ;;  %v7125_v5 = vld [vmem:[#allocation45_spill] sm:$0xff] }
 0x209   : > { %v1022_v2 = vmul.f32 %v3711_v31, %v5776_v30  ;;  %v2588_v39 = vmul.f32 %v2492_v4, %v5665_v14  ;;  %v1732_v50 = vmax.f32 %v1540_v58, 0.0001  ;;  %v1030_v24 = vand.u32 2147483647, %v5776_v30 }
 0x20a   : > { %v1032_v56 = vand.u32 2147483648, %v5776_v30  ;;  %v2589_v59 = vmul.f32 %v2493_v46, %v5665_v14  ;;  %v2118_v62 = vand.u32 2139095040, %v1926_v22  ;;  %v2119_v9 = vand.u32 2139095040, %v1927_v32 }
 0x20b   : > { %vm5835_vm2 = vcmp.lt.f32.partialorder %v1540_v58, 0.5  ;;  %v1733_v37 = vmax.f32 %v1541_v25, 0.0001  ;;  %v7122_v43 = vand.u32 2147483648, %v7121_v41  ;;  %vm5841_vm3 = vcmp.lt.f32.partialorder %v1541_v25, 0.5 }
 0x20c   : > { %v1828_v17 = vmin.f32 %v1732_v50, 10000.0  ;;  %v1023_v18 = vsub.f32 1.0, %v1022_v2  ;;  %v7126_v61 = vand.u32 2147483648, %v7125_v5  ;;  %v2310_v51 = vmax.f32 %v2118_v62, 1.0 }
 0x20d   : > { %v2972_v21 = vor.u32 %v7122_v43, %v2588_v39  ;;  %v2311_v63 = vmax.f32 %v2119_v9, 1.0  ;;  %v1829_v4 = vmin.f32 %v1733_v37, 10000.0  ;;  %vm1027_vm4 = vweird.f32 %v3711_v31 }
 0x20e   : > { %v2973_v14 = vor.u32 %v7126_v61, %v2589_v59  ;;  %v1924_v58 = vmul.f32 1.3333334, %v1828_v17  ;;  %v1024_v46 = vmul.f32 %v3711_v31, %v1023_v18  ;;  %vm5848_vm6 = vcmp.eq.f32.partialorder %v1030_v24, 8.507059e+37  ;;  %vm1028_vm7 = vmor %vm1026_vm1, %vm1027_vm4 }
 0x20f   : > { %3164 = vst [vmem:[%s4653_s19 + $0x140] sm:$0xff] %v2972_v21  ;;  %v2406_v25 = vsel %vm5815_vm15, 0.0, %v2310_v51  ;;  %v2407_v32 = vsel %vm5823_vm0, 0.0, %v2311_v63  ;;  %v1925_v2 = vmul.f32 1.3333334, %v1829_v4  ;;  %v3336_v39 = vmul.f32 %v4758_v45, %v5776_v30  ;;  %v7131_v63 = vld [vmem:[#allocation47_spill] sm:$0xff] }
 0x210   : > { %3165 = vst [vmem:[%s4653_s19 + $0x148] sm:$0xff] %v2973_v14  ;;  %v2502_v50 = vmin.f32 %v2406_v25, 64.0  ;;  %v2503_v59 = vmin.f32 %v2407_v32, 64.0  ;;  %v2116_v62 = vand.u32 2139095040, %v1924_v58  ;;  %v1025_v9 = vadd.f32 %v3711_v31, %v1024_v46  ;;  %v7129_v14 = vld [vmem:[#allocation46_spill] sm:$0xff]  ;;  %v3813_v46 = vld [vmem:[%s4134_s25 + $0x170] sm:$0xff] }
 0x211   : > { %v2117_v37 = vand.u32 2139095040, %v1925_v2  ;;  %v1033_v24 = vor.u32 1.1754944e-38, %v1032_v56  ;;  %v3351_v19 = vadd.f32 %v5748_v36, %v3336_v39  ;;  %v608_v41 = vmax.f32 %v5799_v8, 1e-05  ;;  %v471_v36 = vpop.xlane.xlu1 %470  ;;  %v3814_v32 = vld [vmem:[%s4134_s25 + $0x178] sm:$0xff]  ;;  %v5882_v39 = vld [vmem:[%s4134_s25 + $0x248] sm:$0xff] }
 0x212   : > { %v2598_v34 = vmul.f32 %v2502_v50, %v5689_v0  ;;  %v2599_v43 = vmul.f32 %v2503_v59, %v5689_v0  ;;  %v2308_v21 = vmax.f32 %v2116_v62, 1.0  ;;  %v1029_v17 = vsel %vm1028_vm7, %v3711_v31, %v1025_v9  ;;  %v5887_v9 = vld [vmem:[%s4134_s25 + $0x290] sm:$0xff]  ;;  %v3823_v50 = vld [vmem:[%s4134_s25 + $0x1b8] sm:$0xff] }
 0x213   : > { %v2309_v18 = vmax.f32 %v2117_v37, 1.0  ;;  %v1034_v5 = vsel %vm5848_vm6, %v1033_v24, %v1029_v17  ;;  %v3352_v61 = vadd.f32 %v3351_v19, %v5764_v33  ;;  %v5868_v56 = vmin.f32 %v608_v41, 10000.0  ;;  %v5891_v37 = vld [vmem:[%s4134_s25 + $0x298] sm:$0xff]  ;;  %v7146_v24 = vld [vmem:[#allocation51_spill] sm:$0xff] }
 0x214   : > { %v7130_v8 = vand.u32 2147483648, %v7129_v14  ;;  %v7132_v4 = vand.u32 2147483648, %v7131_v63  ;;  %v2404_v31 = vsel %vm5835_vm2, 0.0, %v2308_v21  ;;  %v1442_v22 = vmul.f32 %v3813_v46, %v1034_v5  ;;  %v5904_v14 = vld [vmem:[%s4134_s25 + $0x288] sm:$0xff]  ;;  %v7136_v46 = vld [vmem:[#allocation49_spill] sm:$0xff] }
 0x215   : > { %v2405_v33 = vsel %vm5841_vm3, 0.0, %v2309_v18  ;;  %v2500_v25 = vmin.f32 %v2404_v31, 64.0  ;;  %v1443_v2 = vmul.f32 %v3814_v32, %v1034_v5  ;;  %3712 = vrcp.f32 %v5868_v56  ;;  %v468_v5 = vpop.xlane.xlu0 %467  ;;  %7133 = vst [vmem:[#allocation15_spill] sm:$0xff] %v5904_v14  ;;  %v7134_v63 = vld [vmem:[#allocation48_spill] sm:$0xff] }
 0x216   : > { %v2982_v51 = vor.u32 %v7130_v8, %v2598_v34  ;;  %v2983_v58 = vor.u32 %v7132_v4, %v2599_v43  ;;  %v2501_v47 = vmin.f32 %v2405_v33, 64.0  ;;  %v1538_v59 = vand.u32 2147483647, %v1442_v22  ;;  %v5897_v34 = vld [vmem:[%s4134_s25 + $0x280] sm:$0xff] }
 0x217   : > { %v559_v62 = vmul.f32 0.0078125, %v471_v36  ;;  %v2596_v19 = vmul.f32 %v2500_v25, %v5716_v7  ;;  %v1539_v41 = vand.u32 2147483647, %v1443_v2  ;;  %v3338_v21 = vmul.f32 %v4954_v53, %v5689_v0  ;;  %v483_v36 = vpop.xlane.xlu2 %482 }
 0x218   : > { %3174 = vst [vmem:[%s4653_s19 + $0x190] sm:$0xff] %v2982_v51  ;;  %v2597_v17 = vmul.f32 %v2501_v47, %v5716_v7  ;;  %v1730_v18 = vmax.f32 %v1538_v59, 0.0001  ;;  %v3370_v51 = vmul.f32 %v4523_v57, %v5431_v38  ;;  %v7135_v4 = vand.u32 2147483648, %v7134_v63 }
 0x219   : > { %3175 = vst [vmem:[%s4653_s19 + $0x198] sm:$0xff] %v2983_v58  ;;  %v1731_v31 = vmax.f32 %v1539_v41, 0.0001  ;;  %v7137_v22 = vand.u32 2147483648, %v7136_v46  ;;  %v607_v7 = vmax.f32 %v559_v62, 1e-05  ;;  %v5913_v25 = vadd.f32 %v3352_v61, %v3338_v21 }
 0x21a   : > { %v2980_v58 = vor.u32 %v7135_v4, %v2596_v19  ;;  %v1826_v33 = vmin.f32 %v1730_v18, 10000.0  ;;  %v1105_v47 = vand.u32 2147483647, %v5868_v56  ;;  %v558_v8 = vmul.f32 0.0078125, %v468_v5  ;;  %v480_v5 = vpop.xlane.xlu1 %479 }
 0x21b   : > { %v2981_v0 = vor.u32 %v7137_v22, %v2597_v17  ;;  %v3713_v32 = vpop.eup %3712  ;;  %v1827_v2 = vmin.f32 %v1731_v31, 10000.0  ;;  %v563_v43 = vmul.f32 0.0078125, %v483_v36  ;;  %v1107_v19 = vand.u32 2147483648, %v5868_v56 }
 0x21c   : > { %3172 = vst [vmem:[%s4653_s19 + $0x180] sm:$0xff] %v2980_v58  ;;  %v1922_v57 = vmul.f32 1.3333334, %v1826_v33  ;;  %v1097_v38 = vmul.f32 %v3713_v32, %v5868_v56  ;;  %v5920_v63 = vmin.f32 %v607_v7, 10000.0  ;;  %v606_v18 = vmax.f32 %v558_v8, 1e-05 }
 0x21d   : > { %3173 = vst [vmem:[%s4653_s19 + $0x188] sm:$0xff] %v2981_v0  ;;  %v1923_v17 = vmul.f32 1.3333334, %v1827_v2  ;;  %v611_v62 = vmax.f32 %v563_v43, 1e-05  ;;  %v5923_v61 = vadd.f32 %v5540_v10, %v3370_v51  ;;  %vm1101_vm8 = vweird.f32 %v5868_v56 }
 0x21e   : > { %v2114_v21 = vand.u32 2139095040, %v1922_v57  ;;  %v1098_v4 = vsub.f32 1.0, %v1097_v38  ;;  %3714 = vrcp.f32 %v5920_v63  ;;  %vm5927_vm9 = vcmp.lt.f32.partialorder %v1538_v59, 0.5 }
 0x21f   : > { %v2115_v58 = vand.u32 2139095040, %v1923_v17  ;;  %vm1102_vm10 = vweird.f32 %v3713_v32  ;;  %vm5931_vm11 = vcmp.eq.f32.partialorder %v1105_v47, 8.507059e+37  ;;  %v5935_v8 = vmin.f32 %v606_v18, 10000.0 }
 0x220   : > { %v2306_v43 = vmax.f32 %v2114_v21, 1.0  ;;  %v1099_v10 = vmul.f32 %v3713_v32, %v1098_v4  ;;  %v5937_v51 = vmin.f32 %v611_v62, 10000.0  ;;  %vm1635_vm12 = vcmp.lt.f32.partialorder %v1539_v41, 0.5  ;;  %vm1103_vm13 = vmor %vm1101_vm8, %vm1102_vm10 }
 0x221   : > { %v2307_v46 = vmax.f32 %v2115_v58, 1.0  ;;  %v1108_v22 = vor.u32 1.1754944e-38, %v1107_v19  ;;  %v5939_v0 = vmul.f32 0.0078125, %v480_v5  ;;  %v1090_v7 = vand.u32 2147483647, %v5920_v63  ;;  %v3820_v58 = vld [vmem:[%s4134_s25 + $0x1c0] sm:$0xff] }
 0x222   : > { %v2402_v59 = vsel %vm5927_vm9, 0.0, %v2306_v43  ;;  %v1100_v33 = vadd.f32 %v3713_v32, %v1099_v10  ;;  %3716 = vrcp.f32 %v5935_v8  ;;  %vm1086_vm14 = vweird.f32 %v5920_v63  ;;  %v3821_v10 = vld [vmem:[%s4134_s25 + $0x1c8] sm:$0xff] }
 0x223   : > { %v2403_v2 = vsel %vm1635_vm12, 0.0, %v2307_v46  ;;  %v2498_v47 = vmin.f32 %v2402_v59, 64.0  ;;  %v1092_v41 = vand.u32 2147483648, %v5920_v63  ;;  %v5952_v57 = vmul.f32 %v4945_v3, %v5920_v63  ;;  %v7142_v59 = vld [vmem:[#allocation50_spill] sm:$0xff] }
 0x224   : > { %v3715_v38 = vpop.eup %3714  ;;  %v2499_v19 = vmin.f32 %v2403_v2, 64.0  ;;  %v1104_v17 = vsel %vm1103_vm13, %v3713_v32, %v1100_v33  ;;  %v1075_v18 = vand.u32 2147483647, %v5935_v8  ;;  %3718 = vrcp.f32 %v5937_v51 }
 0x225   : > { %v2594_v62 = vmul.f32 %v2498_v47, %v5776_v30  ;;  %v1109_v21 = vsel %vm5931_vm11, %v1108_v22, %v1104_v17  ;;  %v1082_v4 = vmul.f32 %v3715_v38, %v5920_v63  ;;  %v1077_v5 = vand.u32 2147483648, %v5935_v8 }
 0x226   : > { %v2595_v36 = vmul.f32 %v2499_v19, %v5776_v30  ;;  %v1452_v43 = vmul.f32 %v3820_v58, %v1109_v21  ;;  %v1453_v32 = vmul.f32 %v3821_v10, %v1109_v21  ;;  %v3339_v46 = vmul.f32 %v4961_v42, %v5935_v8 }
 0x227   : > { %v7143_v33 = vand.u32 2147483648, %v7142_v59  ;;  %v1083_v31 = vsub.f32 1.0, %v1082_v4  ;;  %vm5968_vm15 = vcmp.eq.f32.partialorder %v1090_v7, 8.507059e+37  ;;  %v1093_v47 = vor.u32 1.1754944e-38, %v1092_v41 }
 0x228   : > { %v3717_v17 = vpop.eup %3716  ;;  %v7147_v30 = vand.u32 2147483648, %v7146_v24  ;;  %v1548_v58 = vand.u32 2147483647, %v1452_v43  ;;  %v1549_v23 = vand.u32 2147483647, %v1453_v32  ;;  %vm1087_vm0 = vweird.f32 %v3715_v38 }
 0x229   : > { %v2978_v2 = vor.u32 %v7143_v33, %v2594_v62  ;;  %v610_v21 = vmax.f32 %v5939_v0, 1e-05  ;;  %v1084_v10 = vmul.f32 %v3715_v38, %v1083_v31  ;;  %v1067_v59 = vmul.f32 %v3717_v17, %v5935_v8  ;;  %vm1088_vm7 = vmor %vm1086_vm14, %vm1087_vm0 }
 0x22a   : > { %v2979_v19 = vor.u32 %v7147_v30, %v2595_v36  ;;  %vm1071_vm1 = vweird.f32 %v5935_v8  ;;  %v5978_v7 = vpop.eup %3718  ;;  %v1740_v62 = vmax.f32 %v1548_v58, 0.0001  ;;  %vm5981_vm2 = vcmp.eq.f32.partialorder %v1075_v18, 8.507059e+37 }
 0x22b   : > { %3170 = vst [vmem:[%s4653_s19 + $0x170] sm:$0xff] %v2978_v2  ;;  %v1078_v24 = vor.u32 1.1754944e-38, %v1077_v5  ;;  %v3354_v4 = vadd.f32 %v5913_v25, %v3339_v46  ;;  %v1741_v36 = vmax.f32 %v1549_v23, 0.0001  ;;  %v1085_v0 = vadd.f32 %v3715_v38, %v1084_v10 }
 0x22c   : > { %3171 = vst [vmem:[%s4653_s19 + $0x178] sm:$0xff] %v2979_v19  ;;  %v1068_v43 = vsub.f32 1.0, %v1067_v59  ;;  %v1142_v32 = vmul.f32 %v5978_v7, %v5937_v51  ;;  %vm1146_vm3 = vweird.f32 %v5937_v51  ;;  %vm5989_vm4 = vcmp.lt.f32.partialorder %v1548_v58, 0.5  ;;  %v3822_v59 = vld [vmem:[%s4134_s25 + $0x1b0] sm:$0xff] }
 0x22d   : > { %vm5993_vm6 = vcmp.lt.f32.partialorder %v1549_v23, 0.5  ;;  %v1836_v5 = vmin.f32 %v1740_v62, 10000.0  ;;  %vm1072_vm8 = vweird.f32 %v3717_v17  ;;  %v1837_v25 = vmin.f32 %v1741_v36, 10000.0 }
 0x22e   : > { %v1089_v46 = vsel %vm1088_vm7, %v3715_v38, %v1085_v0  ;;  %v1069_v2 = vmul.f32 %v3717_v17, %v1068_v43  ;;  %v1143_v31 = vsub.f32 1.0, %v1142_v32  ;;  %v1150_v58 = vand.u32 2147483647, %v5937_v51  ;;  %vm1073_vm9 = vmor %vm1071_vm1, %vm1072_vm8 }
 0x22f   : > { %v1932_v30 = vmul.f32 1.3333334, %v1836_v5  ;;  %v1094_v19 = vsel %vm5968_vm15, %v1093_v47, %v1089_v46  ;;  %v1152_v23 = vand.u32 2147483648, %v5937_v51  ;;  %v1933_v10 = vmul.f32 1.3333334, %v1837_v25 }
 0x230   : > { %v1450_v62 = vmul.f32 %v3822_v59, %v1094_v19  ;;  %v1451_v3 = vmul.f32 %v3823_v50, %v1094_v19  ;;  %v1070_v42 = vadd.f32 %v3717_v17, %v1069_v2  ;;  %v1144_v38 = vmul.f32 %v5978_v7, %v1143_v31 }
 0x231   : > { %v2124_v14 = vand.u32 2139095040, %v1932_v30  ;;  %vm1147_vm10 = vweird.f32 %v5978_v7  ;;  %v6011_v22 = vmin.f32 %v610_v21, 10000.0  ;;  %v2125_v47 = vand.u32 2139095040, %v1933_v10 }
 0x232   : > { %v1546_v36 = vand.u32 2147483647, %v1450_v62  ;;  %v1547_v0 = vand.u32 2147483647, %v1451_v3  ;;  %v1074_v43 = vsel %vm1073_vm9, %v3717_v17, %v1070_v42  ;;  %v1145_v5 = vadd.f32 %v5978_v7, %v1144_v38  ;;  %v3824_v42 = vld [vmem:[%s4134_s25 + $0x1a0] sm:$0xff]  ;;  %v3825_v17 = vld [vmem:[%s4134_s25 + $0x1a8] sm:$0xff]  ;;  %vm1148_vm12 = vmor %vm1146_vm3, %vm1147_vm10 }
 0x233   : > { %v2316_v32 = vmax.f32 %v2124_v14, 1.0  ;;  %v1079_v50 = vsel %vm5981_vm2, %v1078_v24, %v1074_v43  ;;  %3720 = vrcp.f32 %v6011_v22  ;;  %v2317_v25 = vmax.f32 %v2125_v47, 1.0 }
 0x234   : > { %v1738_v46 = vmax.f32 %v1546_v36, 0.0001  ;;  %vm6017_vm11 = vcmp.eq.f32.partialorder %v1150_v58, 8.507059e+37  ;;  %v1153_v21 = vor.u32 1.1754944e-38, %v1152_v23  ;;  %v1739_v3 = vmax.f32 %v1547_v0, 0.0001 }
 0x235   : > { %v2412_v31 = vsel %vm5989_vm4, 0.0, %v2316_v32  ;;  %v1448_v14 = vmul.f32 %v3824_v42, %v1079_v50  ;;  %v1449_v41 = vmul.f32 %v3825_v17, %v1079_v50  ;;  %v2413_v24 = vsel %vm5993_vm6, 0.0, %v2317_v25 }
 0x236   : > { %v2508_v30 = vmin.f32 %v2412_v31, 64.0  ;;  %v1834_v19 = vmin.f32 %v1738_v46, 10000.0  ;;  %v1149_v58 = vsel %vm1148_vm12, %v5978_v7, %v1145_v5  ;;  %v2509_v23 = vmin.f32 %v2413_v24, 64.0 }
 0x237   : > { %v1835_v33 = vmin.f32 %v1739_v3, 10000.0  ;;  %v1544_v10 = vand.u32 2147483647, %v1448_v14  ;;  %v1545_v59 = vand.u32 2147483647, %v1449_v41  ;;  %v6034_v47 = vadd.f32 %v3354_v4, %v5952_v57  ;;  %v3827_v14 = vld [vmem:[%s4134_s25 + $0x1f8] sm:$0xff] }
 0x238   : > { %v2604_v62 = vmul.f32 %v2508_v30, %v5868_v56  ;;  %v1930_v38 = vmul.f32 1.3333334, %v1834_v19  ;;  %v1154_v18 = vsel %vm6017_vm11, %v1153_v21, %v1149_v58  ;;  %v2605_v7 = vmul.f32 %v2509_v23, %v5868_v56 }
 0x239   : > { %v6038_v43 = vpop.eup %3720  ;;  %vm6041_vm13 = vcmp.lt.f32.partialorder %v1546_v36, 0.5  ;;  %vm6045_vm14 = vcmp.lt.f32.partialorder %v1547_v0, 0.5  ;;  %v1931_v5 = vmul.f32 1.3333334, %v1835_v33  ;;  %v7160_v57 = vand.u32 2147483648, %v6906_v54  ;;  %v3826_v36 = vld [vmem:[%s4134_s25 + $0x1f0] sm:$0xff] }
 0x23a   : > { %v2122_v25 = vand.u32 2139095040, %v1930_v38  ;;  %v1736_v46 = vmax.f32 %v1544_v10, 0.0001  ;;  %v1737_v2 = vmax.f32 %v1545_v59, 0.0001  ;;  %v7161_v21 = vand.u32 2147483648, %v6907_v6 }
 0x23b   : > { %v2988_v4 = vor.u32 %v7160_v57, %v2604_v62  ;;  %v2123_v3 = vand.u32 2139095040, %v1931_v5  ;;  %v1458_v42 = vmul.f32 %v3826_v36, %v1154_v18  ;;  %v1459_v17 = vmul.f32 %v3827_v14, %v1154_v18 }
 0x23c   : > { %v2989_v31 = vor.u32 %v7161_v21, %v2605_v7  ;;  %v2314_v0 = vmax.f32 %v2122_v25, 1.0  ;;  %v1832_v41 = vmin.f32 %v1736_v46, 10000.0  ;;  %v1833_v24 = vmin.f32 %v1737_v2, 10000.0 }
 0x23d   : > { %3180 = vst [vmem:[%s4653_s19 + $0x1c0] sm:$0xff] %v2988_v4  ;;  %v1127_v54 = vmul.f32 %v6038_v43, %v6011_v22  ;;  %v2315_v30 = vmax.f32 %v2123_v3, 1.0  ;;  %v1554_v19 = vand.u32 2147483647, %v1458_v42  ;;  %v1555_v58 = vand.u32 2147483647, %v1459_v17 }
 0x23e   : > { %3181 = vst [vmem:[%s4653_s19 + $0x1c8] sm:$0xff] %v2989_v31  ;;  %vm1131_vm15 = vweird.f32 %v6011_v22  ;;  %v2410_v6 = vsel %vm6041_vm13, 0.0, %v2314_v0  ;;  %v1928_v23 = vmul.f32 1.3333334, %v1832_v41  ;;  %v1929_v33 = vmul.f32 1.3333334, %v1833_v24  ;;  %v477_v0 = vpop.xlane.xlu0 %476 }
 0x23f   : > { %v1128_v62 = vsub.f32 1.0, %v1127_v54  ;;  %v2411_v38 = vsel %vm6045_vm14, 0.0, %v2315_v30  ;;  %v2506_v18 = vmin.f32 %v2410_v6, 64.0  ;;  %vm6064_vm0 = vcmp.lt.f32.partialorder %v1544_v10, 0.5  ;;  %v504_v6 = vpop.xlane.xlu2 %503 }
 0x240   : > { %vm6068_vm1 = vcmp.lt.f32.partialorder %v1545_v59, 0.5  ;;  %v2507_v57 = vmin.f32 %v2411_v38, 64.0  ;;  %v2120_v4 = vand.u32 2139095040, %v1928_v23  ;;  %v2121_v25 = vand.u32 2139095040, %v1929_v33 }
 0x241   : > { %v1746_v32 = vmax.f32 %v1554_v19, 0.0001  ;;  %v2602_v46 = vmul.f32 %v2506_v18, %v5920_v63  ;;  %v1747_v2 = vmax.f32 %v1555_v58, 0.0001  ;;  %v1129_v21 = vmul.f32 %v6038_v43, %v1128_v62 }
 0x242   : > { %vm1132_vm2 = vweird.f32 %v6038_v43  ;;  %v2603_v10 = vmul.f32 %v2507_v57, %v5920_v63  ;;  %v2312_v50 = vmax.f32 %v2120_v4, 1.0  ;;  %v2313_v31 = vmax.f32 %v2121_v25, 1.0 }
 0x243   : > { %v1842_v59 = vmin.f32 %v1746_v32, 10000.0  ;;  %v7166_v3 = vand.u32 2147483648, %v4898_v29  ;;  %v1843_v42 = vmin.f32 %v1747_v2, 10000.0  ;;  %v1130_v14 = vadd.f32 %v6038_v43, %v1129_v21  ;;  %vm6095_vm4 = vmor %vm1131_vm15, %vm1132_vm2 }
 0x244   : > { %v1135_v17 = vand.u32 2147483647, %v6011_v22  ;;  %v7167_v41 = vand.u32 2147483648, %v4925_v26  ;;  %v2408_v54 = vsel %vm6064_vm0, 0.0, %v2312_v50  ;;  %v2409_v63 = vsel %vm6068_vm1, 0.0, %v2313_v31 }
 0x245   : > { %v2986_v36 = vor.u32 %v7166_v3, %v2602_v46  ;;  %v1938_v30 = vmul.f32 1.3333334, %v1842_v59  ;;  %v2504_v29 = vmin.f32 %v2408_v54, 64.0  ;;  %v2505_v23 = vmin.f32 %v2409_v63, 64.0  ;;  %v501_v59 = vpop.xlane.xlu1 %500 }
 0x246   : > { %v2987_v24 = vor.u32 %v7167_v41, %v2603_v10  ;;  %vm6087_vm3 = vcmp.lt.f32.partialorder %v1554_v19, 0.5  ;;  %v1939_v62 = vmul.f32 1.3333334, %v1843_v42  ;;  %v1134_v18 = vsel %vm6095_vm4, %v6038_v43, %v1130_v14  ;;  %v3829_v41 = vld [vmem:[%s4134_s25 + $0x1e8] sm:$0xff] }
 0x247   : > { %3178 = vst [vmem:[%s4653_s19 + $0x1b0] sm:$0xff] %v2986_v36  ;;  %v2130_v38 = vand.u32 2139095040, %v1938_v30  ;;  %v1137_v19 = vand.u32 2147483648, %v6011_v22  ;;  %v561_v7 = vmul.f32 0.0078125, %v477_v0  ;;  %v2600_v5 = vmul.f32 %v2504_v29, %v5935_v8  ;;  %v3828_v0 = vld [vmem:[%s4134_s25 + $0x1e0] sm:$0xff]  ;;  %v6128_v30 = vld [vmem:[%s4134_s25 + $0x270] sm:$0xff] }
 0x248   : > { %3179 = vst [vmem:[%s4653_s19 + $0x1b8] sm:$0xff] %v2987_v24  ;;  %v2601_v57 = vmul.f32 %v2505_v23, %v5935_v8  ;;  %v2131_v4 = vand.u32 2139095040, %v1939_v62  ;;  %v570_v25 = vmul.f32 0.0078125, %v504_v6  ;;  %vm6106_vm6 = vcmp.lt.f32.partialorder %v1555_v58, 0.5 }
 0x249   : > { %v2322_v46 = vmax.f32 %v2130_v38, 1.0  ;;  %v1138_v2 = vor.u32 1.1754944e-38, %v1137_v19  ;;  %v609_v21 = vmax.f32 %v561_v7, 1e-05  ;;  %v7174_v43 = vand.u32 2147483648, %v4929_v13 }
 0x24a   : > { %v7175_v50 = vand.u32 2147483648, %v4938_v52  ;;  %v2323_v8 = vmax.f32 %v2131_v4, 1.0  ;;  %vm1136_vm7 = vcmp.eq.f32.partialorder %v1135_v17, 8.507059e+37  ;;  %v618_v42 = vmax.f32 %v570_v25, 1e-05 }
 0x24b   : > { %v2984_v10 = vor.u32 %v7174_v43, %v2600_v5  ;;  %v2418_v58 = vsel %vm6087_vm3, 0.0, %v2322_v46  ;;  %v1139_v3 = vsel %vm1136_vm7, %v1138_v2, %v1134_v18  ;;  %v6116_v36 = vmin.f32 %v609_v21, 10000.0  ;;  %v6146_v2 = vld [vmem:[%s4134_s25 + $0x278] sm:$0xff] }
 0x24c   : > { %v2985_v31 = vor.u32 %v7175_v50, %v2601_v57  ;;  %v2419_v13 = vsel %vm6106_vm6, 0.0, %v2323_v8  ;;  %v2514_v14 = vmin.f32 %v2418_v58, 64.0  ;;  %v1456_v52 = vmul.f32 %v3828_v0, %v1139_v3  ;;  %v513_v8 = vpop.xlane.xlu2 %512 }
 0x24d   : > { %3176 = vst [vmem:[%s4653_s19 + $0x1a0] sm:$0xff] %v2984_v10  ;;  %v1457_v24 = vmul.f32 %v3829_v41, %v1139_v3  ;;  %v3341_v17 = vmul.f32 %v5045_v11, %v5868_v56  ;;  %v2515_v54 = vmin.f32 %v2419_v13, 64.0  ;;  %3722 = vrcp.f32 %v6116_v36 }
 0x24e   : > { %3177 = vst [vmem:[%s4653_s19 + $0x1a8] sm:$0xff] %v2985_v31  ;;  %v569_v63 = vmul.f32 0.0078125, %v501_v59  ;;  %v2818_v6 = vand.u32 2147483648, %v6128_v30  ;;  %v2610_v29 = vmul.f32 %v2514_v14, %v5937_v51  ;;  %v1552_v23 = vand.u32 2147483647, %v1456_v52  ;;  %v498_v52 = vpop.xlane.xlu0 %497 }
 0x24f   : > { %v1553_v33 = vand.u32 2147483647, %v1457_v24  ;;  %v2611_v62 = vmul.f32 %v2515_v54, %v5937_v51  ;;  %v3356_v26 = vadd.f32 %v6034_v47, %v3341_v17  ;;  %v3342_v56 = vmul.f32 %v5162_v1, %v6116_v36 }
 0x250   : > { %v6136_v38 = vmin.f32 %v618_v42, 10000.0  ;;  %v7176_v18 = vand.u32 2147483648, %v5185_v20  ;;  %v1744_v7 = vmax.f32 %v1552_v23, 0.0001  ;;  %v3343_v5 = vmul.f32 %v5014_v15, %v6011_v22 }
 0x251   : > { %v1120_v57 = vand.u32 2147483647, %v6116_v36  ;;  %v7177_v4 = vand.u32 2147483648, %v5194_v16  ;;  %v1745_v32 = vmax.f32 %v1553_v33, 0.0001  ;;  %v3357_v47 = vadd.f32 %v3356_v26, %v3342_v56 }
 0x252   : > { %v2994_v19 = vor.u32 %v7176_v18, %v2610_v29  ;;  %v617_v46 = vmax.f32 %v569_v63, 1e-05  ;;  %v2819_v21 = vand.u32 2147483648, %v6146_v2  ;;  %v1840_v20 = vmin.f32 %v1744_v7, 10000.0 }
 0x253   : > { %v2995_v25 = vor.u32 %v7177_v4, %v2611_v62  ;;  %v1122_v43 = vand.u32 2147483648, %v6116_v36  ;;  %3724 = vrcp.f32 %v6136_v38  ;;  %v3723_v10 = vpop.eup %3722  ;;  %v3344_v50 = vmul.f32 %v5245_v60, %v5937_v51 }
 0x254   : > { %3186 = vst [vmem:[%s4653_s19 + $0x1f0] sm:$0xff] %v2994_v19  ;;  %v1841_v16 = vmin.f32 %v1745_v32, 10000.0  ;;  %vm1116_vm8 = vweird.f32 %v6116_v36  ;;  %v3358_v31 = vadd.f32 %v3357_v47, %v3343_v5  ;;  %vm6156_vm9 = vcmp.lt.f32.partialorder %v1552_v23, 0.5 }
 0x255   : > { %3187 = vst [vmem:[%s4653_s19 + $0x1f8] sm:$0xff] %v2995_v25  ;;  %v1936_v59 = vmul.f32 1.3333334, %v1840_v20  ;;  %v1112_v58 = vmul.f32 %v3723_v10, %v6116_v36  ;;  %vm6161_vm10 = vcmp.eq.f32.partialorder %v1120_v57, 8.507059e+37  ;;  %v1255_v42 = vand.u32 2147483647, %v6136_v38 }
 0x256   : > { %v1937_v13 = vmul.f32 1.3333334, %v1841_v16  ;;  %v3359_v14 = vadd.f32 %v3358_v31, %v3344_v50  ;;  %v1257_v51 = vand.u32 2147483648, %v6136_v38  ;;  %v6167_v0 = vmin.f32 %v617_v46, 10000.0 }
 0x257   : > { %vm6169_vm11 = vcmp.lt.f32.partialorder %v1553_v33, 0.5  ;;  %v2128_v24 = vand.u32 2139095040, %v1936_v59  ;;  %v1113_v17 = vsub.f32 1.0, %v1112_v58  ;;  %v1123_v54 = vor.u32 1.1754944e-38, %v1122_v43 }
 0x258   : > { %v2129_v63 = vand.u32 2139095040, %v1937_v13  ;;  %v3360_v29 = vrot.slane %v3359_v14, 4  ;;  %vm1251_vm12 = vweird.f32 %v6136_v38  ;;  %3726 = vrcp.f32 %v6167_v0 }
 0x259   : > { %v3725_v23 = vpop.eup %3724  ;;  %v2320_v62 = vmax.f32 %v2128_v24, 1.0  ;;  %v1114_v26 = vmul.f32 %v3723_v10, %v1113_v17  ;;  %vm1117_vm13 = vweird.f32 %v3723_v10  ;;  %v568_v56 = vmul.f32 0.0078125, %v498_v52  ;;  %v3832_v52 = vld [vmem:[%s4134_s25 + $0x1d0] sm:$0xff]  ;;  %v3833_v24 = vld [vmem:[%s4134_s25 + $0x1d8] sm:$0xff] }
 0x25a   : > { %v2321_v18 = vmax.f32 %v2129_v63, 1.0  ;;  %v3361_v19 = vadd.f32 %v3360_v29, %v3359_v14  ;;  %v1247_v33 = vmul.f32 %v3725_v23, %v6136_v38  ;;  %vm6176_vm14 = vcmp.eq.f32.partialorder %v1255_v42, 8.507059e+37  ;;  %vm1118_vm15 = vmor %vm1116_vm8, %vm1117_vm13 }
 0x25b   : > { %v1258_v5 = vor.u32 1.1754944e-38, %v1257_v51  ;;  %v2416_v57 = vsel %vm6156_vm9, 0.0, %v2320_v62  ;;  %v1115_v4 = vadd.f32 %v3723_v10, %v1114_v26  ;;  %v1240_v25 = vand.u32 2147483647, %v6167_v0 }
 0x25c   : > { %v1242_v32 = vand.u32 2147483648, %v6167_v0  ;;  %v2417_v47 = vsel %vm6169_vm11, 0.0, %v2321_v18  ;;  %v2512_v46 = vmin.f32 %v2416_v57, 64.0  ;;  %v3362_v20 = vrot.slane %v3361_v19, 2 }
 0x25d   : > { %v1248_v43 = vsub.f32 1.0, %v1247_v33  ;;  %v2513_v50 = vmin.f32 %v2417_v47, 64.0  ;;  %v1119_v16 = vsel %vm1118_vm15, %v3723_v10, %v1115_v4  ;;  %vm1252_vm0 = vweird.f32 %v3725_v23 }
 0x25e   : > { %v616_v31 = vmax.f32 %v568_v56, 1e-05  ;;  %v3727_v59 = vpop.eup %3726  ;;  %v2608_v58 = vmul.f32 %v2512_v46, %v6011_v22  ;;  %v1124_v42 = vsel %vm6161_vm10, %v1123_v54, %v1119_v16  ;;  %v3363_v13 = vadd.f32 %v3362_v20, %v3361_v19  ;;  %vm1253_vm1 = vmor %vm1251_vm12, %vm1252_vm0 }
 0x25f   : > { %v1249_v14 = vmul.f32 %v3725_v23, %v1248_v43  ;;  %v2609_v51 = vmul.f32 %v2513_v50, %v6011_v22  ;;  %v1454_v41 = vmul.f32 %v3832_v52, %v1124_v42  ;;  %v1455_v17 = vmul.f32 %v3833_v24, %v1124_v42  ;;  %v3834_v43 = vld [vmem:[%s4134_s25 + $0x260] sm:$0xff]  ;;  %v3835_v50 = vld [vmem:[%s4134_s25 + $0x268] sm:$0xff] }
 0x260   : > { %v1232_v10 = vmul.f32 %v3727_v59, %v6167_v0  ;;  %v7186_v63 = vand.u32 2147483648, %v5417_v49  ;;  %v3364_v62 = vrot.slane %v3363_v13, 1  ;;  %v6197_v56 = vmul.f32 0.0078125, %v513_v8 }
 0x261   : > { %v1250_v26 = vadd.f32 %v3725_v23, %v1249_v14  ;;  %v7187_v3 = vand.u32 2147483648, %v5434_v48  ;;  %v1550_v18 = vand.u32 2147483647, %v1454_v41  ;;  %v1551_v22 = vand.u32 2147483647, %v1455_v17 }
 0x262   : > { %v2992_v29 = vor.u32 %v7186_v63, %v2608_v58  ;;  %v1233_v19 = vsub.f32 1.0, %v1232_v10  ;;  %v3365_v49 = vadd.f32 %v3364_v62, %v3363_v13  ;;  %vm1236_vm2 = vweird.f32 %v6167_v0 }
 0x263   : > { %v2993_v54 = vor.u32 %v7187_v3, %v2609_v51  ;;  %v1254_v33 = vsel %vm1253_vm1, %v3725_v23, %v1250_v26  ;;  %v6206_v57 = vmin.f32 %v616_v31, 10000.0  ;;  %v1742_v48 = vmax.f32 %v1550_v18, 0.0001 }
 0x264   : > { %3184 = vst [vmem:[%s4653_s19 + $0x1e0] sm:$0xff] %v2992_v29  ;;  %v1259_v4 = vsel %vm6176_vm14, %v1258_v5, %v1254_v33  ;;  %vm6211_vm3 = vcmp.eq.f32.partialorder %v1240_v25, 8.507059e+37  ;;  %v1243_v46 = vor.u32 1.1754944e-38, %v1242_v32  ;;  %v1743_v20 = vmax.f32 %v1551_v22, 0.0001 }
 0x265   : > { %3185 = vst [vmem:[%s4653_s19 + $0x1e8] sm:$0xff] %v2993_v54  ;;  %v1472_v23 = vmul.f32 %v3834_v43, %v1259_v4  ;;  %v1473_v16 = vmul.f32 %v3835_v50, %v1259_v4  ;;  %v1234_v31 = vmul.f32 %v3727_v59, %v1233_v19  ;;  %v1838_v8 = vmin.f32 %v1742_v48, 10000.0  ;;  %v3836_v19 = vld [vmem:[%s4134_s25 + $0x250] sm:$0xff] }
 0x266   : > { %3366 = vst.msk [vmem:[%s5339_s5 + $0x1] sm:$0x1] %vm5290_vm5, %v3365_v49  ;;  %vm1237_vm4 = vweird.f32 %v3727_v59  ;;  %3728 = vrcp.f32 %v6206_v57  ;;  %v621_v7 = vmax.f32 %v6197_v56, 1e-05  ;;  %v1839_v5 = vmin.f32 %v1743_v20, 10000.0  ;;  %v3837_v49 = vld [vmem:[%s4134_s25 + $0x258] sm:$0xff] }
 0x267   : > { %v1568_v25 = vand.u32 2147483647, %v1472_v23  ;;  %v1569_v58 = vand.u32 2147483647, %v1473_v16  ;;  %v1235_v42 = vadd.f32 %v3727_v59, %v1234_v31  ;;  %vm6222_vm6 = vcmp.lt.f32.partialorder %v1550_v18, 0.5  ;;  %vm1238_vm8 = vmor %vm1236_vm2, %vm1237_vm4 }
 0x268   : > { %vm6226_vm7 = vcmp.lt.f32.partialorder %v1551_v22, 0.5  ;;  %v1934_v14 = vmul.f32 1.3333334, %v1838_v8  ;;  %v3371_v51 = vmul.f32 %v4510_v55, %v6206_v57  ;;  %v1935_v52 = vmul.f32 1.3333334, %v1839_v5 }
 0x269   : > { %v1760_v41 = vmax.f32 %v1568_v25, 0.0001  ;;  %v3372_v24 = vmul.f32 %v4520_v40, %v6167_v0  ;;  %v1225_v17 = vand.u32 2147483647, %v6206_v57  ;;  %v1761_v63 = vmax.f32 %v1569_v58, 0.0001 }
 0x26a   : > { %v2126_v10 = vand.u32 2139095040, %v1934_v14  ;;  %v1239_v29 = vsel %vm1238_vm8, %v3727_v59, %v1235_v42  ;;  %v1227_v62 = vand.u32 2147483648, %v6206_v57  ;;  %v2127_v26 = vand.u32 2139095040, %v1935_v52  ;;  %v510_v59 = vpop.xlane.xlu1 %509 }
 0x26b   : > { %v1856_v56 = vmin.f32 %v1760_v41, 10000.0  ;;  %v1244_v55 = vsel %vm6211_vm3, %v1243_v46, %v1239_v29  ;;  %v3386_v3 = vadd.f32 %v5923_v61, %v3371_v51  ;;  %v1857_v22 = vmin.f32 %v1761_v63, 10000.0 }
 0x26c   : > { %v6241_v54 = vpop.eup %3728  ;;  %v2318_v18 = vmax.f32 %v2126_v10, 1.0  ;;  %v1470_v40 = vmul.f32 %v3836_v19, %v1244_v55  ;;  %v1471_v33 = vmul.f32 %v3837_v49, %v1244_v55  ;;  %v2319_v48 = vmax.f32 %v2127_v26, 1.0 }
 0x26d   : > { %vm6245_vm9 = vcmp.lt.f32.partialorder %v1568_v25, 0.5  ;;  %v1952_v4 = vmul.f32 1.3333334, %v1856_v56  ;;  %v1217_v47 = vmul.f32 %v6241_v54, %v6206_v57  ;;  %v1953_v46 = vmul.f32 1.3333334, %v1857_v22 }
 0x26e   : > { %v2414_v61 = vsel %vm6222_vm6, 0.0, %v2318_v18  ;;  %v1566_v20 = vand.u32 2147483647, %v1470_v40  ;;  %v3387_v43 = vadd.f32 %v3386_v3, %v3372_v24  ;;  %v2415_v23 = vsel %vm6226_vm7, 0.0, %v2319_v48 }
 0x26f   : > { %v2510_v50 = vmin.f32 %v2414_v61, 64.0  ;;  %v2144_v16 = vand.u32 2139095040, %v1952_v4  ;;  %v1567_v31 = vand.u32 2147483647, %v1471_v33  ;;  %v2511_v8 = vmin.f32 %v2415_v23, 64.0 }
 0x270   : > { %vm6255_vm10 = vcmp.lt.f32.partialorder %v1569_v58, 0.5  ;;  %v2145_v25 = vand.u32 2139095040, %v1953_v46  ;;  %v1758_v42 = vmax.f32 %v1566_v20, 0.0001  ;;  %vm1222_vm11 = vweird.f32 %v6241_v54 }
 0x271   : > { %v2606_v14 = vmul.f32 %v2510_v50, %v6116_v36  ;;  %v2336_v32 = vmax.f32 %v2144_v16, 1.0  ;;  %v1759_v51 = vmax.f32 %v1567_v31, 0.0001  ;;  %v2607_v13 = vmul.f32 %v2511_v8, %v6116_v36 }
 0x272   : > { %v2337_v52 = vmax.f32 %v2145_v25, 1.0  ;;  %v1854_v41 = vmin.f32 %v1758_v42, 10000.0  ;;  %v1218_v24 = vsub.f32 1.0, %v1217_v47  ;;  %v7198_v58 = vand.u32 2147483648, %v5438_v28 }
 0x273   : > { %v2432_v63 = vsel %vm6245_vm9, 0.0, %v2336_v32  ;;  %v1855_v29 = vmin.f32 %v1759_v51, 10000.0  ;;  %v6266_v26 = vmin.f32 %v621_v7, 10000.0  ;;  %v7199_v56 = vand.u32 2147483648, %v5443_v27 }
 0x274   : > { %v2990_v10 = vor.u32 %v7198_v58, %v2606_v14  ;;  %v2433_v3 = vsel %vm6255_vm10, 0.0, %v2337_v52  ;;  %v2528_v36 = vmin.f32 %v2432_v63, 64.0  ;;  %v1950_v18 = vmul.f32 1.3333334, %v1854_v41  ;;  %v3838_v14 = vld [vmem:[%s4134_s25 + $0x240] sm:$0xff] }
 0x275   : > { %v2991_v55 = vor.u32 %v7199_v56, %v2607_v13  ;;  %v2529_v22 = vmin.f32 %v2433_v3, 64.0  ;;  %v1951_v19 = vmul.f32 1.3333334, %v1855_v29  ;;  %v1219_v28 = vmul.f32 %v6241_v54, %v1218_v24 }
 0x276   : > { %3182 = vst [vmem:[%s4653_s19 + $0x1d0] sm:$0xff] %v2990_v10  ;;  %3730 = vrcp.f32 %v6266_v26  ;;  %v2624_v40 = vmul.f32 %v2528_v36, %v6136_v38  ;;  %v3373_v7 = vmul.f32 %v4769_v44, %v6136_v38  ;;  %v2142_v27 = vand.u32 2139095040, %v1950_v18  ;;  %v6315_v36 = vld [vmem:[%s4134_s25 + $0x2c0] sm:$0xff] }
 0x277   : > { %3183 = vst [vmem:[%s4653_s19 + $0x1d8] sm:$0xff] %v2991_v55  ;;  %vm1221_vm12 = vweird.f32 %v6206_v57  ;;  %v2625_v49 = vmul.f32 %v2529_v22, %v6136_v38  ;;  %v2143_v33 = vand.u32 2139095040, %v1951_v19  ;;  %v1220_v48 = vadd.f32 %v6241_v54, %v1219_v28  ;;  %v7203_v38 = vld [vmem:[#allocation11_spill] sm:$0xff]  ;;  %v7207_v22 = vld [vmem:[#allocation12_spill] sm:$0xff] }
 0x278   : > { %vm1226_vm13 = vcmp.eq.f32.partialorder %v1225_v17, 8.507059e+37  ;;  %v7200_v4 = vand.u32 2147483648, %v5449_v12  ;;  %vm6284_vm14 = vcmp.lt.f32.partialorder %v1566_v20, 0.5  ;;  %v2334_v44 = vmax.f32 %v2142_v27, 1.0  ;;  %vm1223_vm15 = vmor %vm1221_vm12, %vm1222_vm11 }
 0x279   : > { %v1228_v46 = vor.u32 1.1754944e-38, %v1227_v62  ;;  %v7204_v23 = vand.u32 2147483648, %v7203_v38  ;;  %vm6292_vm0 = vcmp.lt.f32.partialorder %v1567_v31, 0.5  ;;  %v2335_v12 = vmax.f32 %v2143_v33, 1.0 }
 0x27a   : > { %v3008_v47 = vor.u32 %v7200_v4, %v2624_v40  ;;  %v1224_v16 = vsel %vm1223_vm15, %v6241_v54, %v1220_v48  ;;  %v2430_v20 = vsel %vm6284_vm14, 0.0, %v2334_v44  ;;  %v572_v5 = vmul.f32 0.0078125, %v510_v59  ;;  %v507_v54 = vpop.xlane.xlu0 %506 }
 0x27b   : > { %v3009_v50 = vor.u32 %v7204_v23, %v2625_v49  ;;  %v1229_v8 = vsel %vm1226_vm13, %v1228_v46, %v1224_v16  ;;  %v6300_v25 = vadd.f32 %v3387_v43, %v3373_v7  ;;  %v2431_v62 = vsel %vm6292_vm0, 0.0, %v2335_v12  ;;  %v7209_v7 = vld [vmem:[#allocation13_spill] sm:$0xff] }
 0x27c   : > { %3200 = vst [vmem:[%s4653_s19 + $0x260] sm:$0xff] %v3008_v47  ;;  %v3731_v42 = vpop.eup %3730  ;;  %v2526_v31 = vmin.f32 %v2430_v20, 64.0  ;;  %v1468_v32 = vmul.f32 %v3838_v14, %v1229_v8  ;;  %v1469_v51 = vmul.f32 %v5882_v39, %v1229_v8  ;;  %v2527_v13 = vmin.f32 %v2431_v62, 64.0 }
 0x27d   : > { %3201 = vst [vmem:[%s4653_s19 + $0x268] sm:$0xff] %v3009_v50  ;;  %v1292_v52 = vmul.f32 %v3731_v42, %v6266_v26  ;;  %v1300_v41 = vand.u32 2147483647, %v6266_v26  ;;  %v620_v24 = vmax.f32 %v572_v5, 1e-05  ;;  %v1302_v63 = vand.u32 2147483648, %v6266_v26 }
 0x27e   : > { %v2622_v43 = vmul.f32 %v2526_v31, %v6167_v0  ;;  %v1564_v58 = vand.u32 2147483647, %v1468_v32  ;;  %v1565_v10 = vand.u32 2147483647, %v1469_v51  ;;  %v2623_v29 = vmul.f32 %v2527_v13, %v6167_v0  ;;  %v522_v0 = vpop.xlane.xlu2 %521 }
 0x27f   : > { %v1293_v56 = vsub.f32 1.0, %v1292_v52  ;;  %v6312_v55 = vmin.f32 %v620_v24, 10000.0  ;;  %v571_v3 = vmul.f32 0.0078125, %v507_v54  ;;  %v2828_v18 = vand.u32 2147483648, %v6315_v36  ;;  %v7217_v52 = vld [vmem:[#allocation52_spill] sm:$0xff] }
 0x280   : > { %v7208_v19 = vand.u32 2147483648, %v7207_v22  ;;  %v1756_v40 = vmax.f32 %v1564_v58, 0.0001  ;;  %vm1297_vm1 = vweird.f32 %v3731_v42  ;;  %v7210_v27 = vand.u32 2147483648, %v7209_v7 }
 0x281   : > { %v1757_v33 = vmax.f32 %v1565_v10, 0.0001  ;;  %v1294_v48 = vmul.f32 %v3731_v42, %v1293_v56  ;;  %3732 = vrcp.f32 %v6312_v55  ;;  %vm1296_vm2 = vweird.f32 %v6266_v26 }
 0x282   : > { %v3006_v28 = vor.u32 %v7208_v19, %v2622_v43  ;;  %v3007_v49 = vor.u32 %v7210_v27, %v2623_v29  ;;  %v1852_v59 = vmin.f32 %v1756_v40, 10000.0  ;;  %vm6325_vm3 = vcmp.eq.f32.partialorder %v1300_v41, 8.507059e+37  ;;  %vm1298_vm7 = vmor %vm1296_vm2, %vm1297_vm1  ;;  %v519_v43 = vpop.xlane.xlu1 %518 }
 0x283   : > { %v6331_v47 = vmul.f32 %v4954_v53, %v6266_v26  ;;  %v1853_v61 = vmin.f32 %v1757_v33, 10000.0  ;;  %v1295_v44 = vadd.f32 %v3731_v42, %v1294_v48  ;;  %v1303_v46 = vor.u32 1.1754944e-38, %v1302_v63 }
 0x284   : > { %3198 = vst [vmem:[%s4653_s19 + $0x250] sm:$0xff] %v3006_v28  ;;  %v619_v38 = vmax.f32 %v571_v3, 1e-05  ;;  %vm6334_vm4 = vcmp.lt.f32.partialorder %v1564_v58, 0.5  ;;  %vm6338_vm6 = vcmp.lt.f32.partialorder %v1565_v10, 0.5  ;;  %v576_v12 = vmul.f32 0.0078125, %v522_v0  ;;  %v516_v28 = vpop.xlane.xlu0 %515 }
 0x285   : > { %3199 = vst [vmem:[%s4653_s19 + $0x258] sm:$0xff] %v3007_v49  ;;  %v1948_v17 = vmul.f32 1.3333334, %v1852_v59  ;;  %v1949_v16 = vmul.f32 1.3333334, %v1853_v61  ;;  %v1299_v53 = vsel %vm1298_vm7, %v3731_v42, %v1295_v44  ;;  %vm1281_vm8 = vweird.f32 %v6312_v55 }
 0x286   : > { %v1285_v20 = vand.u32 2147483647, %v6312_v55  ;;  %v6344_v8 = vmin.f32 %v619_v38, 10000.0  ;;  %v1304_v62 = vsel %vm6325_vm3, %v1303_v46, %v1299_v53  ;;  %v1287_v31 = vand.u32 2147483648, %v6312_v55 }
 0x287   : > { %v2140_v5 = vand.u32 2139095040, %v1948_v17  ;;  %v3733_v14 = vpop.eup %3732  ;;  %v2141_v32 = vand.u32 2139095040, %v1949_v16  ;;  %v1478_v51 = vmul.f32 %v5887_v9, %v1304_v62  ;;  %v1479_v54 = vmul.f32 %v5891_v37, %v1304_v62  ;;  %v7220_v17 = vld [vmem:[#allocation14_spill] sm:$0xff] }
 0x288   : > { %3734 = vrcp.f32 %v6344_v8  ;;  %v1277_v13 = vmul.f32 %v3733_v14, %v6312_v55  ;;  %v3375_v41 = vmul.f32 %v7217_v52, %v6312_v55  ;;  %v624_v24 = vmax.f32 %v576_v12, 1e-05 }
 0x289   : > { %v2332_v42 = vmax.f32 %v2140_v5, 1.0  ;;  %v2333_v58 = vmax.f32 %v2141_v32, 1.0  ;;  %v1574_v10 = vand.u32 2147483647, %v1478_v51  ;;  %v1575_v63 = vand.u32 2147483647, %v1479_v54 }
 0x28a   : > { %vm6356_vm9 = vcmp.eq.f32.partialorder %v1285_v20, 8.507059e+37  ;;  %v1278_v3 = vsub.f32 1.0, %v1277_v13  ;;  %v1288_v22 = vor.u32 1.1754944e-38, %v1287_v31  ;;  %v3374_v19 = vmul.f32 %v4758_v45, %v6344_v8 }
 0x28b   : > { %v2428_v56 = vsel %vm6334_vm4, 0.0, %v2332_v42  ;;  %v2429_v40 = vsel %vm6338_vm6, 0.0, %v2333_v58  ;;  %vm1282_vm10 = vweird.f32 %v3733_v14  ;;  %v575_v27 = vmul.f32 0.0078125, %v519_v43  ;;  %v3841_v43 = vld [vmem:[%s4134_s25 + $0x288] sm:$0xff] }
 0x28c   : > { %v2524_v7 = vmin.f32 %v2428_v56, 64.0  ;;  %v2525_v49 = vmin.f32 %v2429_v40, 64.0  ;;  %v1766_v33 = vmax.f32 %v1574_v10, 0.0001  ;;  %v1767_v48 = vmax.f32 %v1575_v63, 0.0001  ;;  %vm1283_vm11 = vmor %vm1281_vm8, %vm1282_vm10 }
 0x28d   : > { %v1279_v0 = vmul.f32 %v3733_v14, %v1278_v3  ;;  %v3389_v61 = vadd.f32 %v6300_v25, %v3374_v19  ;;  %v6370_v44 = vmin.f32 %v624_v24, 10000.0  ;;  %v6372_v45 = vmul.f32 0.0078125, %v516_v28 }
 0x28e   : > { %v6366_v59 = vpop.eup %3734  ;;  %v2620_v4 = vmul.f32 %v2524_v7, %v6206_v57  ;;  %v2621_v46 = vmul.f32 %v2525_v49, %v6206_v57  ;;  %v1862_v38 = vmin.f32 %v1766_v33, 10000.0  ;;  %v1863_v23 = vmin.f32 %v1767_v48, 10000.0 }
 0x28f   : > { %v1280_v50 = vadd.f32 %v3733_v14, %v1279_v0  ;;  %v7221_v12 = vand.u32 2147483648, %v7220_v17  ;;  %v1262_v25 = vmul.f32 %v6366_v59, %v6344_v8  ;;  %v1272_v53 = vand.u32 2147483648, %v6344_v8 }
 0x290   : > { %v6383_v20 = vadd.f32 %v3389_v61, %v3375_v41  ;;  %v7222_v57 = vand.u32 2147483648, %v5882_v39  ;;  %v1958_v62 = vmul.f32 1.3333334, %v1862_v38  ;;  %v1959_v31 = vmul.f32 1.3333334, %v1863_v23  ;;  %v3840_v41 = vld [vmem:[%s4134_s25 + $0x280] sm:$0xff] }
 0x291   : > { %v3004_v16 = vor.u32 %v7221_v12, %v2620_v4  ;;  %v1284_v32 = vsel %vm1283_vm11, %v3733_v14, %v1280_v50  ;;  %v1263_v54 = vsub.f32 1.0, %v1262_v25  ;;  %v1270_v42 = vand.u32 2147483647, %v6344_v8 }
 0x292   : > { %v3005_v5 = vor.u32 %v7222_v57, %v2621_v46  ;;  %v1289_v51 = vsel %vm6356_vm9, %v1288_v22, %v1284_v32  ;;  %3736 = vrcp.f32 %v6370_v44  ;;  %v2150_v13 = vand.u32 2139095040, %v1958_v62 }
 0x293   : > { %3196 = vst [vmem:[%s4653_s19 + $0x240] sm:$0xff] %v3004_v16  ;;  %v2151_v52 = vand.u32 2139095040, %v1959_v31  ;;  %v1476_v24 = vmul.f32 %v3840_v41, %v1289_v51  ;;  %v1477_v39 = vmul.f32 %v3841_v43, %v1289_v51  ;;  %vm6395_vm12 = vcmp.lt.f32.partialorder %v1574_v10, 0.5 }
 0x294   : > { %3197 = vst [vmem:[%s4653_s19 + $0x248] sm:$0xff] %v3005_v5  ;;  %v1264_v14 = vmul.f32 %v6366_v59, %v1263_v54  ;;  %vm1266_vm13 = vweird.f32 %v6344_v8  ;;  %vm1267_vm14 = vweird.f32 %v6366_v59  ;;  %v2342_v29 = vmax.f32 %v2150_v13, 1.0 }
 0x295   : > { %v2343_v56 = vmax.f32 %v2151_v52, 1.0  ;;  %v1572_v3 = vand.u32 2147483647, %v1476_v24  ;;  %v1573_v22 = vand.u32 2147483647, %v1477_v39  ;;  %vm1671_vm15 = vcmp.lt.f32.partialorder %v1575_v63, 0.5  ;;  %vm1268_vm1 = vmor %vm1266_vm13, %vm1267_vm14 }
 0x296   : > { %v1265_v19 = vadd.f32 %v6366_v59, %v1264_v14  ;;  %vm6403_vm0 = vcmp.eq.f32.partialorder %v1270_v42, 8.507059e+37  ;;  %v623_v10 = vmax.f32 %v575_v27, 1e-05  ;;  %v2438_v40 = vsel %vm6395_vm12, 0.0, %v2342_v29 }
 0x297   : > { %v2439_v7 = vsel %vm1671_vm15, 0.0, %v2343_v56  ;;  %v1273_v49 = vor.u32 1.1754944e-38, %v1272_v53  ;;  %v1345_v33 = vand.u32 2147483647, %v6370_v44  ;;  %v2534_v0 = vmin.f32 %v2438_v40, 64.0 }
 0x298   : > { %v3737_v48 = vpop.eup %3736  ;;  %v2535_v4 = vmin.f32 %v2439_v7, 64.0  ;;  %v1764_v61 = vmax.f32 %v1572_v3, 0.0001  ;;  %v1765_v46 = vmax.f32 %v1573_v22, 0.0001  ;;  %vm1341_vm2 = vweird.f32 %v6370_v44 }
 0x299   : > { %v1269_v63 = vsel %vm1268_vm1, %v6366_v59, %v1265_v19  ;;  %v1337_v27 = vmul.f32 %v3737_v48, %v6370_v44  ;;  %v1347_v38 = vand.u32 2147483648, %v6370_v44  ;;  %v6418_v23 = vmin.f32 %v623_v10, 10000.0  ;;  %v7236_v59 = vld [vmem:[#allocation15_spill] sm:$0xff] }
 0x29a   : > { %v2630_v50 = vmul.f32 %v2534_v0, %v6266_v26  ;;  %v2631_v17 = vmul.f32 %v2535_v4, %v6266_v26  ;;  %v1860_v12 = vmin.f32 %v1764_v61, 10000.0  ;;  %v1861_v16 = vmin.f32 %v1765_v46, 10000.0 }
 0x29b   : > { %v1274_v25 = vsel %vm6403_vm0, %v1273_v49, %v1269_v63  ;;  %v1338_v53 = vsub.f32 1.0, %v1337_v27  ;;  %vm6424_vm3 = vcmp.eq.f32.partialorder %v1345_v33, 8.507059e+37  ;;  %3738 = vrcp.f32 %v6418_v23 }
 0x29c   : > { %v7229_v57 = vand.u32 2147483648, %v5887_v9  ;;  %v7230_v62 = vand.u32 2147483648, %v5891_v37  ;;  %v1956_v26 = vmul.f32 1.3333334, %v1860_v12  ;;  %v1957_v32 = vmul.f32 1.3333334, %v1861_v16 }
 0x29d   : > { %v1474_v51 = vmul.f32 %v6128_v30, %v1274_v25  ;;  %v1475_v54 = vmul.f32 %v6146_v2, %v1274_v25  ;;  %v1339_v42 = vmul.f32 %v3737_v48, %v1338_v53  ;;  %v1348_v13 = vor.u32 1.1754944e-38, %v1347_v38 }
 0x29e   : > { %v3014_v5 = vor.u32 %v7229_v57, %v2630_v50  ;;  %v3015_v31 = vor.u32 %v7230_v62, %v2631_v17  ;;  %vm6436_vm4 = vcmp.lt.f32.partialorder %v1572_v3, 0.5  ;;  %v2148_v41 = vand.u32 2139095040, %v1956_v26  ;;  %v6466_v17 = vld [vmem:[%s4134_s25 + $0x2c8] sm:$0xff] }
 0x29f   : > { %v2149_v24 = vand.u32 2139095040, %v1957_v32  ;;  %vm1342_vm6 = vweird.f32 %v3737_v48  ;;  %vm6441_vm7 = vcmp.lt.f32.partialorder %v1573_v22, 0.5  ;;  %v1570_v37 = vand.u32 2147483647, %v1474_v51 }
 0x2a0   : > { %3206 = vst [vmem:[%s4653_s19 + $0x290] sm:$0xff] %v3014_v5  ;;  %v1571_v43 = vand.u32 2147483647, %v1475_v54  ;;  %v1340_v39 = vadd.f32 %v3737_v48, %v1339_v42  ;;  %v2340_v58 = vmax.f32 %v2148_v41, 1.0  ;;  %v1330_v29 = vand.u32 2147483647, %v6418_v23  ;;  %vm1343_vm8 = vmor %vm1341_vm2, %vm1342_vm6 }
 0x2a1   : > { %3207 = vst [vmem:[%s4653_s19 + $0x298] sm:$0xff] %v3015_v31  ;;  %v2341_v14 = vmax.f32 %v2149_v24, 1.0  ;;  %v6448_v56 = vadd.f32 %v6383_v20, %v6331_v47  ;;  %v3739_v3 = vpop.eup %3738  ;;  %v1762_v19 = vmax.f32 %v1570_v37, 0.0001  ;;  %vm1326_vm9 = vweird.f32 %v6418_v23 }
 0x2a2   : > { %v1763_v28 = vmax.f32 %v1571_v43, 0.0001  ;;  %v1332_v22 = vand.u32 2147483648, %v6418_v23  ;;  %v2436_v10 = vsel %vm6436_vm4, 0.0, %v2340_v58  ;;  %v1344_v7 = vsel %vm1343_vm8, %v3737_v48, %v1340_v39 }
 0x2a3   : > { %v2437_v40 = vsel %vm6441_vm7, 0.0, %v2341_v14  ;;  %v1322_v47 = vmul.f32 %v3739_v3, %v6418_v23  ;;  %v2532_v20 = vmin.f32 %v2436_v10, 64.0  ;;  %v1858_v33 = vmin.f32 %v1762_v19, 10000.0  ;;  %v6482_v19 = vld [vmem:[%s4134_s25 + $0x2b0] sm:$0xff]  ;;  %v6487_v10 = vld [vmem:[%s4134_s25 + $0x2b8] sm:$0xff] }
 0x2a4   : > { %v2533_v49 = vmin.f32 %v2437_v40, 64.0  ;;  %v1859_v0 = vmin.f32 %v1763_v28, 10000.0  ;;  %v1349_v4 = vsel %vm6424_vm3, %v1348_v13, %v1344_v7  ;;  %vm1327_vm10 = vweird.f32 %v3739_v3 }
 0x2a5   : > { %v1323_v61 = vsub.f32 1.0, %v1322_v47  ;;  %v622_v46 = vmax.f32 %v6372_v45, 1e-05  ;;  %v2628_v63 = vmul.f32 %v2532_v20, %v6312_v55  ;;  %v1954_v38 = vmul.f32 1.3333334, %v1858_v33  ;;  %vm1328_vm11 = vmor %vm1326_vm9, %vm1327_vm10 }
 0x2a6   : > { %v2629_v27 = vmul.f32 %v2533_v49, %v6312_v55  ;;  %v1955_v48 = vmul.f32 1.3333334, %v1859_v0  ;;  %v1484_v50 = vmul.f32 %v6315_v36, %v1349_v4  ;;  %v1485_v12 = vmul.f32 %v6466_v17, %v1349_v4 }
 0x2a7   : > { %v1324_v16 = vmul.f32 %v3739_v3, %v1323_v61  ;;  %v6469_v25 = vmin.f32 %v622_v46, 10000.0  ;;  %v7235_v53 = vand.u32 2147483648, %v5897_v34  ;;  %v7237_v57 = vand.u32 2147483648, %v7236_v59 }
 0x2a8   : > { %v2146_v55 = vand.u32 2139095040, %v1954_v38  ;;  %v2147_v62 = vand.u32 2139095040, %v1955_v48  ;;  %v1580_v31 = vand.u32 2147483647, %v1484_v50  ;;  %v1581_v26 = vand.u32 2147483647, %v1485_v12  ;;  %v528_v12 = vpop.xlane.xlu1 %527 }
 0x2a9   : > { %v3012_v45 = vor.u32 %v7235_v53, %v2628_v63  ;;  %v3013_v5 = vor.u32 %v7237_v57, %v2629_v27  ;;  %v1325_v32 = vadd.f32 %v3739_v3, %v1324_v16  ;;  %3740 = vrcp.f32 %v6469_v25  ;;  %v531_v27 = vpop.xlane.xlu2 %530 }
 0x2aa   : > { %v2338_v51 = vmax.f32 %v2146_v55, 1.0  ;;  %v2339_v54 = vmax.f32 %v2147_v62, 1.0  ;;  %vm1331_vm12 = vcmp.eq.f32.partialorder %v1330_v29, 8.507059e+37  ;;  %v1333_v34 = vor.u32 1.1754944e-38, %v1332_v22 }
 0x2ab   : > { %3204 = vst [vmem:[%s4653_s19 + $0x280] sm:$0xff] %v3012_v45  ;;  %vm1666_vm13 = vcmp.lt.f32.partialorder %v1570_v37, 0.5  ;;  %vm1667_vm14 = vcmp.lt.f32.partialorder %v1571_v43, 0.5  ;;  %v1772_v42 = vmax.f32 %v1580_v31, 0.0001  ;;  %v1329_v13 = vsel %vm1328_vm11, %v3739_v3, %v1325_v32 }
 0x2ac   : > { %3205 = vst [vmem:[%s4653_s19 + $0x288] sm:$0xff] %v3013_v5  ;;  %v2434_v52 = vsel %vm1666_vm13, 0.0, %v2338_v51  ;;  %v2435_v41 = vsel %vm1667_vm14, 0.0, %v2339_v54  ;;  %v1773_v24 = vmax.f32 %v1581_v26, 0.0001  ;;  %v1334_v9 = vsel %vm1331_vm12, %v1333_v34, %v1329_v13 }
 0x2ad   : > { %v2530_v39 = vmin.f32 %v2434_v52, 64.0  ;;  %v2531_v58 = vmin.f32 %v2435_v41, 64.0  ;;  %v1868_v14 = vmin.f32 %v1772_v42, 10000.0  ;;  %v1482_v28 = vmul.f32 %v6482_v19, %v1334_v9 }
 0x2ae   : > { %v2829_v29 = vand.u32 2147483648, %v6466_v17  ;;  %v1869_v22 = vmin.f32 %v1773_v24, 10000.0  ;;  %v1483_v37 = vmul.f32 %v6487_v10, %v1334_v9  ;;  %v1315_v43 = vand.u32 2147483647, %v6469_v25 }
 0x2af   : > { %v3741_v3 = vpop.eup %3740  ;;  %v2626_v40 = vmul.f32 %v2530_v39, %v6344_v8  ;;  %v2627_v7 = vmul.f32 %v2531_v58, %v6344_v8  ;;  %v1964_v47 = vmul.f32 1.3333334, %v1868_v14  ;;  %v1578_v20 = vand.u32 2147483647, %v1482_v28 }
 0x2b0   : > { %vm1311_vm15 = vweird.f32 %v6469_v25  ;;  %vm6494_vm0 = vcmp.lt.f32.partialorder %v1580_v31, 0.5  ;;  %v1965_v33 = vmul.f32 1.3333334, %v1869_v22  ;;  %v1579_v0 = vand.u32 2147483647, %v1483_v37 }
 0x2b1   : > { %v1307_v4 = vmul.f32 %v3741_v3, %v6469_v25  ;;  %v3010_v61 = vor.u32 %v2818_v6, %v2626_v40  ;;  %v3011_v8 = vor.u32 %v2819_v21, %v2627_v7  ;;  %vm6503_vm1 = vcmp.lt.f32.partialorder %v1581_v26, 0.5  ;;  %v6538_v7 = vld [vmem:[%s4134_s25 + $0x2a0] sm:$0xff] }
 0x2b2   : > { %v2156_v63 = vand.u32 2139095040, %v1964_v47  ;;  %v2157_v38 = vand.u32 2139095040, %v1965_v33  ;;  %v1770_v48 = vmax.f32 %v1578_v20, 0.0001  ;;  %v1771_v50 = vmax.f32 %v1579_v0, 0.0001 }
 0x2b3   : > { %vm6507_vm2 = vcmp.eq.f32.partialorder %v1315_v43, 8.507059e+37  ;;  %3202 = vst [vmem:[%s4653_s19 + $0x270] sm:$0xff] %v3010_v61  ;;  %v1308_v6 = vsub.f32 1.0, %v1307_v4  ;;  %vm1312_vm3 = vweird.f32 %v3741_v3  ;;  %v1317_v2 = vand.u32 2147483648, %v6469_v25  ;;  %v7248_v61 = vld [vmem:[#allocation54_spill] sm:$0xff] }
 0x2b4   : > { %v2348_v30 = vmax.f32 %v2156_v63, 1.0  ;;  %3203 = vst [vmem:[%s4653_s19 + $0x278] sm:$0xff] %v3011_v8  ;;  %v2349_v21 = vmax.f32 %v2157_v38, 1.0  ;;  %v1866_v16 = vmin.f32 %v1770_v48, 10000.0  ;;  %v1867_v53 = vmin.f32 %v1771_v50, 10000.0  ;;  %vm1313_vm7 = vmor %vm1311_vm15, %vm1312_vm3  ;;  %v525_v48 = vpop.xlane.xlu0 %524 }
 0x2b5   : > { %v579_v45 = vmul.f32 0.0078125, %v531_v27  ;;  %vm6516_vm4 = vcmp.lt.f32.partialorder %v1578_v20, 0.5  ;;  %v1309_v5 = vmul.f32 %v3741_v3, %v1308_v6  ;;  %v578_v55 = vmul.f32 0.0078125, %v528_v12  ;;  %v6542_v20 = vld [vmem:[%s4134_s25 + $0x2a8] sm:$0xff] }
 0x2b6   : > { %v2444_v59 = vsel %vm6494_vm0, 0.0, %v2348_v30  ;;  %v2445_v62 = vsel %vm6503_vm1, 0.0, %v2349_v21  ;;  %v1962_v26 = vmul.f32 1.3333334, %v1866_v16  ;;  %v1963_v32 = vmul.f32 1.3333334, %v1867_v53 }
 0x2b7   : > { %v2540_v31 = vmin.f32 %v2444_v59, 64.0  ;;  %v2541_v51 = vmin.f32 %v2445_v62, 64.0  ;;  %vm6522_vm6 = vcmp.lt.f32.partialorder %v1579_v0, 0.5  ;;  %v1310_v34 = vadd.f32 %v3741_v3, %v1309_v5  ;;  %v7249_v59 = vld [vmem:[#allocation53_spill] sm:$0xff] }
 0x2b8   : > { %v627_v42 = vmax.f32 %v579_v45, 1e-05  ;;  %v2154_v52 = vand.u32 2139095040, %v1962_v26  ;;  %v2155_v41 = vand.u32 2139095040, %v1963_v32  ;;  %v1318_v24 = vor.u32 1.1754944e-38, %v1317_v2 }
 0x2b9   : > { %v2636_v13 = vmul.f32 %v2540_v31, %v6370_v44  ;;  %v2637_v9 = vmul.f32 %v2541_v51, %v6370_v44  ;;  %v1314_v39 = vsel %vm1313_vm7, %v3741_v3, %v1310_v34  ;;  %v626_v14 = vmax.f32 %v578_v55, 1e-05 }
 0x2ba   : > { %v6531_v58 = vmin.f32 %v627_v42, 10000.0  ;;  %v2346_v22 = vmax.f32 %v2154_v52, 1.0  ;;  %v2347_v37 = vmax.f32 %v2155_v41, 1.0  ;;  %v1319_v43 = vsel %vm6507_vm2, %v1318_v24, %v1314_v39 }
 0x2bb   : > { %v3020_v28 = vor.u32 %v2828_v18, %v2636_v13  ;;  %v3021_v40 = vor.u32 %v2829_v29, %v2637_v9  ;;  %v1480_v47 = vmul.f32 %v6538_v7, %v1319_v43  ;;  %v1481_v3 = vmul.f32 %v6542_v20, %v1319_v43 }
 0x2bc   : > { %3742 = vrcp.f32 %v6531_v58  ;;  %v2826_v36 = vand.u32 2147483648, %v6482_v19  ;;  %v2827_v18 = vand.u32 2147483648, %v6487_v10  ;;  %v2442_v49 = vsel %vm6516_vm4, 0.0, %v2346_v22 }
 0x2bd   : > { %3212 = vst [vmem:[%s4653_s19 + $0x2c0] sm:$0xff] %v3020_v28  ;;  %v2443_v29 = vsel %vm6522_vm6, 0.0, %v2347_v37  ;;  %v2538_v33 = vmin.f32 %v2442_v49, 64.0  ;;  %v1576_v4 = vand.u32 2147483647, %v1480_v47  ;;  %v3377_v8 = vmul.f32 %v7248_v61, %v6469_v25  ;;  %v6594_v49 = vld [vmem:[%s4134_s25 + $0x2f8] sm:$0xff] }
 0x2be   : > { %3213 = vst [vmem:[%s4653_s19 + $0x2c8] sm:$0xff] %v3021_v40  ;;  %v2539_v0 = vmin.f32 %v2443_v29, 64.0  ;;  %v1577_v46 = vand.u32 2147483647, %v1481_v3  ;;  %v6556_v63 = vmin.f32 %v626_v14, 10000.0  ;;  %v2824_v2 = vand.u32 2147483648, %v6538_v7 }
 0x2bf   : > { %v2634_v19 = vmul.f32 %v2538_v33, %v6418_v23  ;;  %v1768_v27 = vmax.f32 %v1576_v4, 0.0001  ;;  %v3392_v6 = vadd.f32 %v6448_v56, %v3377_v8  ;;  %v1390_v53 = vand.u32 2147483647, %v6531_v58 }
 0x2c0   : > { %v2635_v10 = vmul.f32 %v2539_v0, %v6418_v23  ;;  %v1769_v38 = vmax.f32 %v1577_v46, 0.0001  ;;  %3744 = vrcp.f32 %v6556_v63  ;;  %v2825_v45 = vand.u32 2147483648, %v6542_v20 }
 0x2c1   : > { %v3018_v17 = vor.u32 %v2826_v36, %v2634_v19  ;;  %v1864_v30 = vmin.f32 %v1768_v27, 10000.0  ;;  %v3378_v57 = vmul.f32 %v7249_v59, %v6418_v23  ;;  %v577_v55 = vmul.f32 0.0078125, %v525_v48  ;;  %v6590_v36 = vld [vmem:[%s4134_s25 + $0x2f0] sm:$0xff] }
 0x2c2   : > { %v3743_v50 = vpop.eup %3742  ;;  %v3019_v12 = vor.u32 %v2827_v18, %v2635_v10  ;;  %v1865_v21 = vmin.f32 %v1769_v38, 10000.0  ;;  %v3379_v62 = vmul.f32 %v5045_v11, %v6370_v44  ;;  %v1392_v26 = vand.u32 2147483648, %v6531_v58 }
 0x2c3   : > { %v1382_v16 = vmul.f32 %v3743_v50, %v6531_v58  ;;  %3210 = vst [vmem:[%s4653_s19 + $0x2b0] sm:$0xff] %v3018_v17  ;;  %v1960_v5 = vmul.f32 1.3333334, %v1864_v30  ;;  %v3393_v51 = vadd.f32 %v3392_v6, %v3378_v57  ;;  %vm1386_vm8 = vweird.f32 %v6531_v58  ;;  %v6608_v6 = vld [vmem:[%s4134_s25 + $0x2e0] sm:$0xff] }
 0x2c4   : > { %3211 = vst [vmem:[%s4653_s19 + $0x2b8] sm:$0xff] %v3019_v12  ;;  %v1961_v56 = vmul.f32 1.3333334, %v1865_v21  ;;  %v625_v54 = vmax.f32 %v577_v55, 1e-05  ;;  %vm1387_vm9 = vweird.f32 %v3743_v50  ;;  %vm6574_vm10 = vcmp.eq.f32.partialorder %v1390_v53, 8.507059e+37 }
 0x2c5   : > { %v1383_v31 = vsub.f32 1.0, %v1382_v16  ;;  %v2152_v32 = vand.u32 2139095040, %v1960_v5  ;;  %vm1672_vm11 = vcmp.lt.f32.partialorder %v1576_v4, 0.5  ;;  %vm1673_vm12 = vcmp.lt.f32.partialorder %v1577_v46, 0.5  ;;  %vm1388_vm13 = vmor %vm1386_vm8, %vm1387_vm9  ;;  %v6612_v21 = vld [vmem:[%s4134_s25 + $0x2e8] sm:$0xff] }
 0x2c6   : > { %v3745_v34 = vpop.eup %3744  ;;  %v2153_v42 = vand.u32 2139095040, %v1961_v56  ;;  %v6579_v52 = vmin.f32 %v625_v54, 10000.0  ;;  %v1393_v9 = vor.u32 1.1754944e-38, %v1392_v26  ;;  %v1375_v28 = vand.u32 2147483647, %v6556_v63 }
 0x2c7   : > { %v1384_v13 = vmul.f32 %v3743_v50, %v1383_v31  ;;  %v2344_v11 = vmax.f32 %v2152_v32, 1.0  ;;  %v1367_v44 = vmul.f32 %v3745_v34, %v6556_v63  ;;  %v1377_v40 = vand.u32 2147483648, %v6556_v63 }
 0x2c8   : > { %v2345_v41 = vmax.f32 %v2153_v42, 1.0  ;;  %3746 = vrcp.f32 %v6579_v52  ;;  %vm1372_vm14 = vweird.f32 %v3745_v34  ;;  %v3394_v33 = vadd.f32 %v3393_v51, %v3379_v62 }
 0x2c9   : > { %v1385_v24 = vadd.f32 %v3743_v50, %v1384_v13  ;;  %v2440_v39 = vsel %vm1672_vm11, 0.0, %v2344_v11  ;;  %v1368_v14 = vsub.f32 1.0, %v1367_v44  ;;  %vm1371_vm15 = vweird.f32 %v6556_v63 }
 0x2ca   : > { %v2441_v22 = vsel %vm1673_vm12, 0.0, %v2345_v41  ;;  %v2536_v37 = vmin.f32 %v2440_v39, 64.0  ;;  %v3380_v61 = vmul.f32 %v5162_v1, %v6579_v52  ;;  %vm1373_vm0 = vmor %vm1371_vm15, %vm1372_vm14  ;;  %v1378_v10 = vor.u32 1.1754944e-38, %v1377_v40 }
 0x2cb   : > { %v1389_v43 = vsel %vm1388_vm13, %v3743_v50, %v1385_v24  ;;  %v2537_v7 = vmin.f32 %v2441_v22, 64.0  ;;  %v1369_v20 = vmul.f32 %v3745_v34, %v1368_v14  ;;  %vm1376_vm1 = vcmp.eq.f32.partialorder %v1375_v28, 8.507059e+37 }
 0x2cc   : > { %v1394_v47 = vsel %vm6574_vm10, %v1393_v9, %v1389_v43  ;;  %v2632_v3 = vmul.f32 %v2536_v37, %v6469_v25  ;;  %v3395_v50 = vadd.f32 %v3394_v33, %v3380_v61  ;;  %v3382_v17 = vmul.f32 %v5245_v60, %v6531_v58  ;;  %v3851_v33 = vld [vmem:[%s4134_s25 + $0x2d0] sm:$0xff] }
 0x2cd   : > { %v1490_v18 = vmul.f32 %v6590_v36, %v1394_v47  ;;  %v1491_v29 = vmul.f32 %v6594_v49, %v1394_v47  ;;  %v2633_v0 = vmul.f32 %v2537_v7, %v6469_v25  ;;  %v1370_v4 = vadd.f32 %v3745_v34, %v1369_v20 }
 0x2ce   : > { %v3016_v8 = vor.u32 %v2824_v2, %v2632_v3  ;;  %v3747_v27 = vpop.eup %3746  ;;  %v3381_v1 = vmul.f32 %v5014_v15, %v6556_v63  ;;  %v1360_v59 = vand.u32 2147483647, %v6579_v52  ;;  %v1362_v60 = vand.u32 2147483648, %v6579_v52 }
 0x2cf   : > { %v1586_v46 = vand.u32 2147483647, %v1490_v18  ;;  %v1587_v19 = vand.u32 2147483647, %v1491_v29  ;;  %v3017_v38 = vor.u32 %v2825_v45, %v2633_v0  ;;  %v1374_v48 = vsel %vm1373_vm0, %v3745_v34, %v1370_v4  ;;  %v3852_v4 = vld [vmem:[%s4134_s25 + $0x2d8] sm:$0xff] }
 0x2d0   : > { %3208 = vst [vmem:[%s4653_s19 + $0x2a0] sm:$0xff] %v3016_v8  ;;  %v1379_v12 = vsel %vm1376_vm1, %v1378_v10, %v1374_v48  ;;  %v1352_v53 = vmul.f32 %v3747_v27, %v6579_v52  ;;  %v3396_v57 = vadd.f32 %v3395_v50, %v3381_v1  ;;  %v2834_v56 = vand.u32 2147483648, %v6590_v36 }
 0x2d1   : > { %v1778_v25 = vmax.f32 %v1586_v46, 0.0001  ;;  %3209 = vst [vmem:[%s4653_s19 + $0x2a8] sm:$0xff] %v3017_v38  ;;  %v1779_v30 = vmax.f32 %v1587_v19, 0.0001  ;;  %v1488_v2 = vmul.f32 %v6608_v6, %v1379_v12  ;;  %v1489_v16 = vmul.f32 %v6612_v21, %v1379_v12 }
 0x2d2   : > { %v1353_v62 = vsub.f32 1.0, %v1352_v53  ;;  %v2835_v31 = vand.u32 2147483648, %v6594_v49  ;;  %v3397_v32 = vadd.f32 %v3396_v57, %v3382_v17  ;;  %vm1356_vm2 = vweird.f32 %v6579_v52 }
 0x2d3   : > { %v1874_v45 = vmin.f32 %v1778_v25, 10000.0  ;;  %v1875_v5 = vmin.f32 %v1779_v30, 10000.0  ;;  %v1584_v15 = vand.u32 2147483647, %v1488_v2  ;;  %v1585_v55 = vand.u32 2147483647, %v1489_v16 }
 0x2d4   : > { %vm1357_vm3 = vweird.f32 %v3747_v27  ;;  %v1354_v13 = vmul.f32 %v3747_v27, %v1353_v62  ;;  %v3398_v23 = vrot.slane %v3397_v32, 4  ;;  %vm6621_vm4 = vcmp.eq.f32.partialorder %v1360_v59, 8.507059e+37 }
 0x2d5   : > { %v1970_v26 = vmul.f32 1.3333334, %v1874_v45  ;;  %v1971_v51 = vmul.f32 1.3333334, %v1875_v5  ;;  %v1776_v54 = vmax.f32 %v1584_v15, 0.0001  ;;  %vm1358_vm8 = vmor %vm1356_vm2, %vm1357_vm3 }
 0x2d6   : > { %v1777_v42 = vmax.f32 %v1585_v55, 0.0001  ;;  %v1363_v24 = vor.u32 1.1754944e-38, %v1362_v60  ;;  %v1355_v14 = vadd.f32 %v3747_v27, %v1354_v13  ;;  %v3399_v28 = vadd.f32 %v3398_v23, %v3397_v32 }
 0x2d7   : > { %v2162_v34 = vand.u32 2139095040, %v1970_v26  ;;  %v2163_v11 = vand.u32 2139095040, %v1971_v51  ;;  %v1872_v44 = vmin.f32 %v1776_v54, 10000.0  ;;  %vm1682_vm6 = vcmp.lt.f32.partialorder %v1586_v46, 0.5 }
 0x2d8   : > { %v1873_v39 = vmin.f32 %v1777_v42, 10000.0  ;;  %vm1683_vm7 = vcmp.lt.f32.partialorder %v1587_v19, 0.5  ;;  %v1359_v7 = vsel %vm1358_vm8, %v3747_v27, %v1355_v14  ;;  %v3400_v47 = vrot.slane %v3399_v28, 2 }
 0x2d9   : > { %v2354_v9 = vmax.f32 %v2162_v34, 1.0  ;;  %v2355_v22 = vmax.f32 %v2163_v11, 1.0  ;;  %v1968_v37 = vmul.f32 1.3333334, %v1872_v44  ;;  %v1364_v18 = vsel %vm6621_vm4, %v1363_v24, %v1359_v7 }
 0x2da   : > { %v1969_v40 = vmul.f32 1.3333334, %v1873_v39  ;;  %v1486_v0 = vmul.f32 %v3851_v33, %v1364_v18  ;;  %v1487_v61 = vmul.f32 %v3852_v4, %v1364_v18  ;;  %vm1680_vm9 = vcmp.lt.f32.partialorder %v1584_v15, 0.5 }
 0x2db   : > { %v2450_v43 = vsel %vm1682_vm6, 0.0, %v2354_v9  ;;  %v2451_v20 = vsel %vm1683_vm7, 0.0, %v2355_v22  ;;  %v2160_v36 = vand.u32 2139095040, %v1968_v37  ;;  %v3401_v19 = vadd.f32 %v3400_v47, %v3399_v28 }
 0x2dc   : > { %v2546_v3 = vmin.f32 %v2450_v43, 64.0  ;;  %v2547_v49 = vmin.f32 %v2451_v20, 64.0  ;;  %v2161_v29 = vand.u32 2139095040, %v1969_v40  ;;  %v1582_v38 = vand.u32 2147483647, %v1486_v0 }
 0x2dd   : > { %v2352_v46 = vmax.f32 %v2160_v36, 1.0  ;;  %v1583_v48 = vand.u32 2147483647, %v1487_v61  ;;  %vm1681_vm10 = vcmp.lt.f32.partialorder %v1585_v55, 0.5  ;;  %v3402_v17 = vrot.slane %v3401_v19, 1 }
 0x2de   : > { %v2642_v8 = vmul.f32 %v2546_v3, %v6531_v58  ;;  %v2643_v10 = vmul.f32 %v2547_v49, %v6531_v58  ;;  %v2353_v27 = vmax.f32 %v2161_v29, 1.0  ;;  %v2832_v12 = vand.u32 2147483648, %v6608_v6 }
 0x2df   : > { %v2448_v25 = vsel %vm1680_vm9, 0.0, %v2352_v46  ;;  %v2833_v16 = vand.u32 2147483648, %v6612_v21  ;;  %v1774_v53 = vmax.f32 %v1582_v38, 0.0001  ;;  %v3403_v45 = vadd.f32 %v3402_v17, %v3401_v19 }
 0x2e0   : > { %v3026_v50 = vor.u32 %v2834_v56, %v2642_v8  ;;  %v3027_v1 = vor.u32 %v2835_v31, %v2643_v10  ;;  %v2449_v30 = vsel %vm1681_vm10, 0.0, %v2353_v27  ;;  %v2544_v2 = vmin.f32 %v2448_v25, 64.0 }
 0x2e1   : > { %v2545_v58 = vmin.f32 %v2449_v30, 64.0  ;;  %v1775_v60 = vmax.f32 %v1583_v48, 0.0001  ;;  %v1870_v5 = vmin.f32 %v1774_v53, 10000.0  ;;  %3404 = vst.msk [vmem:[%s5339_s5 + $0x2] sm:$0x1] %vm5290_vm5, %v3403_v45 }
 0x2e2   : > { %3218 = vst [vmem:[%s4653_s19 + $0x2f0] sm:$0xff] %v3026_v50  ;;  %v2640_v59 = vmul.f32 %v2544_v2, %v6556_v63  ;;  %vm1678_vm11 = vcmp.lt.f32.partialorder %v1582_v38, 0.5  ;;  %vm1679_vm12 = vcmp.lt.f32.partialorder %v1583_v48, 0.5  ;;  %v2830_v35 = vand.u32 2147483648, %v3851_v33 }
 0x2e3   : > { %3219 = vst [vmem:[%s4653_s19 + $0x2f8] sm:$0xff] %v3027_v1  ;;  %v2641_v57 = vmul.f32 %v2545_v58, %v6556_v63  ;;  %v1871_v15 = vmin.f32 %v1775_v60, 10000.0  ;;  %v1966_v62 = vmul.f32 1.3333334, %v1870_v5  ;;  %v2831_v34 = vand.u32 2147483648, %v3852_v4 }
 0x2e4   : > { %v3024_v6 = vor.u32 %v2832_v12, %v2640_v59 }
 0x2e5   : > { %v3025_v55 = vor.u32 %v2833_v16, %v2641_v57  ;;  %v1967_v21 = vmul.f32 1.3333334, %v1871_v15  ;;  %v2158_v56 = vand.u32 2139095040, %v1966_v62 }
 0x2e6   : > { %3216 = vst [vmem:[%s4653_s19 + $0x2e0] sm:$0xff] %v3024_v6 }
 0x2e7   : > { %3217 = vst [vmem:[%s4653_s19 + $0x2e8] sm:$0xff] %v3025_v55  ;;  %v2159_v31 = vand.u32 2139095040, %v1967_v21  ;;  %v2350_v26 = vmax.f32 %v2158_v56, 1.0 }
 0x2e9   : > { %v2351_v63 = vmax.f32 %v2159_v31, 1.0  ;;  %v2446_v32 = vsel %vm1678_vm11, 0.0, %v2350_v26 }
 0x2ea   : > { %v2542_v54 = vmin.f32 %v2446_v32, 64.0 }
 0x2eb   : > { %v2447_v51 = vsel %vm1679_vm12, 0.0, %v2351_v63 }
 0x2ec   : > { %v2543_v42 = vmin.f32 %v2447_v51, 64.0  ;;  %v2638_v13 = vmul.f32 %v2542_v54, %v6579_v52 }
 0x2ee   : > { %v2639_v23 = vmul.f32 %v2543_v42, %v6579_v52  ;;  %v3022_v11 = vor.u32 %v2830_v35, %v2638_v13  ;;  %3417 = sbr.rel (!%p4069_p9) target bundleno = 786 (0x312), region = 32 }
 0x2f0   : > { %v3023_v44 = vor.u32 %v2831_v34, %v2639_v23  ;;  %3214 = vst [vmem:[%s4653_s19 + $0x2d0] sm:$0xff] %v3022_v11 }
 0x2f2   : > { %3215 = vst [vmem:[%s4653_s19 + $0x2d8] sm:$0xff] %v3023_v44 }
 0x2f3   : > { %s7264_s27 = smov (!%p3420_p6, %s3419_s27), 48 }
 0x2f4   : > { %s3594_s28 = sshll.u32 %s7264_s27, 4 }
 0x2f5   : > { %s3424_s30 = ssub.s32 768, %s3594_s28 }
 0x2f6   : > { %s3425_s4 = sshll.u32 %s3424_s30, 4 }
 0x2f7   : > { %3426 = vsyncadd %s3406_s6, %s3425_s4  ;;  %p6659_p11 = scmp.ne.s32.totalorder %s3594_s28, 0  ;;  %s3598_s8 = smul.u32 768, %s4046_s13 }
 0x2f8   : > { %s3432_s14 = sshll.u32 %s4653_s19, 4  ;;  %s3588_s17 = sshll.u32 %s7264_s27, 8  ;;  %s6669_s14 = int_to_ptr.vmem [resolvable:$true] %s3432_s14 }
 0x2f9   : > { %s3430_s3 = scalar_lea.hbm %s6731_s1, %s3598_s8  ;;  %s3892_s29 = sshra.s32 %s6669_s14, 4  ;;  %s3893_s29 = int_to_ptr.vmem [resolvable:$true] %s3892_s29 }
 0x2fa   : > { %s3434_s25 = sshll.u32 %s3430_s3, 4  ;;  %s3894_s26 = sshrl.u32 %s3588_s17, 4  ;;  %s6671_s25 = int_to_ptr.hbm [resolvable:$true] %s3434_s25 }
 0x2fb   : > { %s3899_s28 = scalar_lea.vmem %s3893_s29, %s3894_s26  ;;  %s4007_s19 = smov [#allocation5]  }
 0x2fc   : > { %p3900_p13 = scmp.ne.s32.totalorder %s3893_s29, %s3899_s28  ;;  %s3903_s30 = scalar_lea.vmem %s4007_s19, 1536 }
 0x2fd   : > { %p3905_p8 = scmp.lt.s32.totalorder %s3903_s30, %s3899_s28 }
 0x2fe   : > { %p3901_p5 = pnand %p3900_p13, %p6659_p11 }
 0x300   : > { %p3902_p7 = pneg %p3901_p5 }
 0x302   : > { %p3907_p12 = pnand %p3905_p8, %p3902_p7 }
 0x304   : > { %3910 = shalt.err (!%p3907_p12)
}
 0x305   : > { %s3911_s4 = sshra.s32 %s6671_s25, 4  ;;  %s3922_s3 = scalar_lea.hbm %s6731_s1, 1040  ;;  %s3912_s4 = int_to_ptr.hbm [resolvable:$true] %s3911_s4 }
 0x306   : > { %s3918_s8 = scalar_lea.hbm %s3912_s4, %s3894_s26  ;;  %p3923_p3 = scmp.lt.s32.totalorder %s3912_s4, %s6731_s1 }
 0x307   : > { %p3919_p0 = scmp.ne.s32.totalorder %s3912_s4, %s3918_s8  ;;  %p3924_p4 = scmp.lt.s32.totalorder %s3922_s3, %s3918_s8 }
 0x309   : > { %p3920_p1 = pnand %p3919_p0, %p6659_p11  ;;  %p3925_p6 = por %p3924_p4, %p3923_p3 }
 0x30b   : > { %p3921_p2 = pneg %p3920_p1 }
 0x30d   : > { %p3926_p13 = pnand %p3925_p6, %p3921_p2 }
 0x30f   : > { %3929 = shalt.err (!%p3926_p13)
}
 0x310   : > { %s4008_s28 = smov 256   ;;  %s4009_s26 = smov 16  }
 0x311   : > { %3440 = dma.vmem_to_hbm [thread:$0]  (%p6659_p11), %s6669_s14, %s3588_s17, %s6671_s25, %s3406_s6, %s4008_s28, %s4008_s28, %s4009_s26  }
 0x312 PF: > { %s3602_s16 = smul.u32 3, %s4046_s13  ;;  %s3449_s19 = sshll.u32 %s5339_s5, 4  ;;  %s3450_s19 = int_to_ptr.vmem [resolvable:$true] %s3449_s19 }
 0x313   : > { %s3951_s7 = scalar_lea.hbm %s6732_s2, 6 }
 0x314   : > { %s3447_s8 = scalar_lea.hbm %s6732_s2, %s3602_s16 }
 0x315   : > { %s3451_s23 = sshll.u32 %s3447_s8, 4  ;;  %s3452_s23 = int_to_ptr.hbm [resolvable:$true] %s3451_s23 }
 0x316   : > { %s3945_s24 = sshra.s32 %s3452_s23, 4  ;;  %s3946_s24 = int_to_ptr.hbm [resolvable:$true] %s3945_s24 }
 0x317   : > { %s3947_s3 = scalar_lea.hbm %s3946_s24, 3  ;;  %p3952_p8 = scmp.lt.s32.totalorder %s3946_s24, %s6732_s2 }
 0x318   : > { %p3948_p5 = scmp.ne.s32.totalorder %s3946_s24, %s3947_s3  ;;  %p3953_p12 = scmp.lt.s32.totalorder %s3951_s7, %s3947_s3 }
 0x31a   : > { %p3949_p7 = pnand %p3948_p5, %p4069_p9  ;;  %p3954_p0 = por %p3953_p12, %p3952_p8 }
 0x31c   : > { %p3950_p11 = pneg %p3949_p7 }
 0x31e   : > { %p3955_p1 = pnand %p3954_p0, %p3950_p11 }
 0x320   : > { %3958 = shalt.err (!%p3955_p1)
}
 0x321   : > { %s7255_s14 = scalar_lea.sflag [#allocation7], %s4128_s22 }
 0x322   : > { %3604 = dma.vmem_to_hbm [thread:$0]  (%p4069_p9), %s3450_s19, 48, %s3452_s23, %s7255_s14  }
 0x323 PF: > { %s3463_s17 = sand.u32 1, %s3989_s9   ;;  %p7256_p2 = scmp.ge.s32.totalorder %s4001_s12, 2 }
 0x324   : > { %s3464_s25 = scalar_lea.sflag [#allocation4], %s3463_s17 }
 0x325   : > { %p3608_p3 = pnand %p7256_p2, %p4073_p10 }
 0x327   : > { %p3609_p4 = pneg %p3608_p3 }
 0x329   : > { %3980 = dma.done.wait (%p3609_p4), %s3464_s25, 12288  }
 0x32a   : > { %3982 = vsyncadd (%p3609_p4), %s3464_s25, 4294955008  ;;  %s3474_s29 = scalar_lea.sflag [#allocation7], %s3463_s17 }
 0x32b   : > { %3984 = dma.done.wait (%p3609_p4), %s3474_s29, 48  }
 0x32c   : > { %3986 = vsyncadd (%p3609_p4), %s3474_s29, 4294967248  ;;  %p19_p9 = scmp.ge.s32.totalorder %s4050_s15, 4   ;;  %s7257_s9 = smov %s3993_s10 }
 0x32d   : > { %s7258_s10 = smov %s3997_s11  ;;  %s7259_s11 = smov %s4062_s18 }
 0x32e   : > { %s7260_s12 = smov %s4050_s15  ;;  %21 = sbr.rel (!%p19_p9) target bundleno = 7 (0x7), region = 86 }
 0x333   :  { %3480 = vsyncpa [#allocation3], 1 }
 0x334   :  { %3482 = vsyncpa [#allocation3 + $0x1], 1 }
 0x335   :  { %3483 = vsyncpa [#allocation4], 1 }
 0x336   :  { %3485 = vsyncpa [#allocation4 + $0x1], 1 }
 0x337   :  { %3486 = vsyncpa [#allocation7], 1 }
 0x338   :  { %3488 = vsyncpa [#allocation7 + $0x1], 1 }

</bundles_post_ra>
